<compile_context>
chip_gen: v7x
topology: tpu7x:2x2x1
jax: 0.10.0
libtpu: 0.0.40
codegen_flags: <defaults>
</compile_context>

<pallas_src>
from functools import partial

import numpy as np
import jax
import jax.numpy as jnp
from jax import lax
from jax.experimental import pallas as pl
from jax.experimental.pallas import tpu as pltpu


def _conv3x3(x_act, masks_ref, w_ref, b_ref, *, cin, cout, H, W):
    """3x3 'same' conv on a (bt, cin, H*W) slab -> (bt, cout, H*W) in f32.

    w_ref:    (9, cout, cin) VMEM ref, tap-major (t = ky*3 + kx).
    b_ref:    (cout, 1)      VMEM ref.
    masks_ref:(9, H*W)       VMEM ref, 0/1 edge-validity mask per tap.
    """
    bt = x_act.shape[0]
    HW = H * W
    # Single dense accumulator, initialized with the (broadcast) bias.
    acc = jnp.broadcast_to(b_ref[...][None, :, :], (bt, cout, HW)).astype(jnp.float32)
    for t in range(9):
        dy, dx = t // 3 - 1, t % 3 - 1
        off = dy * W + dx                       # out[s] needs in[s + off]
        if off == 0:
            xs = x_act                          # center tap: no shift, all valid
        else:
            # Cyclic lane rotate (XLU) so xs[..., s] = x[..., (s + off) % HW],
            # then zero the lanes whose source fell outside the image.
            xs = pltpu.roll(x_act, (-off) % HW, 2)
            xs = xs * masks_ref[t:t + 1, :][None, :, :]          # (1,1,HW) bcast
        wt = w_ref[t]                           # (cout, cin) — tiny
        for c in range(cin):
            # (bt,1,HW) * (1,cout,1) -> (bt,cout,HW): fully dense FMA.
            acc = acc + xs[:, c:c + 1, :] * wt[:, c:c + 1][None, :, :]
    return acc


def _conv1x1(x, w_ref, b_ref, *, cin, cout):
    """1x1 conv on (bt, cin, H*W) -> (bt, cout, H*W) in f32. w_ref: (cout, cin)."""
    bt, _, HW = x.shape
    w = w_ref[...]
    acc = jnp.broadcast_to(b_ref[...][None, :, :], (bt, cout, HW)).astype(jnp.float32)
    for c in range(cin):
        acc = acc + x[:, c:c + 1, :] * w[:, c:c + 1][None, :, :]
    return acc


def _gblock_kernel(x_ref, masks_ref, w1_ref, b1_ref, w3a_ref, b3a_ref,
                   w3b_ref, b3b_ref, o_ref, *, cin, cout, H, W, use_1x1):
    x = x_ref[...].astype(jnp.float32)          # (bt, cin, HW)

    # Main branch: relu -> conv3x3 (cin->cout) -> relu -> conv3x3 (cout->cout).
    h = jnp.maximum(x, 0.0)
    h = _conv3x3(h, masks_ref, w3a_ref, b3a_ref, cin=cin, cout=cout, H=H, W=W)
    h = jnp.maximum(h, 0.0)
    h = _conv3x3(h, masks_ref, w3b_ref, b3b_ref, cin=cout, cout=cout, H=H, W=W)

    # Residual branch last (keeps conv temporaries' live ranges short).
    if use_1x1:
        res = _conv1x1(x, w1_ref, b1_ref, cin=cin, cout=cout)
    else:
        res = x

    o_ref[...] = (h + res).astype(o_ref.dtype)


def _tap_masks(H, W):
    """Static 0/1 validity mask per 3x3 tap, flattened over H*W (lane axis)."""
    hh, ww = np.meshgrid(np.arange(H), np.arange(W), indexing="ij")
    m = []
    for t in range(9):
        dy, dx = t // 3 - 1, t % 3 - 1
        valid = (hh + dy >= 0) & (hh + dy < H) & (ww + dx >= 0) & (ww + dx < W)
        m.append(valid.reshape(-1))
    return jnp.asarray(np.stack(m).astype(np.float32))          # (9, H*W)


def gblock_forward(x_nchw, params):
    """GBlock forward. x_nchw: (B, Cin, H, W) f32 -> (B, Cout, H, W) f32."""
    w1T, b1, w3aT, b3a, w3bT, b3b = params
    B, Cin, H, W = x_nchw.shape
    Cout = b3b.shape[0]
    HW = H * W
    use_1x1 = (Cin != Cout)

    x = x_nchw.reshape(B, Cin, HW)              # free contiguous reshape, NO transpose
    masks = _tap_masks(H, W)

    # Fold as much batch as possible into one grid step (amortize per-step overhead).
    bt = next(d for d in (8, 4, 2, 1) if B % d == 0)
    grid = (B // bt,)

    kernel = partial(_gblock_kernel, cin=Cin, cout=Cout, H=H, W=W, use_1x1=use_1x1)
    full2 = lambda i: (0, 0)    # noqa: E731
    full3 = lambda i: (0, 0, 0)  # noqa: E731

    out = pl.pallas_call(
        kernel,
        out_shape=jax.ShapeDtypeStruct((B, Cout, HW), x_nchw.dtype),
        grid_spec=pltpu.PrefetchScalarGridSpec(
            num_scalar_prefetch=0,
            grid=grid,
            in_specs=[
                pl.BlockSpec((bt, Cin, HW), lambda i: (i, 0, 0)),
                pl.BlockSpec(masks.shape, full2),
                pl.BlockSpec(w1T.shape, full2),
                pl.BlockSpec(b1.shape, full2),
                pl.BlockSpec(w3aT.shape, full3),
                pl.BlockSpec(b3a.shape, full2),
                pl.BlockSpec(w3bT.shape, full3),
                pl.BlockSpec(b3b.shape, full2),
            ],
            out_specs=pl.BlockSpec((bt, Cout, HW), lambda i: (i, 0, 0)),
        ),
        compiler_params=pltpu.CompilerParams(
            dimension_semantics=("parallel",)),
    )(x, masks, w1T, b1, w3aT, b3a, w3bT, b3b)

    return out.reshape(B, Cout, H, W)


def gblock_reference(x_nchw, w1_hwio, b1v, w3a_hwio, b3av, w3b_hwio, b3bv):
    """Pure-JAX reference (mirrors the PyTorch GBlock forward) for validation."""
    dn = ("NCHW", "HWIO", "NCHW")
    prec = lax.Precision.HIGHEST
    B, Cin, H, W = x_nchw.shape
    Cout = b3bv.shape[0]
    if Cin != Cout:
        res = lax.conv_general_dilated(x_nchw, w1_hwio, (1, 1), "VALID",
                                       dimension_numbers=dn, precision=prec)
        res = res + b1v.reshape(1, Cout, 1, 1)
    else:
        res = x_nchw
    h = jnp.maximum(x_nchw, 0.0)
    h = lax.conv_general_dilated(h, w3a_hwio, (1, 1), ((1, 1), (1, 1)),
                                 dimension_numbers=dn, precision=prec)
    h = h + b3av.reshape(1, Cout, 1, 1)
    h = jnp.maximum(h, 0.0)
    h = lax.conv_general_dilated(h, w3b_hwio, (1, 1), ((1, 1), (1, 1)),
                                 dimension_numbers=dn, precision=prec)
    h = h + b3bv.reshape(1, Cout, 1, 1)
    return h + res


def init_params(key, in_channel, out_channel):
    """Deterministic synthetic parameters (shapes match the torch module)."""
    k1, k2, k3, k4, k5, k6 = jax.random.split(key, 6)
    s1 = 1.0 / np.sqrt(in_channel)
    s3a = 1.0 / np.sqrt(9.0 * in_channel)
    s3b = 1.0 / np.sqrt(9.0 * out_channel)
    w1_hwio = s1 * jax.random.normal(k1, (1, 1, in_channel, out_channel), jnp.float32)
    b1 = s1 * jax.random.normal(k2, (out_channel,), jnp.float32)
    w3a_hwio = s3a * jax.random.normal(k3, (3, 3, in_channel, out_channel), jnp.float32)
    b3a = s3a * jax.random.normal(k4, (out_channel,), jnp.float32)
    w3b_hwio = s3b * jax.random.normal(k5, (3, 3, out_channel, out_channel), jnp.float32)
    b3b = s3b * jax.random.normal(k6, (out_channel,), jnp.float32)
    return w1_hwio, b1, w3a_hwio, b3a, w3b_hwio, b3b


def to_kernel_params(w1_hwio, b1, w3a_hwio, b3a, w3b_hwio, b3b):
    """Re-layout HWIO weights for the kernel: tap-major, (Cout, Cin) per tap."""
    Cin, Cout = w1_hwio.shape[2], w1_hwio.shape[3]
    w1T = jnp.transpose(w1_hwio[0, 0], (1, 0))                          # (Cout, Cin)
    w3aT = jnp.transpose(w3a_hwio, (0, 1, 3, 2)).reshape(9, Cout, Cin)  # (9,Cout,Cin)
    w3bT = jnp.transpose(w3b_hwio, (0, 1, 3, 2)).reshape(9, Cout, Cout)
    return (w1T, b1.reshape(Cout, 1), w3aT, b3a.reshape(Cout, 1),
            w3bT, b3b.reshape(Cout, 1))


if __name__ == "__main__":
    B, Cin, Cout, H, W = 2, 4, 8, 16, 16

    key = jax.random.PRNGKey(0)
    kx, kp = jax.random.split(key)
    x = jax.random.normal(kx, (B, Cin, H, W), jnp.float32)   # NCHW, like PyTorch

    w1_hwio, b1, w3a_hwio, b3a, w3b_hwio, b3b = init_params(kp, Cin, Cout)
    kparams = to_kernel_params(w1_hwio, b1, w3a_hwio, b3a, w3b_hwio, b3b)

    y = jax.block_until_ready(gblock_forward(x, kparams))
    y_ref = jax.block_until_ready(
        gblock_reference(x, w1_hwio, b1, w3a_hwio, b3a, w3b_hwio, b3b))

    assert y.shape == (B, Cout, H, W), y.shape
    max_err = float(jnp.max(jnp.abs(y - y_ref)))
    assert jnp.allclose(y, y_ref, atol=2e-4, rtol=2e-4), max_err

    print("KERNEL_OK")
</pallas_src>

<mosaic_0001>
module attributes {stable_mosaic.version = 11 : i64} {
  func.func @_gblock_kernel(%arg0: i32, %arg1: memref<2x4x256xf32, #tpu.memory_space<vmem>>, %arg2: memref<9x256xf32, #tpu.memory_space<vmem>>, %arg3: memref<8x4xf32, #tpu.memory_space<vmem>>, %arg4: memref<8x1xf32, #tpu.memory_space<vmem>>, %arg5: memref<9x8x4xf32, #tpu.memory_space<vmem>>, %arg6: memref<8x1xf32, #tpu.memory_space<vmem>>, %arg7: memref<9x8x8xf32, #tpu.memory_space<vmem>>, %arg8: memref<8x1xf32, #tpu.memory_space<vmem>>, %arg9: memref<2x8x256xf32, #tpu.memory_space<vmem>>) attributes {dimension_semantics = [#tpu.dimension_semantics<parallel>], iteration_bounds = array<i64: 1>, scalar_prefetch = 0 : i64, scratch_operands = 0 : i64, tpu.core_type = #tpu.core_type<tc>, window_params = [{transform_indices = @transform_0, window_bounds = array<i64: 2, 4, 256>}, {pipeline_mode = #tpu.pipeline_mode<synchronous>, transform_indices = @transform_1, window_bounds = array<i64: 9, 256>}, {pipeline_mode = #tpu.pipeline_mode<synchronous>, transform_indices = @transform_2, window_bounds = array<i64: 8, 4>}, {pipeline_mode = #tpu.pipeline_mode<synchronous>, transform_indices = @transform_3, window_bounds = array<i64: 8, 1>}, {pipeline_mode = #tpu.pipeline_mode<synchronous>, transform_indices = @transform_4, window_bounds = array<i64: 9, 8, 4>}, {pipeline_mode = #tpu.pipeline_mode<synchronous>, transform_indices = @transform_5, window_bounds = array<i64: 8, 1>}, {pipeline_mode = #tpu.pipeline_mode<synchronous>, transform_indices = @transform_6, window_bounds = array<i64: 9, 8, 8>}, {pipeline_mode = #tpu.pipeline_mode<synchronous>, transform_indices = @transform_7, window_bounds = array<i64: 8, 1>}, {transform_indices = @transform_8, window_bounds = array<i64: 2, 8, 256>}]} {
    %c0 = arith.constant 0 : index
    %c0_0 = arith.constant 0 : index
    %c0_1 = arith.constant 0 : index
    %0 = vector.load %arg1[%c0, %c0_0, %c0_1] : memref<2x4x256xf32, #tpu.memory_space<vmem>>, vector<2x4x256xf32>
    %cst = arith.constant 0.000000e+00 : f32
    %1 = vector.broadcast %cst : f32 to vector<2x4x256xf32>
    %2 = arith.maximumf %0, %1 : vector<2x4x256xf32>
    %c0_2 = arith.constant 0 : index
    %c0_3 = arith.constant 0 : index
    %3 = vector.load %arg6[%c0_2, %c0_3] : memref<8x1xf32, #tpu.memory_space<vmem>>, vector<8x1xf32>
    %4 = vector.shape_cast %3 : vector<8x1xf32> to vector<1x8x1xf32>
    %5 = vector.shape_cast %4 : vector<1x8x1xf32> to vector<1x8x1xf32>
    %6 = vector.broadcast %5 : vector<1x8x1xf32> to vector<2x8x256xf32>
    %c17_i32 = arith.constant 17 : i32
    %7 = tpu.dynamic_rotate %2 by %c17_i32 dim 2 : vector<2x4x256xf32>, i32 -> vector<2x4x256xf32>
    %c0_4 = arith.constant 0 : index
    %c0_5 = arith.constant 0 : index
    %8 = vector.load %arg2[%c0_4, %c0_5] : memref<9x256xf32, #tpu.memory_space<vmem>>, vector<1x256xf32>
    %9 = vector.shape_cast %8 : vector<1x256xf32> to vector<1x1x256xf32>
    %10 = vector.broadcast %9 : vector<1x1x256xf32> to vector<2x4x256xf32>
    %11 = arith.mulf %7, %10 : vector<2x4x256xf32>
    %c0_6 = arith.constant 0 : index
    %c0_7 = arith.constant 0 : index
    %c0_8 = arith.constant 0 : index
    %12 = vector.load %arg5[%c0_6, %c0_7, %c0_8] : memref<9x8x4xf32, #tpu.memory_space<vmem>>, vector<1x8x4xf32>
    %13 = vector.shape_cast %12 : vector<1x8x4xf32> to vector<8x4xf32>
    %14 = vector.extract_strided_slice %11 {offsets = [0, 0, 0], sizes = [2, 1, 256], strides = [1, 1, 1]} : vector<2x4x256xf32> to vector<2x1x256xf32>
    %15 = vector.extract_strided_slice %13 {offsets = [0, 0], sizes = [8, 1], strides = [1, 1]} : vector<8x4xf32> to vector<8x1xf32>
    %16 = vector.shape_cast %15 : vector<8x1xf32> to vector<1x8x1xf32>
    %17 = vector.broadcast %14 : vector<2x1x256xf32> to vector<2x8x256xf32>
    %18 = vector.broadcast %16 : vector<1x8x1xf32> to vector<2x8x256xf32>
    %19 = arith.mulf %17, %18 : vector<2x8x256xf32>
    %20 = arith.addf %6, %19 : vector<2x8x256xf32>
    %21 = vector.extract_strided_slice %11 {offsets = [0, 1, 0], sizes = [2, 1, 256], strides = [1, 1, 1]} : vector<2x4x256xf32> to vector<2x1x256xf32>
    %22 = vector.extract_strided_slice %13 {offsets = [0, 1], sizes = [8, 1], strides = [1, 1]} : vector<8x4xf32> to vector<8x1xf32>
    %23 = vector.shape_cast %22 : vector<8x1xf32> to vector<1x8x1xf32>
    %24 = vector.broadcast %21 : vector<2x1x256xf32> to vector<2x8x256xf32>
    %25 = vector.broadcast %23 : vector<1x8x1xf32> to vector<2x8x256xf32>
    %26 = arith.mulf %24, %25 : vector<2x8x256xf32>
    %27 = arith.addf %20, %26 : vector<2x8x256xf32>
    %28 = vector.extract_strided_slice %11 {offsets = [0, 2, 0], sizes = [2, 1, 256], strides = [1, 1, 1]} : vector<2x4x256xf32> to vector<2x1x256xf32>
    %29 = vector.extract_strided_slice %13 {offsets = [0, 2], sizes = [8, 1], strides = [1, 1]} : vector<8x4xf32> to vector<8x1xf32>
    %30 = vector.shape_cast %29 : vector<8x1xf32> to vector<1x8x1xf32>
    %31 = vector.broadcast %28 : vector<2x1x256xf32> to vector<2x8x256xf32>
    %32 = vector.broadcast %30 : vector<1x8x1xf32> to vector<2x8x256xf32>
    %33 = arith.mulf %31, %32 : vector<2x8x256xf32>
    %34 = arith.addf %27, %33 : vector<2x8x256xf32>
    %35 = vector.extract_strided_slice %11 {offsets = [0, 3, 0], sizes = [2, 1, 256], strides = [1, 1, 1]} : vector<2x4x256xf32> to vector<2x1x256xf32>
    %36 = vector.extract_strided_slice %13 {offsets = [0, 3], sizes = [8, 1], strides = [1, 1]} : vector<8x4xf32> to vector<8x1xf32>
    %37 = vector.shape_cast %36 : vector<8x1xf32> to vector<1x8x1xf32>
    %38 = vector.broadcast %35 : vector<2x1x256xf32> to vector<2x8x256xf32>
    %39 = vector.broadcast %37 : vector<1x8x1xf32> to vector<2x8x256xf32>
    %40 = arith.mulf %38, %39 : vector<2x8x256xf32>
    %41 = arith.addf %34, %40 : vector<2x8x256xf32>
    %c16_i32 = arith.constant 16 : i32
    %42 = tpu.dynamic_rotate %2 by %c16_i32 dim 2 : vector<2x4x256xf32>, i32 -> vector<2x4x256xf32>
    %c1 = arith.constant 1 : index
    %c0_9 = arith.constant 0 : index
    %43 = vector.load %arg2[%c1, %c0_9] : memref<9x256xf32, #tpu.memory_space<vmem>>, vector<1x256xf32>
    %44 = vector.shape_cast %43 : vector<1x256xf32> to vector<1x1x256xf32>
    %45 = vector.broadcast %44 : vector<1x1x256xf32> to vector<2x4x256xf32>
    %46 = arith.mulf %42, %45 : vector<2x4x256xf32>
    %c1_10 = arith.constant 1 : index
    %c0_11 = arith.constant 0 : index
    %c0_12 = arith.constant 0 : index
    %47 = vector.load %arg5[%c1_10, %c0_11, %c0_12] : memref<9x8x4xf32, #tpu.memory_space<vmem>>, vector<1x8x4xf32>
    %48 = vector.shape_cast %47 : vector<1x8x4xf32> to vector<8x4xf32>
    %49 = vector.extract_strided_slice %46 {offsets = [0, 0, 0], sizes = [2, 1, 256], strides = [1, 1, 1]} : vector<2x4x256xf32> to vector<2x1x256xf32>
    %50 = vector.extract_strided_slice %48 {offsets = [0, 0], sizes = [8, 1], strides = [1, 1]} : vector<8x4xf32> to vector<8x1xf32>
    %51 = vector.shape_cast %50 : vector<8x1xf32> to vector<1x8x1xf32>
    %52 = vector.broadcast %49 : vector<2x1x256xf32> to vector<2x8x256xf32>
    %53 = vector.broadcast %51 : vector<1x8x1xf32> to vector<2x8x256xf32>
    %54 = arith.mulf %52, %53 : vector<2x8x256xf32>
    %55 = arith.addf %41, %54 : vector<2x8x256xf32>
    %56 = vector.extract_strided_slice %46 {offsets = [0, 1, 0], sizes = [2, 1, 256], strides = [1, 1, 1]} : vector<2x4x256xf32> to vector<2x1x256xf32>
    %57 = vector.extract_strided_slice %48 {offsets = [0, 1], sizes = [8, 1], strides = [1, 1]} : vector<8x4xf32> to vector<8x1xf32>
    %58 = vector.shape_cast %57 : vector<8x1xf32> to vector<1x8x1xf32>
    %59 = vector.broadcast %56 : vector<2x1x256xf32> to vector<2x8x256xf32>
    %60 = vector.broadcast %58 : vector<1x8x1xf32> to vector<2x8x256xf32>
    %61 = arith.mulf %59, %60 : vector<2x8x256xf32>
    %62 = arith.addf %55, %61 : vector<2x8x256xf32>
    %63 = vector.extract_strided_slice %46 {offsets = [0, 2, 0], sizes = [2, 1, 256], strides = [1, 1, 1]} : vector<2x4x256xf32> to vector<2x1x256xf32>
    %64 = vector.extract_strided_slice %48 {offsets = [0, 2], sizes = [8, 1], strides = [1, 1]} : vector<8x4xf32> to vector<8x1xf32>
    %65 = vector.shape_cast %64 : vector<8x1xf32> to vector<1x8x1xf32>
    %66 = vector.broadcast %63 : vector<2x1x256xf32> to vector<2x8x256xf32>
    %67 = vector.broadcast %65 : vector<1x8x1xf32> to vector<2x8x256xf32>
    %68 = arith.mulf %66, %67 : vector<2x8x256xf32>
    %69 = arith.addf %62, %68 : vector<2x8x256xf32>
    %70 = vector.extract_strided_slice %46 {offsets = [0, 3, 0], sizes = [2, 1, 256], strides = [1, 1, 1]} : vector<2x4x256xf32> to vector<2x1x256xf32>
    %71 = vector.extract_strided_slice %48 {offsets = [0, 3], sizes = [8, 1], strides = [1, 1]} : vector<8x4xf32> to vector<8x1xf32>
    %72 = vector.shape_cast %71 : vector<8x1xf32> to vector<1x8x1xf32>
    %73 = vector.broadcast %70 : vector<2x1x256xf32> to vector<2x8x256xf32>
    %74 = vector.broadcast %72 : vector<1x8x1xf32> to vector<2x8x256xf32>
    %75 = arith.mulf %73, %74 : vector<2x8x256xf32>
    %76 = arith.addf %69, %75 : vector<2x8x256xf32>
    %c15_i32 = arith.constant 15 : i32
    %77 = tpu.dynamic_rotate %2 by %c15_i32 dim 2 : vector<2x4x256xf32>, i32 -> vector<2x4x256xf32>
    %c2 = arith.constant 2 : index
    %c0_13 = arith.constant 0 : index
    %78 = vector.load %arg2[%c2, %c0_13] : memref<9x256xf32, #tpu.memory_space<vmem>>, vector<1x256xf32>
    %79 = vector.shape_cast %78 : vector<1x256xf32> to vector<1x1x256xf32>
    %80 = vector.broadcast %79 : vector<1x1x256xf32> to vector<2x4x256xf32>
    %81 = arith.mulf %77, %80 : vector<2x4x256xf32>
    %c2_14 = arith.constant 2 : index
    %c0_15 = arith.constant 0 : index
    %c0_16 = arith.constant 0 : index
    %82 = vector.load %arg5[%c2_14, %c0_15, %c0_16] : memref<9x8x4xf32, #tpu.memory_space<vmem>>, vector<1x8x4xf32>
    %83 = vector.shape_cast %82 : vector<1x8x4xf32> to vector<8x4xf32>
    %84 = vector.extract_strided_slice %81 {offsets = [0, 0, 0], sizes = [2, 1, 256], strides = [1, 1, 1]} : vector<2x4x256xf32> to vector<2x1x256xf32>
    %85 = vector.extract_strided_slice %83 {offsets = [0, 0], sizes = [8, 1], strides = [1, 1]} : vector<8x4xf32> to vector<8x1xf32>
    %86 = vector.shape_cast %85 : vector<8x1xf32> to vector<1x8x1xf32>
    %87 = vector.broadcast %84 : vector<2x1x256xf32> to vector<2x8x256xf32>
    %88 = vector.broadcast %86 : vector<1x8x1xf32> to vector<2x8x256xf32>
    %89 = arith.mulf %87, %88 : vector<2x8x256xf32>
    %90 = arith.addf %76, %89 : vector<2x8x256xf32>
    %91 = vector.extract_strided_slice %81 {offsets = [0, 1, 0], sizes = [2, 1, 256], strides = [1, 1, 1]} : vector<2x4x256xf32> to vector<2x1x256xf32>
    %92 = vector.extract_strided_slice %83 {offsets = [0, 1], sizes = [8, 1], strides = [1, 1]} : vector<8x4xf32> to vector<8x1xf32>
    %93 = vector.shape_cast %92 : vector<8x1xf32> to vector<1x8x1xf32>
    %94 = vector.broadcast %91 : vector<2x1x256xf32> to vector<2x8x256xf32>
    %95 = vector.broadcast %93 : vector<1x8x1xf32> to vector<2x8x256xf32>
    %96 = arith.mulf %94, %95 : vector<2x8x256xf32>
    %97 = arith.addf %90, %96 : vector<2x8x256xf32>
    %98 = vector.extract_strided_slice %81 {offsets = [0, 2, 0], sizes = [2, 1, 256], strides = [1, 1, 1]} : vector<2x4x256xf32> to vector<2x1x256xf32>
    %99 = vector.extract_strided_slice %83 {offsets = [0, 2], sizes = [8, 1], strides = [1, 1]} : vector<8x4xf32> to vector<8x1xf32>
    %100 = vector.shape_cast %99 : vector<8x1xf32> to vector<1x8x1xf32>
    %101 = vector.broadcast %98 : vector<2x1x256xf32> to vector<2x8x256xf32>
    %102 = vector.broadcast %100 : vector<1x8x1xf32> to vector<2x8x256xf32>
    %103 = arith.mulf %101, %102 : vector<2x8x256xf32>
    %104 = arith.addf %97, %103 : vector<2x8x256xf32>
    %105 = vector.extract_strided_slice %81 {offsets = [0, 3, 0], sizes = [2, 1, 256], strides = [1, 1, 1]} : vector<2x4x256xf32> to vector<2x1x256xf32>
    %106 = vector.extract_strided_slice %83 {offsets = [0, 3], sizes = [8, 1], strides = [1, 1]} : vector<8x4xf32> to vector<8x1xf32>
    %107 = vector.shape_cast %106 : vector<8x1xf32> to vector<1x8x1xf32>
    %108 = vector.broadcast %105 : vector<2x1x256xf32> to vector<2x8x256xf32>
    %109 = vector.broadcast %107 : vector<1x8x1xf32> to vector<2x8x256xf32>
    %110 = arith.mulf %108, %109 : vector<2x8x256xf32>
    %111 = arith.addf %104, %110 : vector<2x8x256xf32>
    %c1_i32 = arith.constant 1 : i32
    %112 = tpu.dynamic_rotate %2 by %c1_i32 dim 2 : vector<2x4x256xf32>, i32 -> vector<2x4x256xf32>
    %c3 = arith.constant 3 : index
    %c0_17 = arith.constant 0 : index
    %113 = vector.load %arg2[%c3, %c0_17] : memref<9x256xf32, #tpu.memory_space<vmem>>, vector<1x256xf32>
    %114 = vector.shape_cast %113 : vector<1x256xf32> to vector<1x1x256xf32>
    %115 = vector.broadcast %114 : vector<1x1x256xf32> to vector<2x4x256xf32>
    %116 = arith.mulf %112, %115 : vector<2x4x256xf32>
    %c3_18 = arith.constant 3 : index
    %c0_19 = arith.constant 0 : index
    %c0_20 = arith.constant 0 : index
    %117 = vector.load %arg5[%c3_18, %c0_19, %c0_20] : memref<9x8x4xf32, #tpu.memory_space<vmem>>, vector<1x8x4xf32>
    %118 = vector.shape_cast %117 : vector<1x8x4xf32> to vector<8x4xf32>
    %119 = vector.extract_strided_slice %116 {offsets = [0, 0, 0], sizes = [2, 1, 256], strides = [1, 1, 1]} : vector<2x4x256xf32> to vector<2x1x256xf32>
    %120 = vector.extract_strided_slice %118 {offsets = [0, 0], sizes = [8, 1], strides = [1, 1]} : vector<8x4xf32> to vector<8x1xf32>
    %121 = vector.shape_cast %120 : vector<8x1xf32> to vector<1x8x1xf32>
    %122 = vector.broadcast %119 : vector<2x1x256xf32> to vector<2x8x256xf32>
    %123 = vector.broadcast %121 : vector<1x8x1xf32> to vector<2x8x256xf32>
    %124 = arith.mulf %122, %123 : vector<2x8x256xf32>
    %125 = arith.addf %111, %124 : vector<2x8x256xf32>
    %126 = vector.extract_strided_slice %116 {offsets = [0, 1, 0], sizes = [2, 1, 256], strides = [1, 1, 1]} : vector<2x4x256xf32> to vector<2x1x256xf32>
    %127 = vector.extract_strided_slice %118 {offsets = [0, 1], sizes = [8, 1], strides = [1, 1]} : vector<8x4xf32> to vector<8x1xf32>
    %128 = vector.shape_cast %127 : vector<8x1xf32> to vector<1x8x1xf32>
    %129 = vector.broadcast %126 : vector<2x1x256xf32> to vector<2x8x256xf32>
    %130 = vector.broadcast %128 : vector<1x8x1xf32> to vector<2x8x256xf32>
    %131 = arith.mulf %129, %130 : vector<2x8x256xf32>
    %132 = arith.addf %125, %131 : vector<2x8x256xf32>
    %133 = vector.extract_strided_slice %116 {offsets = [0, 2, 0], sizes = [2, 1, 256], strides = [1, 1, 1]} : vector<2x4x256xf32> to vector<2x1x256xf32>
    %134 = vector.extract_strided_slice %118 {offsets = [0, 2], sizes = [8, 1], strides = [1, 1]} : vector<8x4xf32> to vector<8x1xf32>
    %135 = vector.shape_cast %134 : vector<8x1xf32> to vector<1x8x1xf32>
    %136 = vector.broadcast %133 : vector<2x1x256xf32> to vector<2x8x256xf32>
    %137 = vector.broadcast %135 : vector<1x8x1xf32> to vector<2x8x256xf32>
    %138 = arith.mulf %136, %137 : vector<2x8x256xf32>
    %139 = arith.addf %132, %138 : vector<2x8x256xf32>
    %140 = vector.extract_strided_slice %116 {offsets = [0, 3, 0], sizes = [2, 1, 256], strides = [1, 1, 1]} : vector<2x4x256xf32> to vector<2x1x256xf32>
    %141 = vector.extract_strided_slice %118 {offsets = [0, 3], sizes = [8, 1], strides = [1, 1]} : vector<8x4xf32> to vector<8x1xf32>
    %142 = vector.shape_cast %141 : vector<8x1xf32> to vector<1x8x1xf32>
    %143 = vector.broadcast %140 : vector<2x1x256xf32> to vector<2x8x256xf32>
    %144 = vector.broadcast %142 : vector<1x8x1xf32> to vector<2x8x256xf32>
    %145 = arith.mulf %143, %144 : vector<2x8x256xf32>
    %146 = arith.addf %139, %145 : vector<2x8x256xf32>
    %c4 = arith.constant 4 : index
    %c0_21 = arith.constant 0 : index
    %c0_22 = arith.constant 0 : index
    %147 = vector.load %arg5[%c4, %c0_21, %c0_22] : memref<9x8x4xf32, #tpu.memory_space<vmem>>, vector<1x8x4xf32>
    %148 = vector.shape_cast %147 : vector<1x8x4xf32> to vector<8x4xf32>
    %149 = vector.extract_strided_slice %2 {offsets = [0, 0, 0], sizes = [2, 1, 256], strides = [1, 1, 1]} : vector<2x4x256xf32> to vector<2x1x256xf32>
    %150 = vector.extract_strided_slice %148 {offsets = [0, 0], sizes = [8, 1], strides = [1, 1]} : vector<8x4xf32> to vector<8x1xf32>
    %151 = vector.shape_cast %150 : vector<8x1xf32> to vector<1x8x1xf32>
    %152 = vector.broadcast %149 : vector<2x1x256xf32> to vector<2x8x256xf32>
    %153 = vector.broadcast %151 : vector<1x8x1xf32> to vector<2x8x256xf32>
    %154 = arith.mulf %152, %153 : vector<2x8x256xf32>
    %155 = arith.addf %146, %154 : vector<2x8x256xf32>
    %156 = vector.extract_strided_slice %2 {offsets = [0, 1, 0], sizes = [2, 1, 256], strides = [1, 1, 1]} : vector<2x4x256xf32> to vector<2x1x256xf32>
    %157 = vector.extract_strided_slice %148 {offsets = [0, 1], sizes = [8, 1], strides = [1, 1]} : vector<8x4xf32> to vector<8x1xf32>
    %158 = vector.shape_cast %157 : vector<8x1xf32> to vector<1x8x1xf32>
    %159 = vector.broadcast %156 : vector<2x1x256xf32> to vector<2x8x256xf32>
    %160 = vector.broadcast %158 : vector<1x8x1xf32> to vector<2x8x256xf32>
    %161 = arith.mulf %159, %160 : vector<2x8x256xf32>
    %162 = arith.addf %155, %161 : vector<2x8x256xf32>
    %163 = vector.extract_strided_slice %2 {offsets = [0, 2, 0], sizes = [2, 1, 256], strides = [1, 1, 1]} : vector<2x4x256xf32> to vector<2x1x256xf32>
    %164 = vector.extract_strided_slice %148 {offsets = [0, 2], sizes = [8, 1], strides = [1, 1]} : vector<8x4xf32> to vector<8x1xf32>
    %165 = vector.shape_cast %164 : vector<8x1xf32> to vector<1x8x1xf32>
    %166 = vector.broadcast %163 : vector<2x1x256xf32> to vector<2x8x256xf32>
    %167 = vector.broadcast %165 : vector<1x8x1xf32> to vector<2x8x256xf32>
    %168 = arith.mulf %166, %167 : vector<2x8x256xf32>
    %169 = arith.addf %162, %168 : vector<2x8x256xf32>
    %170 = vector.extract_strided_slice %2 {offsets = [0, 3, 0], sizes = [2, 1, 256], strides = [1, 1, 1]} : vector<2x4x256xf32> to vector<2x1x256xf32>
    %171 = vector.extract_strided_slice %148 {offsets = [0, 3], sizes = [8, 1], strides = [1, 1]} : vector<8x4xf32> to vector<8x1xf32>
    %172 = vector.shape_cast %171 : vector<8x1xf32> to vector<1x8x1xf32>
    %173 = vector.broadcast %170 : vector<2x1x256xf32> to vector<2x8x256xf32>
    %174 = vector.broadcast %172 : vector<1x8x1xf32> to vector<2x8x256xf32>
    %175 = arith.mulf %173, %174 : vector<2x8x256xf32>
    %176 = arith.addf %169, %175 : vector<2x8x256xf32>
    %c255_i32 = arith.constant 255 : i32
    %177 = tpu.dynamic_rotate %2 by %c255_i32 dim 2 : vector<2x4x256xf32>, i32 -> vector<2x4x256xf32>
    %c5 = arith.constant 5 : index
    %c0_23 = arith.constant 0 : index
    %178 = vector.load %arg2[%c5, %c0_23] : memref<9x256xf32, #tpu.memory_space<vmem>>, vector<1x256xf32>
    %179 = vector.shape_cast %178 : vector<1x256xf32> to vector<1x1x256xf32>
    %180 = vector.broadcast %179 : vector<1x1x256xf32> to vector<2x4x256xf32>
    %181 = arith.mulf %177, %180 : vector<2x4x256xf32>
    %c5_24 = arith.constant 5 : index
    %c0_25 = arith.constant 0 : index
    %c0_26 = arith.constant 0 : index
    %182 = vector.load %arg5[%c5_24, %c0_25, %c0_26] : memref<9x8x4xf32, #tpu.memory_space<vmem>>, vector<1x8x4xf32>
    %183 = vector.shape_cast %182 : vector<1x8x4xf32> to vector<8x4xf32>
    %184 = vector.extract_strided_slice %181 {offsets = [0, 0, 0], sizes = [2, 1, 256], strides = [1, 1, 1]} : vector<2x4x256xf32> to vector<2x1x256xf32>
    %185 = vector.extract_strided_slice %183 {offsets = [0, 0], sizes = [8, 1], strides = [1, 1]} : vector<8x4xf32> to vector<8x1xf32>
    %186 = vector.shape_cast %185 : vector<8x1xf32> to vector<1x8x1xf32>
    %187 = vector.broadcast %184 : vector<2x1x256xf32> to vector<2x8x256xf32>
    %188 = vector.broadcast %186 : vector<1x8x1xf32> to vector<2x8x256xf32>
    %189 = arith.mulf %187, %188 : vector<2x8x256xf32>
    %190 = arith.addf %176, %189 : vector<2x8x256xf32>
    %191 = vector.extract_strided_slice %181 {offsets = [0, 1, 0], sizes = [2, 1, 256], strides = [1, 1, 1]} : vector<2x4x256xf32> to vector<2x1x256xf32>
    %192 = vector.extract_strided_slice %183 {offsets = [0, 1], sizes = [8, 1], strides = [1, 1]} : vector<8x4xf32> to vector<8x1xf32>
    %193 = vector.shape_cast %192 : vector<8x1xf32> to vector<1x8x1xf32>
    %194 = vector.broadcast %191 : vector<2x1x256xf32> to vector<2x8x256xf32>
    %195 = vector.broadcast %193 : vector<1x8x1xf32> to vector<2x8x256xf32>
    %196 = arith.mulf %194, %195 : vector<2x8x256xf32>
    %197 = arith.addf %190, %196 : vector<2x8x256xf32>
    %198 = vector.extract_strided_slice %181 {offsets = [0, 2, 0], sizes = [2, 1, 256], strides = [1, 1, 1]} : vector<2x4x256xf32> to vector<2x1x256xf32>
    %199 = vector.extract_strided_slice %183 {offsets = [0, 2], sizes = [8, 1], strides = [1, 1]} : vector<8x4xf32> to vector<8x1xf32>
    %200 = vector.shape_cast %199 : vector<8x1xf32> to vector<1x8x1xf32>
    %201 = vector.broadcast %198 : vector<2x1x256xf32> to vector<2x8x256xf32>
    %202 = vector.broadcast %200 : vector<1x8x1xf32> to vector<2x8x256xf32>
    %203 = arith.mulf %201, %202 : vector<2x8x256xf32>
    %204 = arith.addf %197, %203 : vector<2x8x256xf32>
    %205 = vector.extract_strided_slice %181 {offsets = [0, 3, 0], sizes = [2, 1, 256], strides = [1, 1, 1]} : vector<2x4x256xf32> to vector<2x1x256xf32>
    %206 = vector.extract_strided_slice %183 {offsets = [0, 3], sizes = [8, 1], strides = [1, 1]} : vector<8x4xf32> to vector<8x1xf32>
    %207 = vector.shape_cast %206 : vector<8x1xf32> to vector<1x8x1xf32>
    %208 = vector.broadcast %205 : vector<2x1x256xf32> to vector<2x8x256xf32>
    %209 = vector.broadcast %207 : vector<1x8x1xf32> to vector<2x8x256xf32>
    %210 = arith.mulf %208, %209 : vector<2x8x256xf32>
    %211 = arith.addf %204, %210 : vector<2x8x256xf32>
    %c241_i32 = arith.constant 241 : i32
    %212 = tpu.dynamic_rotate %2 by %c241_i32 dim 2 : vector<2x4x256xf32>, i32 -> vector<2x4x256xf32>
    %c6 = arith.constant 6 : index
    %c0_27 = arith.constant 0 : index
    %213 = vector.load %arg2[%c6, %c0_27] : memref<9x256xf32, #tpu.memory_space<vmem>>, vector<1x256xf32>
    %214 = vector.shape_cast %213 : vector<1x256xf32> to vector<1x1x256xf32>
    %215 = vector.broadcast %214 : vector<1x1x256xf32> to vector<2x4x256xf32>
    %216 = arith.mulf %212, %215 : vector<2x4x256xf32>
    %c6_28 = arith.constant 6 : index
    %c0_29 = arith.constant 0 : index
    %c0_30 = arith.constant 0 : index
    %217 = vector.load %arg5[%c6_28, %c0_29, %c0_30] : memref<9x8x4xf32, #tpu.memory_space<vmem>>, vector<1x8x4xf32>
    %218 = vector.shape_cast %217 : vector<1x8x4xf32> to vector<8x4xf32>
    %219 = vector.extract_strided_slice %216 {offsets = [0, 0, 0], sizes = [2, 1, 256], strides = [1, 1, 1]} : vector<2x4x256xf32> to vector<2x1x256xf32>
    %220 = vector.extract_strided_slice %218 {offsets = [0, 0], sizes = [8, 1], strides = [1, 1]} : vector<8x4xf32> to vector<8x1xf32>
    %221 = vector.shape_cast %220 : vector<8x1xf32> to vector<1x8x1xf32>
    %222 = vector.broadcast %219 : vector<2x1x256xf32> to vector<2x8x256xf32>
    %223 = vector.broadcast %221 : vector<1x8x1xf32> to vector<2x8x256xf32>
    %224 = arith.mulf %222, %223 : vector<2x8x256xf32>
    %225 = arith.addf %211, %224 : vector<2x8x256xf32>
    %226 = vector.extract_strided_slice %216 {offsets = [0, 1, 0], sizes = [2, 1, 256], strides = [1, 1, 1]} : vector<2x4x256xf32> to vector<2x1x256xf32>
    %227 = vector.extract_strided_slice %218 {offsets = [0, 1], sizes = [8, 1], strides = [1, 1]} : vector<8x4xf32> to vector<8x1xf32>
    %228 = vector.shape_cast %227 : vector<8x1xf32> to vector<1x8x1xf32>
    %229 = vector.broadcast %226 : vector<2x1x256xf32> to vector<2x8x256xf32>
    %230 = vector.broadcast %228 : vector<1x8x1xf32> to vector<2x8x256xf32>
    %231 = arith.mulf %229, %230 : vector<2x8x256xf32>
    %232 = arith.addf %225, %231 : vector<2x8x256xf32>
    %233 = vector.extract_strided_slice %216 {offsets = [0, 2, 0], sizes = [2, 1, 256], strides = [1, 1, 1]} : vector<2x4x256xf32> to vector<2x1x256xf32>
    %234 = vector.extract_strided_slice %218 {offsets = [0, 2], sizes = [8, 1], strides = [1, 1]} : vector<8x4xf32> to vector<8x1xf32>
    %235 = vector.shape_cast %234 : vector<8x1xf32> to vector<1x8x1xf32>
    %236 = vector.broadcast %233 : vector<2x1x256xf32> to vector<2x8x256xf32>
    %237 = vector.broadcast %235 : vector<1x8x1xf32> to vector<2x8x256xf32>
    %238 = arith.mulf %236, %237 : vector<2x8x256xf32>
    %239 = arith.addf %232, %238 : vector<2x8x256xf32>
    %240 = vector.extract_strided_slice %216 {offsets = [0, 3, 0], sizes = [2, 1, 256], strides = [1, 1, 1]} : vector<2x4x256xf32> to vector<2x1x256xf32>
    %241 = vector.extract_strided_slice %218 {offsets = [0, 3], sizes = [8, 1], strides = [1, 1]} : vector<8x4xf32> to vector<8x1xf32>
    %242 = vector.shape_cast %241 : vector<8x1xf32> to vector<1x8x1xf32>
    %243 = vector.broadcast %240 : vector<2x1x256xf32> to vector<2x8x256xf32>
    %244 = vector.broadcast %242 : vector<1x8x1xf32> to vector<2x8x256xf32>
    %245 = arith.mulf %243, %244 : vector<2x8x256xf32>
    %246 = arith.addf %239, %245 : vector<2x8x256xf32>
    %c240_i32 = arith.constant 240 : i32
    %247 = tpu.dynamic_rotate %2 by %c240_i32 dim 2 : vector<2x4x256xf32>, i32 -> vector<2x4x256xf32>
    %c7 = arith.constant 7 : index
    %c0_31 = arith.constant 0 : index
    %248 = vector.load %arg2[%c7, %c0_31] : memref<9x256xf32, #tpu.memory_space<vmem>>, vector<1x256xf32>
    %249 = vector.shape_cast %248 : vector<1x256xf32> to vector<1x1x256xf32>
    %250 = vector.broadcast %249 : vector<1x1x256xf32> to vector<2x4x256xf32>
    %251 = arith.mulf %247, %250 : vector<2x4x256xf32>
    %c7_32 = arith.constant 7 : index
    %c0_33 = arith.constant 0 : index
    %c0_34 = arith.constant 0 : index
    %252 = vector.load %arg5[%c7_32, %c0_33, %c0_34] : memref<9x8x4xf32, #tpu.memory_space<vmem>>, vector<1x8x4xf32>
    %253 = vector.shape_cast %252 : vector<1x8x4xf32> to vector<8x4xf32>
    %254 = vector.extract_strided_slice %251 {offsets = [0, 0, 0], sizes = [2, 1, 256], strides = [1, 1, 1]} : vector<2x4x256xf32> to vector<2x1x256xf32>
    %255 = vector.extract_strided_slice %253 {offsets = [0, 0], sizes = [8, 1], strides = [1, 1]} : vector<8x4xf32> to vector<8x1xf32>
    %256 = vector.shape_cast %255 : vector<8x1xf32> to vector<1x8x1xf32>
    %257 = vector.broadcast %254 : vector<2x1x256xf32> to vector<2x8x256xf32>
    %258 = vector.broadcast %256 : vector<1x8x1xf32> to vector<2x8x256xf32>
    %259 = arith.mulf %257, %258 : vector<2x8x256xf32>
    %260 = arith.addf %246, %259 : vector<2x8x256xf32>
    %261 = vector.extract_strided_slice %251 {offsets = [0, 1, 0], sizes = [2, 1, 256], strides = [1, 1, 1]} : vector<2x4x256xf32> to vector<2x1x256xf32>
    %262 = vector.extract_strided_slice %253 {offsets = [0, 1], sizes = [8, 1], strides = [1, 1]} : vector<8x4xf32> to vector<8x1xf32>
    %263 = vector.shape_cast %262 : vector<8x1xf32> to vector<1x8x1xf32>
    %264 = vector.broadcast %261 : vector<2x1x256xf32> to vector<2x8x256xf32>
    %265 = vector.broadcast %263 : vector<1x8x1xf32> to vector<2x8x256xf32>
    %266 = arith.mulf %264, %265 : vector<2x8x256xf32>
    %267 = arith.addf %260, %266 : vector<2x8x256xf32>
    %268 = vector.extract_strided_slice %251 {offsets = [0, 2, 0], sizes = [2, 1, 256], strides = [1, 1, 1]} : vector<2x4x256xf32> to vector<2x1x256xf32>
    %269 = vector.extract_strided_slice %253 {offsets = [0, 2], sizes = [8, 1], strides = [1, 1]} : vector<8x4xf32> to vector<8x1xf32>
    %270 = vector.shape_cast %269 : vector<8x1xf32> to vector<1x8x1xf32>
    %271 = vector.broadcast %268 : vector<2x1x256xf32> to vector<2x8x256xf32>
    %272 = vector.broadcast %270 : vector<1x8x1xf32> to vector<2x8x256xf32>
    %273 = arith.mulf %271, %272 : vector<2x8x256xf32>
    %274 = arith.addf %267, %273 : vector<2x8x256xf32>
    %275 = vector.extract_strided_slice %251 {offsets = [0, 3, 0], sizes = [2, 1, 256], strides = [1, 1, 1]} : vector<2x4x256xf32> to vector<2x1x256xf32>
    %276 = vector.extract_strided_slice %253 {offsets = [0, 3], sizes = [8, 1], strides = [1, 1]} : vector<8x4xf32> to vector<8x1xf32>
    %277 = vector.shape_cast %276 : vector<8x1xf32> to vector<1x8x1xf32>
    %278 = vector.broadcast %275 : vector<2x1x256xf32> to vector<2x8x256xf32>
    %279 = vector.broadcast %277 : vector<1x8x1xf32> to vector<2x8x256xf32>
    %280 = arith.mulf %278, %279 : vector<2x8x256xf32>
    %281 = arith.addf %274, %280 : vector<2x8x256xf32>
    %c239_i32 = arith.constant 239 : i32
    %282 = tpu.dynamic_rotate %2 by %c239_i32 dim 2 : vector<2x4x256xf32>, i32 -> vector<2x4x256xf32>
    %c8 = arith.constant 8 : index
    %c0_35 = arith.constant 0 : index
    %283 = vector.load %arg2[%c8, %c0_35] : memref<9x256xf32, #tpu.memory_space<vmem>>, vector<1x256xf32>
    %284 = vector.shape_cast %283 : vector<1x256xf32> to vector<1x1x256xf32>
    %285 = vector.broadcast %284 : vector<1x1x256xf32> to vector<2x4x256xf32>
    %286 = arith.mulf %282, %285 : vector<2x4x256xf32>
    %c8_36 = arith.constant 8 : index
    %c0_37 = arith.constant 0 : index
    %c0_38 = arith.constant 0 : index
    %287 = vector.load %arg5[%c8_36, %c0_37, %c0_38] : memref<9x8x4xf32, #tpu.memory_space<vmem>>, vector<1x8x4xf32>
    %288 = vector.shape_cast %287 : vector<1x8x4xf32> to vector<8x4xf32>
    %289 = vector.extract_strided_slice %286 {offsets = [0, 0, 0], sizes = [2, 1, 256], strides = [1, 1, 1]} : vector<2x4x256xf32> to vector<2x1x256xf32>
    %290 = vector.extract_strided_slice %288 {offsets = [0, 0], sizes = [8, 1], strides = [1, 1]} : vector<8x4xf32> to vector<8x1xf32>
    %291 = vector.shape_cast %290 : vector<8x1xf32> to vector<1x8x1xf32>
    %292 = vector.broadcast %289 : vector<2x1x256xf32> to vector<2x8x256xf32>
    %293 = vector.broadcast %291 : vector<1x8x1xf32> to vector<2x8x256xf32>
    %294 = arith.mulf %292, %293 : vector<2x8x256xf32>
    %295 = arith.addf %281, %294 : vector<2x8x256xf32>
    %296 = vector.extract_strided_slice %286 {offsets = [0, 1, 0], sizes = [2, 1, 256], strides = [1, 1, 1]} : vector<2x4x256xf32> to vector<2x1x256xf32>
    %297 = vector.extract_strided_slice %288 {offsets = [0, 1], sizes = [8, 1], strides = [1, 1]} : vector<8x4xf32> to vector<8x1xf32>
    %298 = vector.shape_cast %297 : vector<8x1xf32> to vector<1x8x1xf32>
    %299 = vector.broadcast %296 : vector<2x1x256xf32> to vector<2x8x256xf32>
    %300 = vector.broadcast %298 : vector<1x8x1xf32> to vector<2x8x256xf32>
    %301 = arith.mulf %299, %300 : vector<2x8x256xf32>
    %302 = arith.addf %295, %301 : vector<2x8x256xf32>
    %303 = vector.extract_strided_slice %286 {offsets = [0, 2, 0], sizes = [2, 1, 256], strides = [1, 1, 1]} : vector<2x4x256xf32> to vector<2x1x256xf32>
    %304 = vector.extract_strided_slice %288 {offsets = [0, 2], sizes = [8, 1], strides = [1, 1]} : vector<8x4xf32> to vector<8x1xf32>
    %305 = vector.shape_cast %304 : vector<8x1xf32> to vector<1x8x1xf32>
    %306 = vector.broadcast %303 : vector<2x1x256xf32> to vector<2x8x256xf32>
    %307 = vector.broadcast %305 : vector<1x8x1xf32> to vector<2x8x256xf32>
    %308 = arith.mulf %306, %307 : vector<2x8x256xf32>
    %309 = arith.addf %302, %308 : vector<2x8x256xf32>
    %310 = vector.extract_strided_slice %286 {offsets = [0, 3, 0], sizes = [2, 1, 256], strides = [1, 1, 1]} : vector<2x4x256xf32> to vector<2x1x256xf32>
    %311 = vector.extract_strided_slice %288 {offsets = [0, 3], sizes = [8, 1], strides = [1, 1]} : vector<8x4xf32> to vector<8x1xf32>
    %312 = vector.shape_cast %311 : vector<8x1xf32> to vector<1x8x1xf32>
    %313 = vector.broadcast %310 : vector<2x1x256xf32> to vector<2x8x256xf32>
    %314 = vector.broadcast %312 : vector<1x8x1xf32> to vector<2x8x256xf32>
    %315 = arith.mulf %313, %314 : vector<2x8x256xf32>
    %316 = arith.addf %309, %315 : vector<2x8x256xf32>
    %cst_39 = arith.constant 0.000000e+00 : f32
    %317 = vector.broadcast %cst_39 : f32 to vector<2x8x256xf32>
    %318 = arith.maximumf %316, %317 : vector<2x8x256xf32>
    %c0_40 = arith.constant 0 : index
    %c0_41 = arith.constant 0 : index
    %319 = vector.load %arg8[%c0_40, %c0_41] : memref<8x1xf32, #tpu.memory_space<vmem>>, vector<8x1xf32>
    %320 = vector.shape_cast %319 : vector<8x1xf32> to vector<1x8x1xf32>
    %321 = vector.shape_cast %320 : vector<1x8x1xf32> to vector<1x8x1xf32>
    %322 = vector.broadcast %321 : vector<1x8x1xf32> to vector<2x8x256xf32>
    %c17_i32_42 = arith.constant 17 : i32
    %323 = tpu.dynamic_rotate %318 by %c17_i32_42 dim 2 : vector<2x8x256xf32>, i32 -> vector<2x8x256xf32>
    %c0_43 = arith.constant 0 : index
    %c0_44 = arith.constant 0 : index
    %324 = vector.load %arg2[%c0_43, %c0_44] : memref<9x256xf32, #tpu.memory_space<vmem>>, vector<1x256xf32>
    %325 = vector.shape_cast %324 : vector<1x256xf32> to vector<1x1x256xf32>
    %326 = vector.broadcast %325 : vector<1x1x256xf32> to vector<2x8x256xf32>
    %327 = arith.mulf %323, %326 : vector<2x8x256xf32>
    %c0_45 = arith.constant 0 : index
    %c0_46 = arith.constant 0 : index
    %c0_47 = arith.constant 0 : index
    %328 = vector.load %arg7[%c0_45, %c0_46, %c0_47] : memref<9x8x8xf32, #tpu.memory_space<vmem>>, vector<1x8x8xf32>
    %329 = vector.shape_cast %328 : vector<1x8x8xf32> to vector<8x8xf32>
    %330 = vector.extract_strided_slice %327 {offsets = [0, 0, 0], sizes = [2, 1, 256], strides = [1, 1, 1]} : vector<2x8x256xf32> to vector<2x1x256xf32>
    %331 = vector.extract_strided_slice %329 {offsets = [0, 0], sizes = [8, 1], strides = [1, 1]} : vector<8x8xf32> to vector<8x1xf32>
    %332 = vector.shape_cast %331 : vector<8x1xf32> to vector<1x8x1xf32>
    %333 = vector.broadcast %330 : vector<2x1x256xf32> to vector<2x8x256xf32>
    %334 = vector.broadcast %332 : vector<1x8x1xf32> to vector<2x8x256xf32>
    %335 = arith.mulf %333, %334 : vector<2x8x256xf32>
    %336 = arith.addf %322, %335 : vector<2x8x256xf32>
    %337 = vector.extract_strided_slice %327 {offsets = [0, 1, 0], sizes = [2, 1, 256], strides = [1, 1, 1]} : vector<2x8x256xf32> to vector<2x1x256xf32>
    %338 = vector.extract_strided_slice %329 {offsets = [0, 1], sizes = [8, 1], strides = [1, 1]} : vector<8x8xf32> to vector<8x1xf32>
    %339 = vector.shape_cast %338 : vector<8x1xf32> to vector<1x8x1xf32>
    %340 = vector.broadcast %337 : vector<2x1x256xf32> to vector<2x8x256xf32>
    %341 = vector.broadcast %339 : vector<1x8x1xf32> to vector<2x8x256xf32>
    %342 = arith.mulf %340, %341 : vector<2x8x256xf32>
    %343 = arith.addf %336, %342 : vector<2x8x256xf32>
    %344 = vector.extract_strided_slice %327 {offsets = [0, 2, 0], sizes = [2, 1, 256], strides = [1, 1, 1]} : vector<2x8x256xf32> to vector<2x1x256xf32>
    %345 = vector.extract_strided_slice %329 {offsets = [0, 2], sizes = [8, 1], strides = [1, 1]} : vector<8x8xf32> to vector<8x1xf32>
    %346 = vector.shape_cast %345 : vector<8x1xf32> to vector<1x8x1xf32>
    %347 = vector.broadcast %344 : vector<2x1x256xf32> to vector<2x8x256xf32>
    %348 = vector.broadcast %346 : vector<1x8x1xf32> to vector<2x8x256xf32>
    %349 = arith.mulf %347, %348 : vector<2x8x256xf32>
    %350 = arith.addf %343, %349 : vector<2x8x256xf32>
    %351 = vector.extract_strided_slice %327 {offsets = [0, 3, 0], sizes = [2, 1, 256], strides = [1, 1, 1]} : vector<2x8x256xf32> to vector<2x1x256xf32>
    %352 = vector.extract_strided_slice %329 {offsets = [0, 3], sizes = [8, 1], strides = [1, 1]} : vector<8x8xf32> to vector<8x1xf32>
    %353 = vector.shape_cast %352 : vector<8x1xf32> to vector<1x8x1xf32>
    %354 = vector.broadcast %351 : vector<2x1x256xf32> to vector<2x8x256xf32>
    %355 = vector.broadcast %353 : vector<1x8x1xf32> to vector<2x8x256xf32>
    %356 = arith.mulf %354, %355 : vector<2x8x256xf32>
    %357 = arith.addf %350, %356 : vector<2x8x256xf32>
    %358 = vector.extract_strided_slice %327 {offsets = [0, 4, 0], sizes = [2, 1, 256], strides = [1, 1, 1]} : vector<2x8x256xf32> to vector<2x1x256xf32>
    %359 = vector.extract_strided_slice %329 {offsets = [0, 4], sizes = [8, 1], strides = [1, 1]} : vector<8x8xf32> to vector<8x1xf32>
    %360 = vector.shape_cast %359 : vector<8x1xf32> to vector<1x8x1xf32>
    %361 = vector.broadcast %358 : vector<2x1x256xf32> to vector<2x8x256xf32>
    %362 = vector.broadcast %360 : vector<1x8x1xf32> to vector<2x8x256xf32>
    %363 = arith.mulf %361, %362 : vector<2x8x256xf32>
    %364 = arith.addf %357, %363 : vector<2x8x256xf32>
    %365 = vector.extract_strided_slice %327 {offsets = [0, 5, 0], sizes = [2, 1, 256], strides = [1, 1, 1]} : vector<2x8x256xf32> to vector<2x1x256xf32>
    %366 = vector.extract_strided_slice %329 {offsets = [0, 5], sizes = [8, 1], strides = [1, 1]} : vector<8x8xf32> to vector<8x1xf32>
    %367 = vector.shape_cast %366 : vector<8x1xf32> to vector<1x8x1xf32>
    %368 = vector.broadcast %365 : vector<2x1x256xf32> to vector<2x8x256xf32>
    %369 = vector.broadcast %367 : vector<1x8x1xf32> to vector<2x8x256xf32>
    %370 = arith.mulf %368, %369 : vector<2x8x256xf32>
    %371 = arith.addf %364, %370 : vector<2x8x256xf32>
    %372 = vector.extract_strided_slice %327 {offsets = [0, 6, 0], sizes = [2, 1, 256], strides = [1, 1, 1]} : vector<2x8x256xf32> to vector<2x1x256xf32>
    %373 = vector.extract_strided_slice %329 {offsets = [0, 6], sizes = [8, 1], strides = [1, 1]} : vector<8x8xf32> to vector<8x1xf32>
    %374 = vector.shape_cast %373 : vector<8x1xf32> to vector<1x8x1xf32>
    %375 = vector.broadcast %372 : vector<2x1x256xf32> to vector<2x8x256xf32>
    %376 = vector.broadcast %374 : vector<1x8x1xf32> to vector<2x8x256xf32>
    %377 = arith.mulf %375, %376 : vector<2x8x256xf32>
    %378 = arith.addf %371, %377 : vector<2x8x256xf32>
    %379 = vector.extract_strided_slice %327 {offsets = [0, 7, 0], sizes = [2, 1, 256], strides = [1, 1, 1]} : vector<2x8x256xf32> to vector<2x1x256xf32>
    %380 = vector.extract_strided_slice %329 {offsets = [0, 7], sizes = [8, 1], strides = [1, 1]} : vector<8x8xf32> to vector<8x1xf32>
    %381 = vector.shape_cast %380 : vector<8x1xf32> to vector<1x8x1xf32>
    %382 = vector.broadcast %379 : vector<2x1x256xf32> to vector<2x8x256xf32>
    %383 = vector.broadcast %381 : vector<1x8x1xf32> to vector<2x8x256xf32>
    %384 = arith.mulf %382, %383 : vector<2x8x256xf32>
    %385 = arith.addf %378, %384 : vector<2x8x256xf32>
    %c16_i32_48 = arith.constant 16 : i32
    %386 = tpu.dynamic_rotate %318 by %c16_i32_48 dim 2 : vector<2x8x256xf32>, i32 -> vector<2x8x256xf32>
    %c1_49 = arith.constant 1 : index
    %c0_50 = arith.constant 0 : index
    %387 = vector.load %arg2[%c1_49, %c0_50] : memref<9x256xf32, #tpu.memory_space<vmem>>, vector<1x256xf32>
    %388 = vector.shape_cast %387 : vector<1x256xf32> to vector<1x1x256xf32>
    %389 = vector.broadcast %388 : vector<1x1x256xf32> to vector<2x8x256xf32>
    %390 = arith.mulf %386, %389 : vector<2x8x256xf32>
    %c1_51 = arith.constant 1 : index
    %c0_52 = arith.constant 0 : index
    %c0_53 = arith.constant 0 : index
    %391 = vector.load %arg7[%c1_51, %c0_52, %c0_53] : memref<9x8x8xf32, #tpu.memory_space<vmem>>, vector<1x8x8xf32>
    %392 = vector.shape_cast %391 : vector<1x8x8xf32> to vector<8x8xf32>
    %393 = vector.extract_strided_slice %390 {offsets = [0, 0, 0], sizes = [2, 1, 256], strides = [1, 1, 1]} : vector<2x8x256xf32> to vector<2x1x256xf32>
    %394 = vector.extract_strided_slice %392 {offsets = [0, 0], sizes = [8, 1], strides = [1, 1]} : vector<8x8xf32> to vector<8x1xf32>
    %395 = vector.shape_cast %394 : vector<8x1xf32> to vector<1x8x1xf32>
    %396 = vector.broadcast %393 : vector<2x1x256xf32> to vector<2x8x256xf32>
    %397 = vector.broadcast %395 : vector<1x8x1xf32> to vector<2x8x256xf32>
    %398 = arith.mulf %396, %397 : vector<2x8x256xf32>
    %399 = arith.addf %385, %398 : vector<2x8x256xf32>
    %400 = vector.extract_strided_slice %390 {offsets = [0, 1, 0], sizes = [2, 1, 256], strides = [1, 1, 1]} : vector<2x8x256xf32> to vector<2x1x256xf32>
    %401 = vector.extract_strided_slice %392 {offsets = [0, 1], sizes = [8, 1], strides = [1, 1]} : vector<8x8xf32> to vector<8x1xf32>
    %402 = vector.shape_cast %401 : vector<8x1xf32> to vector<1x8x1xf32>
    %403 = vector.broadcast %400 : vector<2x1x256xf32> to vector<2x8x256xf32>
    %404 = vector.broadcast %402 : vector<1x8x1xf32> to vector<2x8x256xf32>
    %405 = arith.mulf %403, %404 : vector<2x8x256xf32>
    %406 = arith.addf %399, %405 : vector<2x8x256xf32>
    %407 = vector.extract_strided_slice %390 {offsets = [0, 2, 0], sizes = [2, 1, 256], strides = [1, 1, 1]} : vector<2x8x256xf32> to vector<2x1x256xf32>
    %408 = vector.extract_strided_slice %392 {offsets = [0, 2], sizes = [8, 1], strides = [1, 1]} : vector<8x8xf32> to vector<8x1xf32>
    %409 = vector.shape_cast %408 : vector<8x1xf32> to vector<1x8x1xf32>
    %410 = vector.broadcast %407 : vector<2x1x256xf32> to vector<2x8x256xf32>
    %411 = vector.broadcast %409 : vector<1x8x1xf32> to vector<2x8x256xf32>
    %412 = arith.mulf %410, %411 : vector<2x8x256xf32>
    %413 = arith.addf %406, %412 : vector<2x8x256xf32>
    %414 = vector.extract_strided_slice %390 {offsets = [0, 3, 0], sizes = [2, 1, 256], strides = [1, 1, 1]} : vector<2x8x256xf32> to vector<2x1x256xf32>
    %415 = vector.extract_strided_slice %392 {offsets = [0, 3], sizes = [8, 1], strides = [1, 1]} : vector<8x8xf32> to vector<8x1xf32>
    %416 = vector.shape_cast %415 : vector<8x1xf32> to vector<1x8x1xf32>
    %417 = vector.broadcast %414 : vector<2x1x256xf32> to vector<2x8x256xf32>
    %418 = vector.broadcast %416 : vector<1x8x1xf32> to vector<2x8x256xf32>
    %419 = arith.mulf %417, %418 : vector<2x8x256xf32>
    %420 = arith.addf %413, %419 : vector<2x8x256xf32>
    %421 = vector.extract_strided_slice %390 {offsets = [0, 4, 0], sizes = [2, 1, 256], strides = [1, 1, 1]} : vector<2x8x256xf32> to vector<2x1x256xf32>
    %422 = vector.extract_strided_slice %392 {offsets = [0, 4], sizes = [8, 1], strides = [1, 1]} : vector<8x8xf32> to vector<8x1xf32>
    %423 = vector.shape_cast %422 : vector<8x1xf32> to vector<1x8x1xf32>
    %424 = vector.broadcast %421 : vector<2x1x256xf32> to vector<2x8x256xf32>
    %425 = vector.broadcast %423 : vector<1x8x1xf32> to vector<2x8x256xf32>
    %426 = arith.mulf %424, %425 : vector<2x8x256xf32>
    %427 = arith.addf %420, %426 : vector<2x8x256xf32>
    %428 = vector.extract_strided_slice %390 {offsets = [0, 5, 0], sizes = [2, 1, 256], strides = [1, 1, 1]} : vector<2x8x256xf32> to vector<2x1x256xf32>
    %429 = vector.extract_strided_slice %392 {offsets = [0, 5], sizes = [8, 1], strides = [1, 1]} : vector<8x8xf32> to vector<8x1xf32>
    %430 = vector.shape_cast %429 : vector<8x1xf32> to vector<1x8x1xf32>
    %431 = vector.broadcast %428 : vector<2x1x256xf32> to vector<2x8x256xf32>
    %432 = vector.broadcast %430 : vector<1x8x1xf32> to vector<2x8x256xf32>
    %433 = arith.mulf %431, %432 : vector<2x8x256xf32>
    %434 = arith.addf %427, %433 : vector<2x8x256xf32>
    %435 = vector.extract_strided_slice %390 {offsets = [0, 6, 0], sizes = [2, 1, 256], strides = [1, 1, 1]} : vector<2x8x256xf32> to vector<2x1x256xf32>
    %436 = vector.extract_strided_slice %392 {offsets = [0, 6], sizes = [8, 1], strides = [1, 1]} : vector<8x8xf32> to vector<8x1xf32>
    %437 = vector.shape_cast %436 : vector<8x1xf32> to vector<1x8x1xf32>
    %438 = vector.broadcast %435 : vector<2x1x256xf32> to vector<2x8x256xf32>
    %439 = vector.broadcast %437 : vector<1x8x1xf32> to vector<2x8x256xf32>
    %440 = arith.mulf %438, %439 : vector<2x8x256xf32>
    %441 = arith.addf %434, %440 : vector<2x8x256xf32>
    %442 = vector.extract_strided_slice %390 {offsets = [0, 7, 0], sizes = [2, 1, 256], strides = [1, 1, 1]} : vector<2x8x256xf32> to vector<2x1x256xf32>
    %443 = vector.extract_strided_slice %392 {offsets = [0, 7], sizes = [8, 1], strides = [1, 1]} : vector<8x8xf32> to vector<8x1xf32>
    %444 = vector.shape_cast %443 : vector<8x1xf32> to vector<1x8x1xf32>
    %445 = vector.broadcast %442 : vector<2x1x256xf32> to vector<2x8x256xf32>
    %446 = vector.broadcast %444 : vector<1x8x1xf32> to vector<2x8x256xf32>
    %447 = arith.mulf %445, %446 : vector<2x8x256xf32>
    %448 = arith.addf %441, %447 : vector<2x8x256xf32>
    %c15_i32_54 = arith.constant 15 : i32
    %449 = tpu.dynamic_rotate %318 by %c15_i32_54 dim 2 : vector<2x8x256xf32>, i32 -> vector<2x8x256xf32>
    %c2_55 = arith.constant 2 : index
    %c0_56 = arith.constant 0 : index
    %450 = vector.load %arg2[%c2_55, %c0_56] : memref<9x256xf32, #tpu.memory_space<vmem>>, vector<1x256xf32>
    %451 = vector.shape_cast %450 : vector<1x256xf32> to vector<1x1x256xf32>
    %452 = vector.broadcast %451 : vector<1x1x256xf32> to vector<2x8x256xf32>
    %453 = arith.mulf %449, %452 : vector<2x8x256xf32>
    %c2_57 = arith.constant 2 : index
    %c0_58 = arith.constant 0 : index
    %c0_59 = arith.constant 0 : index
    %454 = vector.load %arg7[%c2_57, %c0_58, %c0_59] : memref<9x8x8xf32, #tpu.memory_space<vmem>>, vector<1x8x8xf32>
    %455 = vector.shape_cast %454 : vector<1x8x8xf32> to vector<8x8xf32>
    %456 = vector.extract_strided_slice %453 {offsets = [0, 0, 0], sizes = [2, 1, 256], strides = [1, 1, 1]} : vector<2x8x256xf32> to vector<2x1x256xf32>
    %457 = vector.extract_strided_slice %455 {offsets = [0, 0], sizes = [8, 1], strides = [1, 1]} : vector<8x8xf32> to vector<8x1xf32>
    %458 = vector.shape_cast %457 : vector<8x1xf32> to vector<1x8x1xf32>
    %459 = vector.broadcast %456 : vector<2x1x256xf32> to vector<2x8x256xf32>
    %460 = vector.broadcast %458 : vector<1x8x1xf32> to vector<2x8x256xf32>
    %461 = arith.mulf %459, %460 : vector<2x8x256xf32>
    %462 = arith.addf %448, %461 : vector<2x8x256xf32>
    %463 = vector.extract_strided_slice %453 {offsets = [0, 1, 0], sizes = [2, 1, 256], strides = [1, 1, 1]} : vector<2x8x256xf32> to vector<2x1x256xf32>
    %464 = vector.extract_strided_slice %455 {offsets = [0, 1], sizes = [8, 1], strides = [1, 1]} : vector<8x8xf32> to vector<8x1xf32>
    %465 = vector.shape_cast %464 : vector<8x1xf32> to vector<1x8x1xf32>
    %466 = vector.broadcast %463 : vector<2x1x256xf32> to vector<2x8x256xf32>
    %467 = vector.broadcast %465 : vector<1x8x1xf32> to vector<2x8x256xf32>
    %468 = arith.mulf %466, %467 : vector<2x8x256xf32>
    %469 = arith.addf %462, %468 : vector<2x8x256xf32>
    %470 = vector.extract_strided_slice %453 {offsets = [0, 2, 0], sizes = [2, 1, 256], strides = [1, 1, 1]} : vector<2x8x256xf32> to vector<2x1x256xf32>
    %471 = vector.extract_strided_slice %455 {offsets = [0, 2], sizes = [8, 1], strides = [1, 1]} : vector<8x8xf32> to vector<8x1xf32>
    %472 = vector.shape_cast %471 : vector<8x1xf32> to vector<1x8x1xf32>
    %473 = vector.broadcast %470 : vector<2x1x256xf32> to vector<2x8x256xf32>
    %474 = vector.broadcast %472 : vector<1x8x1xf32> to vector<2x8x256xf32>
    %475 = arith.mulf %473, %474 : vector<2x8x256xf32>
    %476 = arith.addf %469, %475 : vector<2x8x256xf32>
    %477 = vector.extract_strided_slice %453 {offsets = [0, 3, 0], sizes = [2, 1, 256], strides = [1, 1, 1]} : vector<2x8x256xf32> to vector<2x1x256xf32>
    %478 = vector.extract_strided_slice %455 {offsets = [0, 3], sizes = [8, 1], strides = [1, 1]} : vector<8x8xf32> to vector<8x1xf32>
    %479 = vector.shape_cast %478 : vector<8x1xf32> to vector<1x8x1xf32>
    %480 = vector.broadcast %477 : vector<2x1x256xf32> to vector<2x8x256xf32>
    %481 = vector.broadcast %479 : vector<1x8x1xf32> to vector<2x8x256xf32>
    %482 = arith.mulf %480, %481 : vector<2x8x256xf32>
    %483 = arith.addf %476, %482 : vector<2x8x256xf32>
    %484 = vector.extract_strided_slice %453 {offsets = [0, 4, 0], sizes = [2, 1, 256], strides = [1, 1, 1]} : vector<2x8x256xf32> to vector<2x1x256xf32>
    %485 = vector.extract_strided_slice %455 {offsets = [0, 4], sizes = [8, 1], strides = [1, 1]} : vector<8x8xf32> to vector<8x1xf32>
    %486 = vector.shape_cast %485 : vector<8x1xf32> to vector<1x8x1xf32>
    %487 = vector.broadcast %484 : vector<2x1x256xf32> to vector<2x8x256xf32>
    %488 = vector.broadcast %486 : vector<1x8x1xf32> to vector<2x8x256xf32>
    %489 = arith.mulf %487, %488 : vector<2x8x256xf32>
    %490 = arith.addf %483, %489 : vector<2x8x256xf32>
    %491 = vector.extract_strided_slice %453 {offsets = [0, 5, 0], sizes = [2, 1, 256], strides = [1, 1, 1]} : vector<2x8x256xf32> to vector<2x1x256xf32>
    %492 = vector.extract_strided_slice %455 {offsets = [0, 5], sizes = [8, 1], strides = [1, 1]} : vector<8x8xf32> to vector<8x1xf32>
    %493 = vector.shape_cast %492 : vector<8x1xf32> to vector<1x8x1xf32>
    %494 = vector.broadcast %491 : vector<2x1x256xf32> to vector<2x8x256xf32>
    %495 = vector.broadcast %493 : vector<1x8x1xf32> to vector<2x8x256xf32>
    %496 = arith.mulf %494, %495 : vector<2x8x256xf32>
    %497 = arith.addf %490, %496 : vector<2x8x256xf32>
    %498 = vector.extract_strided_slice %453 {offsets = [0, 6, 0], sizes = [2, 1, 256], strides = [1, 1, 1]} : vector<2x8x256xf32> to vector<2x1x256xf32>
    %499 = vector.extract_strided_slice %455 {offsets = [0, 6], sizes = [8, 1], strides = [1, 1]} : vector<8x8xf32> to vector<8x1xf32>
    %500 = vector.shape_cast %499 : vector<8x1xf32> to vector<1x8x1xf32>
    %501 = vector.broadcast %498 : vector<2x1x256xf32> to vector<2x8x256xf32>
    %502 = vector.broadcast %500 : vector<1x8x1xf32> to vector<2x8x256xf32>
    %503 = arith.mulf %501, %502 : vector<2x8x256xf32>
    %504 = arith.addf %497, %503 : vector<2x8x256xf32>
    %505 = vector.extract_strided_slice %453 {offsets = [0, 7, 0], sizes = [2, 1, 256], strides = [1, 1, 1]} : vector<2x8x256xf32> to vector<2x1x256xf32>
    %506 = vector.extract_strided_slice %455 {offsets = [0, 7], sizes = [8, 1], strides = [1, 1]} : vector<8x8xf32> to vector<8x1xf32>
    %507 = vector.shape_cast %506 : vector<8x1xf32> to vector<1x8x1xf32>
    %508 = vector.broadcast %505 : vector<2x1x256xf32> to vector<2x8x256xf32>
    %509 = vector.broadcast %507 : vector<1x8x1xf32> to vector<2x8x256xf32>
    %510 = arith.mulf %508, %509 : vector<2x8x256xf32>
    %511 = arith.addf %504, %510 : vector<2x8x256xf32>
    %c1_i32_60 = arith.constant 1 : i32
    %512 = tpu.dynamic_rotate %318 by %c1_i32_60 dim 2 : vector<2x8x256xf32>, i32 -> vector<2x8x256xf32>
    %c3_61 = arith.constant 3 : index
    %c0_62 = arith.constant 0 : index
    %513 = vector.load %arg2[%c3_61, %c0_62] : memref<9x256xf32, #tpu.memory_space<vmem>>, vector<1x256xf32>
    %514 = vector.shape_cast %513 : vector<1x256xf32> to vector<1x1x256xf32>
    %515 = vector.broadcast %514 : vector<1x1x256xf32> to vector<2x8x256xf32>
    %516 = arith.mulf %512, %515 : vector<2x8x256xf32>
    %c3_63 = arith.constant 3 : index
    %c0_64 = arith.constant 0 : index
    %c0_65 = arith.constant 0 : index
    %517 = vector.load %arg7[%c3_63, %c0_64, %c0_65] : memref<9x8x8xf32, #tpu.memory_space<vmem>>, vector<1x8x8xf32>
    %518 = vector.shape_cast %517 : vector<1x8x8xf32> to vector<8x8xf32>
    %519 = vector.extract_strided_slice %516 {offsets = [0, 0, 0], sizes = [2, 1, 256], strides = [1, 1, 1]} : vector<2x8x256xf32> to vector<2x1x256xf32>
    %520 = vector.extract_strided_slice %518 {offsets = [0, 0], sizes = [8, 1], strides = [1, 1]} : vector<8x8xf32> to vector<8x1xf32>
    %521 = vector.shape_cast %520 : vector<8x1xf32> to vector<1x8x1xf32>
    %522 = vector.broadcast %519 : vector<2x1x256xf32> to vector<2x8x256xf32>
    %523 = vector.broadcast %521 : vector<1x8x1xf32> to vector<2x8x256xf32>
    %524 = arith.mulf %522, %523 : vector<2x8x256xf32>
    %525 = arith.addf %511, %524 : vector<2x8x256xf32>
    %526 = vector.extract_strided_slice %516 {offsets = [0, 1, 0], sizes = [2, 1, 256], strides = [1, 1, 1]} : vector<2x8x256xf32> to vector<2x1x256xf32>
    %527 = vector.extract_strided_slice %518 {offsets = [0, 1], sizes = [8, 1], strides = [1, 1]} : vector<8x8xf32> to vector<8x1xf32>
    %528 = vector.shape_cast %527 : vector<8x1xf32> to vector<1x8x1xf32>
    %529 = vector.broadcast %526 : vector<2x1x256xf32> to vector<2x8x256xf32>
    %530 = vector.broadcast %528 : vector<1x8x1xf32> to vector<2x8x256xf32>
    %531 = arith.mulf %529, %530 : vector<2x8x256xf32>
    %532 = arith.addf %525, %531 : vector<2x8x256xf32>
    %533 = vector.extract_strided_slice %516 {offsets = [0, 2, 0], sizes = [2, 1, 256], strides = [1, 1, 1]} : vector<2x8x256xf32> to vector<2x1x256xf32>
    %534 = vector.extract_strided_slice %518 {offsets = [0, 2], sizes = [8, 1], strides = [1, 1]} : vector<8x8xf32> to vector<8x1xf32>
    %535 = vector.shape_cast %534 : vector<8x1xf32> to vector<1x8x1xf32>
    %536 = vector.broadcast %533 : vector<2x1x256xf32> to vector<2x8x256xf32>
    %537 = vector.broadcast %535 : vector<1x8x1xf32> to vector<2x8x256xf32>
    %538 = arith.mulf %536, %537 : vector<2x8x256xf32>
    %539 = arith.addf %532, %538 : vector<2x8x256xf32>
    %540 = vector.extract_strided_slice %516 {offsets = [0, 3, 0], sizes = [2, 1, 256], strides = [1, 1, 1]} : vector<2x8x256xf32> to vector<2x1x256xf32>
    %541 = vector.extract_strided_slice %518 {offsets = [0, 3], sizes = [8, 1], strides = [1, 1]} : vector<8x8xf32> to vector<8x1xf32>
    %542 = vector.shape_cast %541 : vector<8x1xf32> to vector<1x8x1xf32>
    %543 = vector.broadcast %540 : vector<2x1x256xf32> to vector<2x8x256xf32>
    %544 = vector.broadcast %542 : vector<1x8x1xf32> to vector<2x8x256xf32>
    %545 = arith.mulf %543, %544 : vector<2x8x256xf32>
    %546 = arith.addf %539, %545 : vector<2x8x256xf32>
    %547 = vector.extract_strided_slice %516 {offsets = [0, 4, 0], sizes = [2, 1, 256], strides = [1, 1, 1]} : vector<2x8x256xf32> to vector<2x1x256xf32>
    %548 = vector.extract_strided_slice %518 {offsets = [0, 4], sizes = [8, 1], strides = [1, 1]} : vector<8x8xf32> to vector<8x1xf32>
    %549 = vector.shape_cast %548 : vector<8x1xf32> to vector<1x8x1xf32>
    %550 = vector.broadcast %547 : vector<2x1x256xf32> to vector<2x8x256xf32>
    %551 = vector.broadcast %549 : vector<1x8x1xf32> to vector<2x8x256xf32>
    %552 = arith.mulf %550, %551 : vector<2x8x256xf32>
    %553 = arith.addf %546, %552 : vector<2x8x256xf32>
    %554 = vector.extract_strided_slice %516 {offsets = [0, 5, 0], sizes = [2, 1, 256], strides = [1, 1, 1]} : vector<2x8x256xf32> to vector<2x1x256xf32>
    %555 = vector.extract_strided_slice %518 {offsets = [0, 5], sizes = [8, 1], strides = [1, 1]} : vector<8x8xf32> to vector<8x1xf32>
    %556 = vector.shape_cast %555 : vector<8x1xf32> to vector<1x8x1xf32>
    %557 = vector.broadcast %554 : vector<2x1x256xf32> to vector<2x8x256xf32>
    %558 = vector.broadcast %556 : vector<1x8x1xf32> to vector<2x8x256xf32>
    %559 = arith.mulf %557, %558 : vector<2x8x256xf32>
    %560 = arith.addf %553, %559 : vector<2x8x256xf32>
    %561 = vector.extract_strided_slice %516 {offsets = [0, 6, 0], sizes = [2, 1, 256], strides = [1, 1, 1]} : vector<2x8x256xf32> to vector<2x1x256xf32>
    %562 = vector.extract_strided_slice %518 {offsets = [0, 6], sizes = [8, 1], strides = [1, 1]} : vector<8x8xf32> to vector<8x1xf32>
    %563 = vector.shape_cast %562 : vector<8x1xf32> to vector<1x8x1xf32>
    %564 = vector.broadcast %561 : vector<2x1x256xf32> to vector<2x8x256xf32>
    %565 = vector.broadcast %563 : vector<1x8x1xf32> to vector<2x8x256xf32>
    %566 = arith.mulf %564, %565 : vector<2x8x256xf32>
    %567 = arith.addf %560, %566 : vector<2x8x256xf32>
    %568 = vector.extract_strided_slice %516 {offsets = [0, 7, 0], sizes = [2, 1, 256], strides = [1, 1, 1]} : vector<2x8x256xf32> to vector<2x1x256xf32>
    %569 = vector.extract_strided_slice %518 {offsets = [0, 7], sizes = [8, 1], strides = [1, 1]} : vector<8x8xf32> to vector<8x1xf32>
    %570 = vector.shape_cast %569 : vector<8x1xf32> to vector<1x8x1xf32>
    %571 = vector.broadcast %568 : vector<2x1x256xf32> to vector<2x8x256xf32>
    %572 = vector.broadcast %570 : vector<1x8x1xf32> to vector<2x8x256xf32>
    %573 = arith.mulf %571, %572 : vector<2x8x256xf32>
    %574 = arith.addf %567, %573 : vector<2x8x256xf32>
    %c4_66 = arith.constant 4 : index
    %c0_67 = arith.constant 0 : index
    %c0_68 = arith.constant 0 : index
    %575 = vector.load %arg7[%c4_66, %c0_67, %c0_68] : memref<9x8x8xf32, #tpu.memory_space<vmem>>, vector<1x8x8xf32>
    %576 = vector.shape_cast %575 : vector<1x8x8xf32> to vector<8x8xf32>
    %577 = vector.extract_strided_slice %318 {offsets = [0, 0, 0], sizes = [2, 1, 256], strides = [1, 1, 1]} : vector<2x8x256xf32> to vector<2x1x256xf32>
    %578 = vector.extract_strided_slice %576 {offsets = [0, 0], sizes = [8, 1], strides = [1, 1]} : vector<8x8xf32> to vector<8x1xf32>
    %579 = vector.shape_cast %578 : vector<8x1xf32> to vector<1x8x1xf32>
    %580 = vector.broadcast %577 : vector<2x1x256xf32> to vector<2x8x256xf32>
    %581 = vector.broadcast %579 : vector<1x8x1xf32> to vector<2x8x256xf32>
    %582 = arith.mulf %580, %581 : vector<2x8x256xf32>
    %583 = arith.addf %574, %582 : vector<2x8x256xf32>
    %584 = vector.extract_strided_slice %318 {offsets = [0, 1, 0], sizes = [2, 1, 256], strides = [1, 1, 1]} : vector<2x8x256xf32> to vector<2x1x256xf32>
    %585 = vector.extract_strided_slice %576 {offsets = [0, 1], sizes = [8, 1], strides = [1, 1]} : vector<8x8xf32> to vector<8x1xf32>
    %586 = vector.shape_cast %585 : vector<8x1xf32> to vector<1x8x1xf32>
    %587 = vector.broadcast %584 : vector<2x1x256xf32> to vector<2x8x256xf32>
    %588 = vector.broadcast %586 : vector<1x8x1xf32> to vector<2x8x256xf32>
    %589 = arith.mulf %587, %588 : vector<2x8x256xf32>
    %590 = arith.addf %583, %589 : vector<2x8x256xf32>
    %591 = vector.extract_strided_slice %318 {offsets = [0, 2, 0], sizes = [2, 1, 256], strides = [1, 1, 1]} : vector<2x8x256xf32> to vector<2x1x256xf32>
    %592 = vector.extract_strided_slice %576 {offsets = [0, 2], sizes = [8, 1], strides = [1, 1]} : vector<8x8xf32> to vector<8x1xf32>
    %593 = vector.shape_cast %592 : vector<8x1xf32> to vector<1x8x1xf32>
    %594 = vector.broadcast %591 : vector<2x1x256xf32> to vector<2x8x256xf32>
    %595 = vector.broadcast %593 : vector<1x8x1xf32> to vector<2x8x256xf32>
    %596 = arith.mulf %594, %595 : vector<2x8x256xf32>
    %597 = arith.addf %590, %596 : vector<2x8x256xf32>
    %598 = vector.extract_strided_slice %318 {offsets = [0, 3, 0], sizes = [2, 1, 256], strides = [1, 1, 1]} : vector<2x8x256xf32> to vector<2x1x256xf32>
    %599 = vector.extract_strided_slice %576 {offsets = [0, 3], sizes = [8, 1], strides = [1, 1]} : vector<8x8xf32> to vector<8x1xf32>
    %600 = vector.shape_cast %599 : vector<8x1xf32> to vector<1x8x1xf32>
    %601 = vector.broadcast %598 : vector<2x1x256xf32> to vector<2x8x256xf32>
    %602 = vector.broadcast %600 : vector<1x8x1xf32> to vector<2x8x256xf32>
    %603 = arith.mulf %601, %602 : vector<2x8x256xf32>
    %604 = arith.addf %597, %603 : vector<2x8x256xf32>
    %605 = vector.extract_strided_slice %318 {offsets = [0, 4, 0], sizes = [2, 1, 256], strides = [1, 1, 1]} : vector<2x8x256xf32> to vector<2x1x256xf32>
    %606 = vector.extract_strided_slice %576 {offsets = [0, 4], sizes = [8, 1], strides = [1, 1]} : vector<8x8xf32> to vector<8x1xf32>
    %607 = vector.shape_cast %606 : vector<8x1xf32> to vector<1x8x1xf32>
    %608 = vector.broadcast %605 : vector<2x1x256xf32> to vector<2x8x256xf32>
    %609 = vector.broadcast %607 : vector<1x8x1xf32> to vector<2x8x256xf32>
    %610 = arith.mulf %608, %609 : vector<2x8x256xf32>
    %611 = arith.addf %604, %610 : vector<2x8x256xf32>
    %612 = vector.extract_strided_slice %318 {offsets = [0, 5, 0], sizes = [2, 1, 256], strides = [1, 1, 1]} : vector<2x8x256xf32> to vector<2x1x256xf32>
    %613 = vector.extract_strided_slice %576 {offsets = [0, 5], sizes = [8, 1], strides = [1, 1]} : vector<8x8xf32> to vector<8x1xf32>
    %614 = vector.shape_cast %613 : vector<8x1xf32> to vector<1x8x1xf32>
    %615 = vector.broadcast %612 : vector<2x1x256xf32> to vector<2x8x256xf32>
    %616 = vector.broadcast %614 : vector<1x8x1xf32> to vector<2x8x256xf32>
    %617 = arith.mulf %615, %616 : vector<2x8x256xf32>
    %618 = arith.addf %611, %617 : vector<2x8x256xf32>
    %619 = vector.extract_strided_slice %318 {offsets = [0, 6, 0], sizes = [2, 1, 256], strides = [1, 1, 1]} : vector<2x8x256xf32> to vector<2x1x256xf32>
    %620 = vector.extract_strided_slice %576 {offsets = [0, 6], sizes = [8, 1], strides = [1, 1]} : vector<8x8xf32> to vector<8x1xf32>
    %621 = vector.shape_cast %620 : vector<8x1xf32> to vector<1x8x1xf32>
    %622 = vector.broadcast %619 : vector<2x1x256xf32> to vector<2x8x256xf32>
    %623 = vector.broadcast %621 : vector<1x8x1xf32> to vector<2x8x256xf32>
    %624 = arith.mulf %622, %623 : vector<2x8x256xf32>
    %625 = arith.addf %618, %624 : vector<2x8x256xf32>
    %626 = vector.extract_strided_slice %318 {offsets = [0, 7, 0], sizes = [2, 1, 256], strides = [1, 1, 1]} : vector<2x8x256xf32> to vector<2x1x256xf32>
    %627 = vector.extract_strided_slice %576 {offsets = [0, 7], sizes = [8, 1], strides = [1, 1]} : vector<8x8xf32> to vector<8x1xf32>
    %628 = vector.shape_cast %627 : vector<8x1xf32> to vector<1x8x1xf32>
    %629 = vector.broadcast %626 : vector<2x1x256xf32> to vector<2x8x256xf32>
    %630 = vector.broadcast %628 : vector<1x8x1xf32> to vector<2x8x256xf32>
    %631 = arith.mulf %629, %630 : vector<2x8x256xf32>
    %632 = arith.addf %625, %631 : vector<2x8x256xf32>
    %c255_i32_69 = arith.constant 255 : i32
    %633 = tpu.dynamic_rotate %318 by %c255_i32_69 dim 2 : vector<2x8x256xf32>, i32 -> vector<2x8x256xf32>
    %c5_70 = arith.constant 5 : index
    %c0_71 = arith.constant 0 : index
    %634 = vector.load %arg2[%c5_70, %c0_71] : memref<9x256xf32, #tpu.memory_space<vmem>>, vector<1x256xf32>
    %635 = vector.shape_cast %634 : vector<1x256xf32> to vector<1x1x256xf32>
    %636 = vector.broadcast %635 : vector<1x1x256xf32> to vector<2x8x256xf32>
    %637 = arith.mulf %633, %636 : vector<2x8x256xf32>
    %c5_72 = arith.constant 5 : index
    %c0_73 = arith.constant 0 : index
    %c0_74 = arith.constant 0 : index
    %638 = vector.load %arg7[%c5_72, %c0_73, %c0_74] : memref<9x8x8xf32, #tpu.memory_space<vmem>>, vector<1x8x8xf32>
    %639 = vector.shape_cast %638 : vector<1x8x8xf32> to vector<8x8xf32>
    %640 = vector.extract_strided_slice %637 {offsets = [0, 0, 0], sizes = [2, 1, 256], strides = [1, 1, 1]} : vector<2x8x256xf32> to vector<2x1x256xf32>
    %641 = vector.extract_strided_slice %639 {offsets = [0, 0], sizes = [8, 1], strides = [1, 1]} : vector<8x8xf32> to vector<8x1xf32>
    %642 = vector.shape_cast %641 : vector<8x1xf32> to vector<1x8x1xf32>
    %643 = vector.broadcast %640 : vector<2x1x256xf32> to vector<2x8x256xf32>
    %644 = vector.broadcast %642 : vector<1x8x1xf32> to vector<2x8x256xf32>
    %645 = arith.mulf %643, %644 : vector<2x8x256xf32>
    %646 = arith.addf %632, %645 : vector<2x8x256xf32>
    %647 = vector.extract_strided_slice %637 {offsets = [0, 1, 0], sizes = [2, 1, 256], strides = [1, 1, 1]} : vector<2x8x256xf32> to vector<2x1x256xf32>
    %648 = vector.extract_strided_slice %639 {offsets = [0, 1], sizes = [8, 1], strides = [1, 1]} : vector<8x8xf32> to vector<8x1xf32>
    %649 = vector.shape_cast %648 : vector<8x1xf32> to vector<1x8x1xf32>
    %650 = vector.broadcast %647 : vector<2x1x256xf32> to vector<2x8x256xf32>
    %651 = vector.broadcast %649 : vector<1x8x1xf32> to vector<2x8x256xf32>
    %652 = arith.mulf %650, %651 : vector<2x8x256xf32>
    %653 = arith.addf %646, %652 : vector<2x8x256xf32>
    %654 = vector.extract_strided_slice %637 {offsets = [0, 2, 0], sizes = [2, 1, 256], strides = [1, 1, 1]} : vector<2x8x256xf32> to vector<2x1x256xf32>
    %655 = vector.extract_strided_slice %639 {offsets = [0, 2], sizes = [8, 1], strides = [1, 1]} : vector<8x8xf32> to vector<8x1xf32>
    %656 = vector.shape_cast %655 : vector<8x1xf32> to vector<1x8x1xf32>
    %657 = vector.broadcast %654 : vector<2x1x256xf32> to vector<2x8x256xf32>
    %658 = vector.broadcast %656 : vector<1x8x1xf32> to vector<2x8x256xf32>
    %659 = arith.mulf %657, %658 : vector<2x8x256xf32>
    %660 = arith.addf %653, %659 : vector<2x8x256xf32>
    %661 = vector.extract_strided_slice %637 {offsets = [0, 3, 0], sizes = [2, 1, 256], strides = [1, 1, 1]} : vector<2x8x256xf32> to vector<2x1x256xf32>
    %662 = vector.extract_strided_slice %639 {offsets = [0, 3], sizes = [8, 1], strides = [1, 1]} : vector<8x8xf32> to vector<8x1xf32>
    %663 = vector.shape_cast %662 : vector<8x1xf32> to vector<1x8x1xf32>
    %664 = vector.broadcast %661 : vector<2x1x256xf32> to vector<2x8x256xf32>
    %665 = vector.broadcast %663 : vector<1x8x1xf32> to vector<2x8x256xf32>
    %666 = arith.mulf %664, %665 : vector<2x8x256xf32>
    %667 = arith.addf %660, %666 : vector<2x8x256xf32>
    %668 = vector.extract_strided_slice %637 {offsets = [0, 4, 0], sizes = [2, 1, 256], strides = [1, 1, 1]} : vector<2x8x256xf32> to vector<2x1x256xf32>
    %669 = vector.extract_strided_slice %639 {offsets = [0, 4], sizes = [8, 1], strides = [1, 1]} : vector<8x8xf32> to vector<8x1xf32>
    %670 = vector.shape_cast %669 : vector<8x1xf32> to vector<1x8x1xf32>
    %671 = vector.broadcast %668 : vector<2x1x256xf32> to vector<2x8x256xf32>
    %672 = vector.broadcast %670 : vector<1x8x1xf32> to vector<2x8x256xf32>
    %673 = arith.mulf %671, %672 : vector<2x8x256xf32>
    %674 = arith.addf %667, %673 : vector<2x8x256xf32>
    %675 = vector.extract_strided_slice %637 {offsets = [0, 5, 0], sizes = [2, 1, 256], strides = [1, 1, 1]} : vector<2x8x256xf32> to vector<2x1x256xf32>
    %676 = vector.extract_strided_slice %639 {offsets = [0, 5], sizes = [8, 1], strides = [1, 1]} : vector<8x8xf32> to vector<8x1xf32>
    %677 = vector.shape_cast %676 : vector<8x1xf32> to vector<1x8x1xf32>
    %678 = vector.broadcast %675 : vector<2x1x256xf32> to vector<2x8x256xf32>
    %679 = vector.broadcast %677 : vector<1x8x1xf32> to vector<2x8x256xf32>
    %680 = arith.mulf %678, %679 : vector<2x8x256xf32>
    %681 = arith.addf %674, %680 : vector<2x8x256xf32>
    %682 = vector.extract_strided_slice %637 {offsets = [0, 6, 0], sizes = [2, 1, 256], strides = [1, 1, 1]} : vector<2x8x256xf32> to vector<2x1x256xf32>
    %683 = vector.extract_strided_slice %639 {offsets = [0, 6], sizes = [8, 1], strides = [1, 1]} : vector<8x8xf32> to vector<8x1xf32>
    %684 = vector.shape_cast %683 : vector<8x1xf32> to vector<1x8x1xf32>
    %685 = vector.broadcast %682 : vector<2x1x256xf32> to vector<2x8x256xf32>
    %686 = vector.broadcast %684 : vector<1x8x1xf32> to vector<2x8x256xf32>
    %687 = arith.mulf %685, %686 : vector<2x8x256xf32>
    %688 = arith.addf %681, %687 : vector<2x8x256xf32>
    %689 = vector.extract_strided_slice %637 {offsets = [0, 7, 0], sizes = [2, 1, 256], strides = [1, 1, 1]} : vector<2x8x256xf32> to vector<2x1x256xf32>
    %690 = vector.extract_strided_slice %639 {offsets = [0, 7], sizes = [8, 1], strides = [1, 1]} : vector<8x8xf32> to vector<8x1xf32>
    %691 = vector.shape_cast %690 : vector<8x1xf32> to vector<1x8x1xf32>
    %692 = vector.broadcast %689 : vector<2x1x256xf32> to vector<2x8x256xf32>
    %693 = vector.broadcast %691 : vector<1x8x1xf32> to vector<2x8x256xf32>
    %694 = arith.mulf %692, %693 : vector<2x8x256xf32>
    %695 = arith.addf %688, %694 : vector<2x8x256xf32>
    %c241_i32_75 = arith.constant 241 : i32
    %696 = tpu.dynamic_rotate %318 by %c241_i32_75 dim 2 : vector<2x8x256xf32>, i32 -> vector<2x8x256xf32>
    %c6_76 = arith.constant 6 : index
    %c0_77 = arith.constant 0 : index
    %697 = vector.load %arg2[%c6_76, %c0_77] : memref<9x256xf32, #tpu.memory_space<vmem>>, vector<1x256xf32>
    %698 = vector.shape_cast %697 : vector<1x256xf32> to vector<1x1x256xf32>
    %699 = vector.broadcast %698 : vector<1x1x256xf32> to vector<2x8x256xf32>
    %700 = arith.mulf %696, %699 : vector<2x8x256xf32>
    %c6_78 = arith.constant 6 : index
    %c0_79 = arith.constant 0 : index
    %c0_80 = arith.constant 0 : index
    %701 = vector.load %arg7[%c6_78, %c0_79, %c0_80] : memref<9x8x8xf32, #tpu.memory_space<vmem>>, vector<1x8x8xf32>
    %702 = vector.shape_cast %701 : vector<1x8x8xf32> to vector<8x8xf32>
    %703 = vector.extract_strided_slice %700 {offsets = [0, 0, 0], sizes = [2, 1, 256], strides = [1, 1, 1]} : vector<2x8x256xf32> to vector<2x1x256xf32>
    %704 = vector.extract_strided_slice %702 {offsets = [0, 0], sizes = [8, 1], strides = [1, 1]} : vector<8x8xf32> to vector<8x1xf32>
    %705 = vector.shape_cast %704 : vector<8x1xf32> to vector<1x8x1xf32>
    %706 = vector.broadcast %703 : vector<2x1x256xf32> to vector<2x8x256xf32>
    %707 = vector.broadcast %705 : vector<1x8x1xf32> to vector<2x8x256xf32>
    %708 = arith.mulf %706, %707 : vector<2x8x256xf32>
    %709 = arith.addf %695, %708 : vector<2x8x256xf32>
    %710 = vector.extract_strided_slice %700 {offsets = [0, 1, 0], sizes = [2, 1, 256], strides = [1, 1, 1]} : vector<2x8x256xf32> to vector<2x1x256xf32>
    %711 = vector.extract_strided_slice %702 {offsets = [0, 1], sizes = [8, 1], strides = [1, 1]} : vector<8x8xf32> to vector<8x1xf32>
    %712 = vector.shape_cast %711 : vector<8x1xf32> to vector<1x8x1xf32>
    %713 = vector.broadcast %710 : vector<2x1x256xf32> to vector<2x8x256xf32>
    %714 = vector.broadcast %712 : vector<1x8x1xf32> to vector<2x8x256xf32>
    %715 = arith.mulf %713, %714 : vector<2x8x256xf32>
    %716 = arith.addf %709, %715 : vector<2x8x256xf32>
    %717 = vector.extract_strided_slice %700 {offsets = [0, 2, 0], sizes = [2, 1, 256], strides = [1, 1, 1]} : vector<2x8x256xf32> to vector<2x1x256xf32>
    %718 = vector.extract_strided_slice %702 {offsets = [0, 2], sizes = [8, 1], strides = [1, 1]} : vector<8x8xf32> to vector<8x1xf32>
    %719 = vector.shape_cast %718 : vector<8x1xf32> to vector<1x8x1xf32>
    %720 = vector.broadcast %717 : vector<2x1x256xf32> to vector<2x8x256xf32>
    %721 = vector.broadcast %719 : vector<1x8x1xf32> to vector<2x8x256xf32>
    %722 = arith.mulf %720, %721 : vector<2x8x256xf32>
    %723 = arith.addf %716, %722 : vector<2x8x256xf32>
    %724 = vector.extract_strided_slice %700 {offsets = [0, 3, 0], sizes = [2, 1, 256], strides = [1, 1, 1]} : vector<2x8x256xf32> to vector<2x1x256xf32>
    %725 = vector.extract_strided_slice %702 {offsets = [0, 3], sizes = [8, 1], strides = [1, 1]} : vector<8x8xf32> to vector<8x1xf32>
    %726 = vector.shape_cast %725 : vector<8x1xf32> to vector<1x8x1xf32>
    %727 = vector.broadcast %724 : vector<2x1x256xf32> to vector<2x8x256xf32>
    %728 = vector.broadcast %726 : vector<1x8x1xf32> to vector<2x8x256xf32>
    %729 = arith.mulf %727, %728 : vector<2x8x256xf32>
    %730 = arith.addf %723, %729 : vector<2x8x256xf32>
    %731 = vector.extract_strided_slice %700 {offsets = [0, 4, 0], sizes = [2, 1, 256], strides = [1, 1, 1]} : vector<2x8x256xf32> to vector<2x1x256xf32>
    %732 = vector.extract_strided_slice %702 {offsets = [0, 4], sizes = [8, 1], strides = [1, 1]} : vector<8x8xf32> to vector<8x1xf32>
    %733 = vector.shape_cast %732 : vector<8x1xf32> to vector<1x8x1xf32>
    %734 = vector.broadcast %731 : vector<2x1x256xf32> to vector<2x8x256xf32>
    %735 = vector.broadcast %733 : vector<1x8x1xf32> to vector<2x8x256xf32>
    %736 = arith.mulf %734, %735 : vector<2x8x256xf32>
    %737 = arith.addf %730, %736 : vector<2x8x256xf32>
    %738 = vector.extract_strided_slice %700 {offsets = [0, 5, 0], sizes = [2, 1, 256], strides = [1, 1, 1]} : vector<2x8x256xf32> to vector<2x1x256xf32>
    %739 = vector.extract_strided_slice %702 {offsets = [0, 5], sizes = [8, 1], strides = [1, 1]} : vector<8x8xf32> to vector<8x1xf32>
    %740 = vector.shape_cast %739 : vector<8x1xf32> to vector<1x8x1xf32>
    %741 = vector.broadcast %738 : vector<2x1x256xf32> to vector<2x8x256xf32>
    %742 = vector.broadcast %740 : vector<1x8x1xf32> to vector<2x8x256xf32>
    %743 = arith.mulf %741, %742 : vector<2x8x256xf32>
    %744 = arith.addf %737, %743 : vector<2x8x256xf32>
    %745 = vector.extract_strided_slice %700 {offsets = [0, 6, 0], sizes = [2, 1, 256], strides = [1, 1, 1]} : vector<2x8x256xf32> to vector<2x1x256xf32>
    %746 = vector.extract_strided_slice %702 {offsets = [0, 6], sizes = [8, 1], strides = [1, 1]} : vector<8x8xf32> to vector<8x1xf32>
    %747 = vector.shape_cast %746 : vector<8x1xf32> to vector<1x8x1xf32>
    %748 = vector.broadcast %745 : vector<2x1x256xf32> to vector<2x8x256xf32>
    %749 = vector.broadcast %747 : vector<1x8x1xf32> to vector<2x8x256xf32>
    %750 = arith.mulf %748, %749 : vector<2x8x256xf32>
    %751 = arith.addf %744, %750 : vector<2x8x256xf32>
    %752 = vector.extract_strided_slice %700 {offsets = [0, 7, 0], sizes = [2, 1, 256], strides = [1, 1, 1]} : vector<2x8x256xf32> to vector<2x1x256xf32>
    %753 = vector.extract_strided_slice %702 {offsets = [0, 7], sizes = [8, 1], strides = [1, 1]} : vector<8x8xf32> to vector<8x1xf32>
    %754 = vector.shape_cast %753 : vector<8x1xf32> to vector<1x8x1xf32>
    %755 = vector.broadcast %752 : vector<2x1x256xf32> to vector<2x8x256xf32>
    %756 = vector.broadcast %754 : vector<1x8x1xf32> to vector<2x8x256xf32>
    %757 = arith.mulf %755, %756 : vector<2x8x256xf32>
    %758 = arith.addf %751, %757 : vector<2x8x256xf32>
    %c240_i32_81 = arith.constant 240 : i32
    %759 = tpu.dynamic_rotate %318 by %c240_i32_81 dim 2 : vector<2x8x256xf32>, i32 -> vector<2x8x256xf32>
    %c7_82 = arith.constant 7 : index
    %c0_83 = arith.constant 0 : index
    %760 = vector.load %arg2[%c7_82, %c0_83] : memref<9x256xf32, #tpu.memory_space<vmem>>, vector<1x256xf32>
    %761 = vector.shape_cast %760 : vector<1x256xf32> to vector<1x1x256xf32>
    %762 = vector.broadcast %761 : vector<1x1x256xf32> to vector<2x8x256xf32>
    %763 = arith.mulf %759, %762 : vector<2x8x256xf32>
    %c7_84 = arith.constant 7 : index
    %c0_85 = arith.constant 0 : index
    %c0_86 = arith.constant 0 : index
    %764 = vector.load %arg7[%c7_84, %c0_85, %c0_86] : memref<9x8x8xf32, #tpu.memory_space<vmem>>, vector<1x8x8xf32>
    %765 = vector.shape_cast %764 : vector<1x8x8xf32> to vector<8x8xf32>
    %766 = vector.extract_strided_slice %763 {offsets = [0, 0, 0], sizes = [2, 1, 256], strides = [1, 1, 1]} : vector<2x8x256xf32> to vector<2x1x256xf32>
    %767 = vector.extract_strided_slice %765 {offsets = [0, 0], sizes = [8, 1], strides = [1, 1]} : vector<8x8xf32> to vector<8x1xf32>
    %768 = vector.shape_cast %767 : vector<8x1xf32> to vector<1x8x1xf32>
    %769 = vector.broadcast %766 : vector<2x1x256xf32> to vector<2x8x256xf32>
    %770 = vector.broadcast %768 : vector<1x8x1xf32> to vector<2x8x256xf32>
    %771 = arith.mulf %769, %770 : vector<2x8x256xf32>
    %772 = arith.addf %758, %771 : vector<2x8x256xf32>
    %773 = vector.extract_strided_slice %763 {offsets = [0, 1, 0], sizes = [2, 1, 256], strides = [1, 1, 1]} : vector<2x8x256xf32> to vector<2x1x256xf32>
    %774 = vector.extract_strided_slice %765 {offsets = [0, 1], sizes = [8, 1], strides = [1, 1]} : vector<8x8xf32> to vector<8x1xf32>
    %775 = vector.shape_cast %774 : vector<8x1xf32> to vector<1x8x1xf32>
    %776 = vector.broadcast %773 : vector<2x1x256xf32> to vector<2x8x256xf32>
    %777 = vector.broadcast %775 : vector<1x8x1xf32> to vector<2x8x256xf32>
    %778 = arith.mulf %776, %777 : vector<2x8x256xf32>
    %779 = arith.addf %772, %778 : vector<2x8x256xf32>
    %780 = vector.extract_strided_slice %763 {offsets = [0, 2, 0], sizes = [2, 1, 256], strides = [1, 1, 1]} : vector<2x8x256xf32> to vector<2x1x256xf32>
    %781 = vector.extract_strided_slice %765 {offsets = [0, 2], sizes = [8, 1], strides = [1, 1]} : vector<8x8xf32> to vector<8x1xf32>
    %782 = vector.shape_cast %781 : vector<8x1xf32> to vector<1x8x1xf32>
    %783 = vector.broadcast %780 : vector<2x1x256xf32> to vector<2x8x256xf32>
    %784 = vector.broadcast %782 : vector<1x8x1xf32> to vector<2x8x256xf32>
    %785 = arith.mulf %783, %784 : vector<2x8x256xf32>
    %786 = arith.addf %779, %785 : vector<2x8x256xf32>
    %787 = vector.extract_strided_slice %763 {offsets = [0, 3, 0], sizes = [2, 1, 256], strides = [1, 1, 1]} : vector<2x8x256xf32> to vector<2x1x256xf32>
    %788 = vector.extract_strided_slice %765 {offsets = [0, 3], sizes = [8, 1], strides = [1, 1]} : vector<8x8xf32> to vector<8x1xf32>
    %789 = vector.shape_cast %788 : vector<8x1xf32> to vector<1x8x1xf32>
    %790 = vector.broadcast %787 : vector<2x1x256xf32> to vector<2x8x256xf32>
    %791 = vector.broadcast %789 : vector<1x8x1xf32> to vector<2x8x256xf32>
    %792 = arith.mulf %790, %791 : vector<2x8x256xf32>
    %793 = arith.addf %786, %792 : vector<2x8x256xf32>
    %794 = vector.extract_strided_slice %763 {offsets = [0, 4, 0], sizes = [2, 1, 256], strides = [1, 1, 1]} : vector<2x8x256xf32> to vector<2x1x256xf32>
    %795 = vector.extract_strided_slice %765 {offsets = [0, 4], sizes = [8, 1], strides = [1, 1]} : vector<8x8xf32> to vector<8x1xf32>
    %796 = vector.shape_cast %795 : vector<8x1xf32> to vector<1x8x1xf32>
    %797 = vector.broadcast %794 : vector<2x1x256xf32> to vector<2x8x256xf32>
    %798 = vector.broadcast %796 : vector<1x8x1xf32> to vector<2x8x256xf32>
    %799 = arith.mulf %797, %798 : vector<2x8x256xf32>
    %800 = arith.addf %793, %799 : vector<2x8x256xf32>
    %801 = vector.extract_strided_slice %763 {offsets = [0, 5, 0], sizes = [2, 1, 256], strides = [1, 1, 1]} : vector<2x8x256xf32> to vector<2x1x256xf32>
    %802 = vector.extract_strided_slice %765 {offsets = [0, 5], sizes = [8, 1], strides = [1, 1]} : vector<8x8xf32> to vector<8x1xf32>
    %803 = vector.shape_cast %802 : vector<8x1xf32> to vector<1x8x1xf32>
    %804 = vector.broadcast %801 : vector<2x1x256xf32> to vector<2x8x256xf32>
    %805 = vector.broadcast %803 : vector<1x8x1xf32> to vector<2x8x256xf32>
    %806 = arith.mulf %804, %805 : vector<2x8x256xf32>
    %807 = arith.addf %800, %806 : vector<2x8x256xf32>
    %808 = vector.extract_strided_slice %763 {offsets = [0, 6, 0], sizes = [2, 1, 256], strides = [1, 1, 1]} : vector<2x8x256xf32> to vector<2x1x256xf32>
    %809 = vector.extract_strided_slice %765 {offsets = [0, 6], sizes = [8, 1], strides = [1, 1]} : vector<8x8xf32> to vector<8x1xf32>
    %810 = vector.shape_cast %809 : vector<8x1xf32> to vector<1x8x1xf32>
    %811 = vector.broadcast %808 : vector<2x1x256xf32> to vector<2x8x256xf32>
    %812 = vector.broadcast %810 : vector<1x8x1xf32> to vector<2x8x256xf32>
    %813 = arith.mulf %811, %812 : vector<2x8x256xf32>
    %814 = arith.addf %807, %813 : vector<2x8x256xf32>
    %815 = vector.extract_strided_slice %763 {offsets = [0, 7, 0], sizes = [2, 1, 256], strides = [1, 1, 1]} : vector<2x8x256xf32> to vector<2x1x256xf32>
    %816 = vector.extract_strided_slice %765 {offsets = [0, 7], sizes = [8, 1], strides = [1, 1]} : vector<8x8xf32> to vector<8x1xf32>
    %817 = vector.shape_cast %816 : vector<8x1xf32> to vector<1x8x1xf32>
    %818 = vector.broadcast %815 : vector<2x1x256xf32> to vector<2x8x256xf32>
    %819 = vector.broadcast %817 : vector<1x8x1xf32> to vector<2x8x256xf32>
    %820 = arith.mulf %818, %819 : vector<2x8x256xf32>
    %821 = arith.addf %814, %820 : vector<2x8x256xf32>
    %c239_i32_87 = arith.constant 239 : i32
    %822 = tpu.dynamic_rotate %318 by %c239_i32_87 dim 2 : vector<2x8x256xf32>, i32 -> vector<2x8x256xf32>
    %c8_88 = arith.constant 8 : index
    %c0_89 = arith.constant 0 : index
    %823 = vector.load %arg2[%c8_88, %c0_89] : memref<9x256xf32, #tpu.memory_space<vmem>>, vector<1x256xf32>
    %824 = vector.shape_cast %823 : vector<1x256xf32> to vector<1x1x256xf32>
    %825 = vector.broadcast %824 : vector<1x1x256xf32> to vector<2x8x256xf32>
    %826 = arith.mulf %822, %825 : vector<2x8x256xf32>
    %c8_90 = arith.constant 8 : index
    %c0_91 = arith.constant 0 : index
    %c0_92 = arith.constant 0 : index
    %827 = vector.load %arg7[%c8_90, %c0_91, %c0_92] : memref<9x8x8xf32, #tpu.memory_space<vmem>>, vector<1x8x8xf32>
    %828 = vector.shape_cast %827 : vector<1x8x8xf32> to vector<8x8xf32>
    %829 = vector.extract_strided_slice %826 {offsets = [0, 0, 0], sizes = [2, 1, 256], strides = [1, 1, 1]} : vector<2x8x256xf32> to vector<2x1x256xf32>
    %830 = vector.extract_strided_slice %828 {offsets = [0, 0], sizes = [8, 1], strides = [1, 1]} : vector<8x8xf32> to vector<8x1xf32>
    %831 = vector.shape_cast %830 : vector<8x1xf32> to vector<1x8x1xf32>
    %832 = vector.broadcast %829 : vector<2x1x256xf32> to vector<2x8x256xf32>
    %833 = vector.broadcast %831 : vector<1x8x1xf32> to vector<2x8x256xf32>
    %834 = arith.mulf %832, %833 : vector<2x8x256xf32>
    %835 = arith.addf %821, %834 : vector<2x8x256xf32>
    %836 = vector.extract_strided_slice %826 {offsets = [0, 1, 0], sizes = [2, 1, 256], strides = [1, 1, 1]} : vector<2x8x256xf32> to vector<2x1x256xf32>
    %837 = vector.extract_strided_slice %828 {offsets = [0, 1], sizes = [8, 1], strides = [1, 1]} : vector<8x8xf32> to vector<8x1xf32>
    %838 = vector.shape_cast %837 : vector<8x1xf32> to vector<1x8x1xf32>
    %839 = vector.broadcast %836 : vector<2x1x256xf32> to vector<2x8x256xf32>
    %840 = vector.broadcast %838 : vector<1x8x1xf32> to vector<2x8x256xf32>
    %841 = arith.mulf %839, %840 : vector<2x8x256xf32>
    %842 = arith.addf %835, %841 : vector<2x8x256xf32>
    %843 = vector.extract_strided_slice %826 {offsets = [0, 2, 0], sizes = [2, 1, 256], strides = [1, 1, 1]} : vector<2x8x256xf32> to vector<2x1x256xf32>
    %844 = vector.extract_strided_slice %828 {offsets = [0, 2], sizes = [8, 1], strides = [1, 1]} : vector<8x8xf32> to vector<8x1xf32>
    %845 = vector.shape_cast %844 : vector<8x1xf32> to vector<1x8x1xf32>
    %846 = vector.broadcast %843 : vector<2x1x256xf32> to vector<2x8x256xf32>
    %847 = vector.broadcast %845 : vector<1x8x1xf32> to vector<2x8x256xf32>
    %848 = arith.mulf %846, %847 : vector<2x8x256xf32>
    %849 = arith.addf %842, %848 : vector<2x8x256xf32>
    %850 = vector.extract_strided_slice %826 {offsets = [0, 3, 0], sizes = [2, 1, 256], strides = [1, 1, 1]} : vector<2x8x256xf32> to vector<2x1x256xf32>
    %851 = vector.extract_strided_slice %828 {offsets = [0, 3], sizes = [8, 1], strides = [1, 1]} : vector<8x8xf32> to vector<8x1xf32>
    %852 = vector.shape_cast %851 : vector<8x1xf32> to vector<1x8x1xf32>
    %853 = vector.broadcast %850 : vector<2x1x256xf32> to vector<2x8x256xf32>
    %854 = vector.broadcast %852 : vector<1x8x1xf32> to vector<2x8x256xf32>
    %855 = arith.mulf %853, %854 : vector<2x8x256xf32>
    %856 = arith.addf %849, %855 : vector<2x8x256xf32>
    %857 = vector.extract_strided_slice %826 {offsets = [0, 4, 0], sizes = [2, 1, 256], strides = [1, 1, 1]} : vector<2x8x256xf32> to vector<2x1x256xf32>
    %858 = vector.extract_strided_slice %828 {offsets = [0, 4], sizes = [8, 1], strides = [1, 1]} : vector<8x8xf32> to vector<8x1xf32>
    %859 = vector.shape_cast %858 : vector<8x1xf32> to vector<1x8x1xf32>
    %860 = vector.broadcast %857 : vector<2x1x256xf32> to vector<2x8x256xf32>
    %861 = vector.broadcast %859 : vector<1x8x1xf32> to vector<2x8x256xf32>
    %862 = arith.mulf %860, %861 : vector<2x8x256xf32>
    %863 = arith.addf %856, %862 : vector<2x8x256xf32>
    %864 = vector.extract_strided_slice %826 {offsets = [0, 5, 0], sizes = [2, 1, 256], strides = [1, 1, 1]} : vector<2x8x256xf32> to vector<2x1x256xf32>
    %865 = vector.extract_strided_slice %828 {offsets = [0, 5], sizes = [8, 1], strides = [1, 1]} : vector<8x8xf32> to vector<8x1xf32>
    %866 = vector.shape_cast %865 : vector<8x1xf32> to vector<1x8x1xf32>
    %867 = vector.broadcast %864 : vector<2x1x256xf32> to vector<2x8x256xf32>
    %868 = vector.broadcast %866 : vector<1x8x1xf32> to vector<2x8x256xf32>
    %869 = arith.mulf %867, %868 : vector<2x8x256xf32>
    %870 = arith.addf %863, %869 : vector<2x8x256xf32>
    %871 = vector.extract_strided_slice %826 {offsets = [0, 6, 0], sizes = [2, 1, 256], strides = [1, 1, 1]} : vector<2x8x256xf32> to vector<2x1x256xf32>
    %872 = vector.extract_strided_slice %828 {offsets = [0, 6], sizes = [8, 1], strides = [1, 1]} : vector<8x8xf32> to vector<8x1xf32>
    %873 = vector.shape_cast %872 : vector<8x1xf32> to vector<1x8x1xf32>
    %874 = vector.broadcast %871 : vector<2x1x256xf32> to vector<2x8x256xf32>
    %875 = vector.broadcast %873 : vector<1x8x1xf32> to vector<2x8x256xf32>
    %876 = arith.mulf %874, %875 : vector<2x8x256xf32>
    %877 = arith.addf %870, %876 : vector<2x8x256xf32>
    %878 = vector.extract_strided_slice %826 {offsets = [0, 7, 0], sizes = [2, 1, 256], strides = [1, 1, 1]} : vector<2x8x256xf32> to vector<2x1x256xf32>
    %879 = vector.extract_strided_slice %828 {offsets = [0, 7], sizes = [8, 1], strides = [1, 1]} : vector<8x8xf32> to vector<8x1xf32>
    %880 = vector.shape_cast %879 : vector<8x1xf32> to vector<1x8x1xf32>
    %881 = vector.broadcast %878 : vector<2x1x256xf32> to vector<2x8x256xf32>
    %882 = vector.broadcast %880 : vector<1x8x1xf32> to vector<2x8x256xf32>
    %883 = arith.mulf %881, %882 : vector<2x8x256xf32>
    %884 = arith.addf %877, %883 : vector<2x8x256xf32>
    %c0_93 = arith.constant 0 : index
    %c0_94 = arith.constant 0 : index
    %885 = vector.load %arg3[%c0_93, %c0_94] : memref<8x4xf32, #tpu.memory_space<vmem>>, vector<8x4xf32>
    %c0_95 = arith.constant 0 : index
    %c0_96 = arith.constant 0 : index
    %886 = vector.load %arg4[%c0_95, %c0_96] : memref<8x1xf32, #tpu.memory_space<vmem>>, vector<8x1xf32>
    %887 = vector.shape_cast %886 : vector<8x1xf32> to vector<1x8x1xf32>
    %888 = vector.shape_cast %887 : vector<1x8x1xf32> to vector<1x8x1xf32>
    %889 = vector.broadcast %888 : vector<1x8x1xf32> to vector<2x8x256xf32>
    %890 = vector.extract_strided_slice %0 {offsets = [0, 0, 0], sizes = [2, 1, 256], strides = [1, 1, 1]} : vector<2x4x256xf32> to vector<2x1x256xf32>
    %891 = vector.extract_strided_slice %885 {offsets = [0, 0], sizes = [8, 1], strides = [1, 1]} : vector<8x4xf32> to vector<8x1xf32>
    %892 = vector.shape_cast %891 : vector<8x1xf32> to vector<1x8x1xf32>
    %893 = vector.broadcast %890 : vector<2x1x256xf32> to vector<2x8x256xf32>
    %894 = vector.broadcast %892 : vector<1x8x1xf32> to vector<2x8x256xf32>
    %895 = arith.mulf %893, %894 : vector<2x8x256xf32>
    %896 = arith.addf %889, %895 : vector<2x8x256xf32>
    %897 = vector.extract_strided_slice %0 {offsets = [0, 1, 0], sizes = [2, 1, 256], strides = [1, 1, 1]} : vector<2x4x256xf32> to vector<2x1x256xf32>
    %898 = vector.extract_strided_slice %885 {offsets = [0, 1], sizes = [8, 1], strides = [1, 1]} : vector<8x4xf32> to vector<8x1xf32>
    %899 = vector.shape_cast %898 : vector<8x1xf32> to vector<1x8x1xf32>
    %900 = vector.broadcast %897 : vector<2x1x256xf32> to vector<2x8x256xf32>
    %901 = vector.broadcast %899 : vector<1x8x1xf32> to vector<2x8x256xf32>
    %902 = arith.mulf %900, %901 : vector<2x8x256xf32>
    %903 = arith.addf %896, %902 : vector<2x8x256xf32>
    %904 = vector.extract_strided_slice %0 {offsets = [0, 2, 0], sizes = [2, 1, 256], strides = [1, 1, 1]} : vector<2x4x256xf32> to vector<2x1x256xf32>
    %905 = vector.extract_strided_slice %885 {offsets = [0, 2], sizes = [8, 1], strides = [1, 1]} : vector<8x4xf32> to vector<8x1xf32>
    %906 = vector.shape_cast %905 : vector<8x1xf32> to vector<1x8x1xf32>
    %907 = vector.broadcast %904 : vector<2x1x256xf32> to vector<2x8x256xf32>
    %908 = vector.broadcast %906 : vector<1x8x1xf32> to vector<2x8x256xf32>
    %909 = arith.mulf %907, %908 : vector<2x8x256xf32>
    %910 = arith.addf %903, %909 : vector<2x8x256xf32>
    %911 = vector.extract_strided_slice %0 {offsets = [0, 3, 0], sizes = [2, 1, 256], strides = [1, 1, 1]} : vector<2x4x256xf32> to vector<2x1x256xf32>
    %912 = vector.extract_strided_slice %885 {offsets = [0, 3], sizes = [8, 1], strides = [1, 1]} : vector<8x4xf32> to vector<8x1xf32>
    %913 = vector.shape_cast %912 : vector<8x1xf32> to vector<1x8x1xf32>
    %914 = vector.broadcast %911 : vector<2x1x256xf32> to vector<2x8x256xf32>
    %915 = vector.broadcast %913 : vector<1x8x1xf32> to vector<2x8x256xf32>
    %916 = arith.mulf %914, %915 : vector<2x8x256xf32>
    %917 = arith.addf %910, %916 : vector<2x8x256xf32>
    %918 = arith.addf %884, %917 : vector<2x8x256xf32>
    %c0_97 = arith.constant 0 : index
    %c0_98 = arith.constant 0 : index
    %c0_99 = arith.constant 0 : index
    %919 = vector.load %arg9[%c0_97, %c0_98, %c0_99] : memref<2x8x256xf32, #tpu.memory_space<vmem>>, vector<2x8x256xf32>
    tpu.vector_store %arg9[%c0_97, %c0_98, %c0_99], %918 {strides = array<i32>} : memref<2x8x256xf32, #tpu.memory_space<vmem>>, vector<2x8x256xf32>,
    return
  }
  func.func @transform_0(%arg0: i32) -> (i32, i32, i32) {
    %c0_i32 = arith.constant 0 : i32
    %c0_i32_0 = arith.constant 0 : i32
    %c0_i32_1 = arith.constant 0 : i32
    return %arg0, %c0_i32, %c0_i32_0 : i32, i32, i32
  }
  func.func @transform_1(%arg0: i32) -> (i32, i32) {
    %c0_i32 = arith.constant 0 : i32
    %c0_i32_0 = arith.constant 0 : i32
    %c0_i32_1 = arith.constant 0 : i32
    return %c0_i32, %c0_i32_0 : i32, i32
  }
  func.func @transform_2(%arg0: i32) -> (i32, i32) {
    %c0_i32 = arith.constant 0 : i32
    %c0_i32_0 = arith.constant 0 : i32
    %c0_i32_1 = arith.constant 0 : i32
    return %c0_i32, %c0_i32_0 : i32, i32
  }
  func.func @transform_3(%arg0: i32) -> (i32, i32) {
    %c0_i32 = arith.constant 0 : i32
    %c0_i32_0 = arith.constant 0 : i32
    %c0_i32_1 = arith.constant 0 : i32
    return %c0_i32, %c0_i32_0 : i32, i32
  }
  func.func @transform_4(%arg0: i32) -> (i32, i32, i32) {
    %c0_i32 = arith.constant 0 : i32
    %c0_i32_0 = arith.constant 0 : i32
    %c0_i32_1 = arith.constant 0 : i32
    %c0_i32_2 = arith.constant 0 : i32
    return %c0_i32, %c0_i32_0, %c0_i32_1 : i32, i32, i32
  }
  func.func @transform_5(%arg0: i32) -> (i32, i32) {
    %c0_i32 = arith.constant 0 : i32
    %c0_i32_0 = arith.constant 0 : i32
    %c0_i32_1 = arith.constant 0 : i32
    return %c0_i32, %c0_i32_0 : i32, i32
  }
  func.func @transform_6(%arg0: i32) -> (i32, i32, i32) {
    %c0_i32 = arith.constant 0 : i32
    %c0_i32_0 = arith.constant 0 : i32
    %c0_i32_1 = arith.constant 0 : i32
    %c0_i32_2 = arith.constant 0 : i32
    return %c0_i32, %c0_i32_0, %c0_i32_1 : i32, i32, i32
  }
  func.func @transform_7(%arg0: i32) -> (i32, i32) {
    %c0_i32 = arith.constant 0 : i32
    %c0_i32_0 = arith.constant 0 : i32
    %c0_i32_1 = arith.constant 0 : i32
    return %c0_i32, %c0_i32_0 : i32, i32
  }
  func.func @transform_8(%arg0: i32) -> (i32, i32, i32) {
    %c0_i32 = arith.constant 0 : i32
    %c0_i32_0 = arith.constant 0 : i32
    %c0_i32_1 = arith.constant 0 : i32
    return %arg0, %c0_i32, %c0_i32_0 : i32, i32, i32
  }
}

</mosaic_0001>

<bundles_post_ra>
// kernel: tpu_custom_call.1
= control target key start
LH: loop header
LB: loop body
LE: loop exit
PB: predicated region body
PF: predicated region fallthrough
CT: control target
= control target key end

     0   :  { %v6838_v3 = vmov 0   ;;  %s3970_s11 = smov 17   ;;  %s6825_s0 = inlined_call_operand.vmem [shape: f32[2,4,256], index: 0, kind: input, shape index: {}]   ;;  %s6826_s1 = inlined_call_operand.vmem [shape: f32[9,256], index: 1, kind: input, shape index: {}]   ;;  %s6827_s2 = inlined_call_operand.vmem [shape: f32[8,4], index: 2, kind: input, shape index: {}]   ;;  %s6828_s3 = inlined_call_operand.vmem [shape: f32[8,1], index: 3, kind: input, shape index: {}]   ;;  %s6829_s4 = inlined_call_operand.vmem [shape: f32[9,8,4], index: 4, kind: input, shape index: {}]   ;;  %s6830_s5 = inlined_call_operand.vmem [shape: f32[8,1], index: 5, kind: input, shape index: {}]   ;;  %s6831_s6 = inlined_call_operand.vmem [shape: f32[9,8,8], index: 6, kind: input, shape index: {}]   ;;  %s6832_s7 = inlined_call_operand.vmem [shape: f32[8,1], index: 7, kind: input, shape index: {}]   ;;  %s6833_s8 = inlined_call_operand.hbm [shape: f32[2,8,256], index: 8, kind: output, shape index: {}]  }
   0x1   :  { %v34_v0 = vld [vmem:[%s6830_s5] sm:$0xff]  ;;  %v31_v1 = vld [vmem:[%s6825_s0 + $0x8] sm:$0xff]  ;;  %3848 = vset.pattern.permute.xlu0 %v6838_v3  ;;  %3849 = vset.pattern.permute.xlu1 %v6838_v3 }
   0x2   :  { %v30_v2 = vld [vmem:[%s6825_s0] sm:$0xff]  ;;  %v4042_v4 = vmax.f32 %v31_v1, 0.0  ;;  %37 = vperm.xlu0 %3848, %v34_v0  }
   0x3   :  { %v4044_v5 = vmax.f32 %v30_v2, 0.0 }
   0x4   :  { %48 = vrot.lane.b32.xlu1 %v4042_v4, %s3970_s11 }
   0x5   :  { %v4051_v6 = vcombine.high %v4044_v5, %v4044_v5 }
   0x6   :  { %13 = vsyncpa [#allocation3], 0  ;;  %46 = vrot.lane.b32.xlu0 %v4044_v5, %s3970_s11  ;;  %v4057_v7 = vcombine.high %v4042_v4, %v4042_v4  ;;  %v6836_v8 = vmov 3   ;;  %v77_v9 = vld [vmem:[%s6829_s4] sm:$0xff]  ;;  %s3972_s13 = smov 16   ;;  %v6840_v10 = vmov 2   ;;  %v54_v30 = vlaneseq }
   0x7   :  { %3854 = vset.pattern.permute.xlu0 %v6836_v8  ;;  %v3808_v11 = vld [vmem:[%s6829_s4 + $0x8] sm:$0xff]  ;;  %s3974_s16 = smov 15   ;;  %v6834_v12 = vmov 1   ;;  %v3810_v13 = vld [vmem:[%s6829_s4 + $0x10] sm:$0xff]  ;;  %s3976_s19 = smov 1   ;;  %v3812_v14 = vld [vmem:[%s6829_s4 + $0x18] sm:$0xff] }
   0x8   :  { %50 = vrot.lane.b32.xlu1 %v4051_v6, %s3970_s11  ;;  %v3813_v15 = vld [vmem:[%s6829_s4 + $0x20] sm:$0xff]  ;;  %s3977_s24 = smov 127   ;;  %v3815_v16 = vld [vmem:[%s6829_s4 + $0x28] sm:$0xff]  ;;  %s3978_s27 = smov 113   ;;  %v3817_v17 = vld [vmem:[%s6829_s4 + $0x30] sm:$0xff]  ;;  %v4189_v34 = vshrl.u32 %v54_v30, 7 }
   0x9   :  { %s3979_s30 = smov 112   ;;  %v3819_v18 = vld [vmem:[%s6829_s4 + $0x38] sm:$0xff]  ;;  %s3980_s5 = smov 111   ;;  %v4141_v19 = vld [vmem:[%s6829_s4 + $0x40] sm:$0xff]  ;;  %v4194_v36 = vand.u32 127, %v54_v30 }
   0xa   :  { %52 = vrot.lane.b32.xlu0 %v4057_v7, %s3970_s11  ;;  %v4184_v32 = vld [vmem:[%s6831_s6] sm:$0xff]  ;;  %v4199_v38 = vsub.s32 0, %v4189_v34  ;;  %v4208_v41 = vsub.s32 1, %v4189_v34  ;;  %v4258_v59 = vsub.s32 2, %v4189_v34  ;;  %v4261_v60 = vsub.s32 3, %v4189_v34 }
   0xb   :  { %v61_v40 = vld [vmem:[%s6826_s1] ss:$8 sm:$0x3]  ;;  %vm56_vm0 = vcmp.lt.s32.totalorder %v4194_v36, 17  ;;  %v4273_v0 = vsub.s32 4, %v4189_v34  ;;  %vm199_vm1 = vcmp.lt.s32.totalorder %v4194_v36, 16 }
   0xc   :  { %96 = vperm.xlu1 %3849, %v77_v9   ;;  %6919 = vst [vmem:[#allocation5_spill] sm:$0xff] %v4199_v38  ;;  %6920 = vst [vmem:[#allocation6_spill] sm:$0xff] %v4208_v41  ;;  %v4216_v43 = vrot.slane %v61_v40, %v4199_v38  ;;  %v4223_v46 = vrot.slane %v61_v40, %v4208_v41  ;;  %v3807_v62 = vld [vmem:[%s6826_s1 + $0x1] ss:$8 sm:$0x3]  ;;  %vm344_vm2 = vcmp.lt.s32.totalorder %v4194_v36, 15 }
   0xd   :  { %v3809_v63 = vld [vmem:[%s6826_s1 + $0x2] ss:$8 sm:$0x3]  ;;  %6925 = vst [vmem:[#allocation11_spill] sm:$0xff] %v4273_v0  ;;  %vm489_vm3 = vcmp.lt.s32.totalorder %v4194_v36, 1  ;;  %vm829_vm4 = vcmp.lt.s32.totalorder %v4194_v36, 127 }
   0xe   :  { %191 = vrot.lane.b32.xlu0 %v4044_v5, %s3972_s13  ;;  %6921 = vst [vmem:[#allocation7_spill] sm:$0xff] %v4216_v43  ;;  %6922 = vst [vmem:[#allocation8_spill] sm:$0xff] %v4223_v46  ;;  %vm974_vm5 = vcmp.lt.s32.totalorder %v4194_v36, 113  ;;  %vm1119_vm6 = vcmp.lt.s32.totalorder %v4194_v36, 112  ;;  %vm1264_vm7 = vcmp.lt.s32.totalorder %v4194_v36, 111 }
  0x10   :  { %3850 = vset.pattern.permute.xlu1 %v6840_v10 }
  0x11   :  { %152 = vperm.xlu1 %3850, %v77_v9  }
  0x12   :  { %195 = vrot.lane.b32.xlu0 %v4051_v6, %s3972_s13 }
  0x15   :  { %3851 = vset.pattern.permute.xlu1 %v6836_v8 }
  0x16   :  { %180 = vperm.xlu1 %3851, %v77_v9   ;;  %325 = vperm.xlu0 %3854, %v3808_v11  }
  0x1a   :  { %193 = vrot.lane.b32.xlu1 %v4042_v4, %s3972_s13  ;;  %340 = vrot.lane.b32.xlu0 %v4051_v6, %s3974_s16 }
  0x1b   :  { %3852 = vset.pattern.permute.xlu1 %v6834_v12 }
  0x1e   :  { %197 = vrot.lane.b32.xlu1 %v4057_v7, %s3972_s13  ;;  %470 = vperm.xlu0 %3854, %v3810_v13  }
  0x22   :  { %269 = vperm.xlu1 %3852, %v3808_v11   ;;  %485 = vrot.lane.b32.xlu0 %v4051_v6, %s3976_s19 }
  0x26   :  { %3853 = vset.pattern.permute.xlu1 %v6840_v10  ;;  %615 = vperm.xlu0 %3854, %v3812_v14  }
  0x27   :  { %297 = vperm.xlu1 %3853, %v3808_v11  }
  0x2a   :  { %3861 = vset.pattern.permute.xlu0 %v6840_v10 }
  0x2b   :  { %336 = vrot.lane.b32.xlu1 %v4044_v5, %s3974_s16  ;;  %762 = vperm.xlu0 %3861, %v3813_v15  }
  0x2c   :  { %3855 = vset.pattern.permute.xlu1 %v6834_v12 }
  0x2f   :  { %338 = vrot.lane.b32.xlu1 %v4042_v4, %s3974_s16  ;;  %3862 = vset.pattern.permute.xlu0 %v6834_v12 }
  0x30   :  { %124 = vperm.xlu0 %3862, %v77_v9  }
  0x33   :  { %342 = vrot.lane.b32.xlu1 %v4057_v7, %s3974_s16 }
  0x34   :  { %823 = vrot.lane.b32.xlu0 %v4042_v4, %s3977_s24 }
  0x37   :  { %414 = vperm.xlu1 %3855, %v3810_v13  }
  0x38   :  { %827 = vrot.lane.b32.xlu0 %v4057_v7, %s3977_s24 }
  0x3b   :  { %3856 = vset.pattern.permute.xlu1 %v6840_v10 }
  0x3c   :  { %442 = vperm.xlu1 %3856, %v3810_v13   ;;  %899 = vperm.xlu0 %3862, %v3815_v16  }
  0x40   :  { %481 = vrot.lane.b32.xlu1 %v4044_v5, %s3976_s19  ;;  %3865 = vset.pattern.permute.xlu0 %v6838_v3 }
  0x41   :  { %3857 = vset.pattern.permute.xlu1 %v6834_v12  ;;  %241 = vperm.xlu0 %3865, %v3808_v11  }
  0x44   :  { %483 = vrot.lane.b32.xlu1 %v4042_v4, %s3976_s19 }
  0x45   :  { %386 = vperm.xlu0 %3865, %v3810_v13   ;;  %v4288_v13 = vrot.slane %v3807_v62, %v4199_v38 }
  0x47   :  { %6927 = vst [vmem:[#allocation13_spill] sm:$0xff] %v4288_v13 }
  0x48   :  { %487 = vrot.lane.b32.xlu1 %v4057_v7, %s3976_s19 }
  0x49   :  { %531 = vperm.xlu0 %3865, %v3812_v14  }
  0x4c   :  { %559 = vperm.xlu1 %3857, %v3812_v14  }
  0x4d   :  { %966 = vrot.lane.b32.xlu0 %v4044_v5, %s3978_s27 }
  0x50   :  { %3858 = vset.pattern.permute.xlu1 %v6840_v10 }
  0x51   :  { %587 = vperm.xlu1 %3858, %v3812_v14   ;;  %970 = vrot.lane.b32.xlu0 %v4051_v6, %s3978_s27  ;;  %v4291_v14 = vrot.slane %v3807_v62, %v4208_v41 }
  0x53   :  { %6928 = vst [vmem:[#allocation14_spill] sm:$0xff] %v4291_v14 }
  0x55   :  { %3859 = vset.pattern.permute.xlu1 %v6838_v3  ;;  %1016 = vperm.xlu0 %3865, %v3817_v17  }
  0x56   :  { %666 = vperm.xlu1 %3859, %v3813_v15  }
  0x59   :  { %1115 = vrot.lane.b32.xlu0 %v4051_v6, %s3979_s30 }
  0x5a   :  { %3860 = vset.pattern.permute.xlu1 %v6834_v12 }
  0x5b   :  { %714 = vperm.xlu1 %3860, %v3813_v15  }
  0x5d   :  { %1161 = vperm.xlu0 %3865, %v3819_v18  }
  0x5f   :  { %3863 = vset.pattern.permute.xlu1 %v6836_v8 }
  0x60   :  { %810 = vperm.xlu1 %3863, %v3813_v15   ;;  %v4294_v15 = vrot.slane %v3809_v63, %v4199_v38 }
  0x61   :  { %1260 = vrot.lane.b32.xlu0 %v4051_v6, %s3980_s5 }
  0x64   :  { %821 = vrot.lane.b32.xlu1 %v4044_v5, %s3977_s24 }
  0x65   :  { %3864 = vset.pattern.permute.xlu1 %v6838_v3  ;;  %1306 = vperm.xlu0 %3865, %v4141_v19  }
  0x68   :  { %825 = vrot.lane.b32.xlu1 %v4051_v6, %s3977_s24  ;;  %v4279_v6 = vsub.s32 5, %v4189_v34 }
  0x69   :  { %3872 = vset.pattern.permute.xlu0 %v6836_v8 }
  0x6a   :  { %1100 = vperm.xlu0 %3872, %v3817_v17   ;;  %6926 = vst [vmem:[#allocation12_spill] sm:$0xff] %v4279_v6 }
  0x6c   :  { %871 = vperm.xlu1 %3864, %v3815_v16  }
  0x6e   :  { %1245 = vperm.xlu0 %3872, %v3819_v18  }
  0x70   :  { %3866 = vset.pattern.permute.xlu1 %v6840_v10 }
  0x71   :  { %927 = vperm.xlu1 %3866, %v3815_v16  }
  0x72   :  { %1390 = vperm.xlu0 %3872, %v4141_v19  }
  0x75   :  { %3867 = vset.pattern.permute.xlu1 %v6836_v8 }
  0x76   :  { %955 = vperm.xlu1 %3867, %v3815_v16   ;;  %3876 = vset.pattern.permute.xlu0 %v6834_v12  ;;  %v49_v20 = vpop.permute.xlu1 %48 }
  0x77   :  { %1474 = vperm.xlu0 %3876, %v4184_v32  }
  0x7a   :  { %968 = vrot.lane.b32.xlu1 %v4042_v4, %s3978_s27  ;;  %v51_v23 = vpop.permute.xlu1 %50 }
  0x7b   :  { %3868 = vset.pattern.permute.xlu1 %v6834_v12 }
  0x7e   :  { %972 = vrot.lane.b32.xlu1 %v4057_v7, %s3978_s27 }
  0x81   :  { %v4159_v21 = vpop.permute.xlu0 %37 }
  0x82   :  { %1044 = vperm.xlu1 %3868, %v3817_v17  }
  0x85   :  { %v47_v22 = vpop.permute.xlu0 %46 }
  0x86   :  { %3869 = vset.pattern.permute.xlu1 %v6840_v10  ;;  %v59_v45 = vsel %vm56_vm0, %v51_v23, %v47_v22  ;;  %v57_v47 = vsel %vm56_vm0, %v47_v22, %v51_v23  ;;  %v4304_v22 = vrot.slane %v3809_v63, %v4208_v41 }
  0x87   :  { %1072 = vperm.xlu1 %3869, %v3817_v17   ;;  %v4230_v48 = vmul.f32 %v4216_v43, %v59_v45  ;;  %v4237_v51 = vmul.f32 %v4223_v46, %v57_v47 }
  0x89   :  { %v53_v24 = vpop.permute.xlu0 %52  ;;  %v81_v54 = vrot.slane %v4230_v48, %v4199_v38  ;;  %v85_v61 = vrot.slane %v4237_v51, %v4199_v38  ;;  %v138_v17 = vrot.slane %v4230_v48, %v4258_v59  ;;  %v110_v30 = vrot.slane %v4230_v48, %v4208_v41 }
  0x8a   :  { %v58_v52 = vsel %vm56_vm0, %v49_v20, %v53_v24  ;;  %v60_v53 = vsel %vm56_vm0, %v53_v24, %v49_v20  ;;  %v166_v20 = vrot.slane %v4230_v48, %v4261_v60  ;;  %v170_v24 = vrot.slane %v4237_v51, %v4261_v60 }
  0x8b   :  { %1111 = vrot.lane.b32.xlu1 %v4044_v5, %s3979_s30  ;;  %v4164_v25 = vpop.permute.xlu1 %96  ;;  %v4250_v56 = vmul.f32 %v4216_v43, %v60_v53  ;;  %v4253_v57 = vmul.f32 %v4223_v46, %v58_v52  ;;  %v114_v40 = vrot.slane %v4237_v51, %v4208_v41 }
  0x8c   :  { %3870 = vset.pattern.permute.xlu1 %v6834_v12  ;;  %v99_v1 = vmul.f32 %v4164_v25, %v81_v54  ;;  %v100_v11 = vmul.f32 %v4164_v25, %v85_v61  ;;  %v1405_v54 = vld [vmem:[%s6832_s7] sm:$0xff] }
  0x8d   :  { %v4167_v26 = vpop.permute.xlu0 %191  ;;  %v93_v9 = vrot.slane %v4253_v57, %v4199_v38  ;;  %v122_v53 = vrot.slane %v4253_v57, %v4208_v41 }
  0x8e   :  { %v103_v23 = vadd.f32 %v99_v1, %v4159_v21  ;;  %v104_v48 = vadd.f32 %v100_v11, %v4159_v21  ;;  %v146_v11 = vrot.slane %v4250_v56, %v4258_v59 }
  0x8f   :  { %1113 = vrot.lane.b32.xlu1 %v4042_v4, %s3979_s30  ;;  %v102_v52 = vmul.f32 %v4164_v25, %v93_v9 }
  0x90   :  { %v4171_v27 = vpop.permute.xlu1 %152 }
  0x91   :  { %v4173_v28 = vpop.permute.xlu0 %195 }
  0x93   :  { %1117 = vrot.lane.b32.xlu1 %v4057_v7, %s3979_s30 }
  0x95   :  { %v4177_v29 = vpop.permute.xlu1 %180  ;;  %v4179_v31 = vpop.permute.xlu0 %325 }
  0x97   :  { %1189 = vperm.xlu1 %3870, %v3819_v18  }
  0x99   :  { %v4187_v33 = vpop.permute.xlu1 %193  ;;  %v4191_v35 = vpop.permute.xlu0 %340 }
  0x9b   :  { %3871 = vset.pattern.permute.xlu1 %v6840_v10 }
  0x9c   :  { %1217 = vperm.xlu1 %3871, %v3819_v18   ;;  %v142_v18 = vrot.slane %v4237_v51, %v4258_v59  ;;  %v200_v51 = vsel %vm199_vm1, %v4167_v26, %v4173_v28 }
  0x9d   :  { %v4196_v37 = vpop.permute.xlu1 %197  ;;  %v4201_v39 = vpop.permute.xlu0 %470 }
  0x9e   :  { %v203_v61 = vsel %vm199_vm1, %v4196_v37, %v4187_v33 }
  0xa0   :  { %1256 = vrot.lane.b32.xlu1 %v4044_v5, %s3980_s5 }
  0xa1   :  { %v4212_v42 = vpop.permute.xlu1 %269  ;;  %3873 = vset.pattern.permute.xlu1 %v6834_v12  ;;  %v4218_v44 = vpop.permute.xlu0 %485  ;;  %v150_v12 = vrot.slane %v4253_v57, %v4258_v59 }
  0xa4   :  { %1258 = vrot.lane.b32.xlu1 %v4042_v4, %s3980_s5 }
  0xa5   :  { %v4234_v50 = vpop.permute.xlu0 %615 }
  0xa6   :  { %v4232_v49 = vpop.permute.xlu1 %297  ;;  %6923 = vst [vmem:[#allocation9_spill] sm:$0xff] %v4234_v50 }
  0xa8   :  { %1262 = vrot.lane.b32.xlu1 %v4057_v7, %s3980_s5  ;;  %v89_v7 = vrot.slane %v4250_v56, %v4199_v38 }
  0xaa   :  { %v4247_v55 = vpop.permute.xlu1 %336  ;;  %v4255_v58 = vpop.permute.xlu0 %762  ;;  %v101_v47 = vmul.f32 %v4164_v25, %v89_v7  ;;  %v202_v25 = vsel %vm199_vm1, %v4173_v28, %v4167_v26  ;;  %v174_v26 = vrot.slane %v4250_v56, %v4261_v60  ;;  %v178_v28 = vrot.slane %v4253_v57, %v4261_v60 }
  0xab   :  { %6924 = vst [vmem:[#allocation10_spill] sm:$0xff] %v4255_v58  ;;  %v201_v57 = vsel %vm199_vm1, %v4187_v33, %v4196_v37 }
  0xac   :  { %1334 = vperm.xlu1 %3873, %v4141_v19   ;;  %v185_v33 = vmul.f32 %v4177_v29, %v174_v26  ;;  %v4378_v37 = vmul.f32 %v4291_v14, %v201_v57 }
  0xae   :  { %v4276_v2 = vpop.permute.xlu1 %338 }
  0xaf   :  { %v125_v16 = vpop.permute.xlu0 %124 }
  0xb0   :  { %3874 = vset.pattern.permute.xlu1 %v6840_v10  ;;  %v127_v63 = vmul.f32 %v125_v16, %v110_v30  ;;  %v128_v1 = vmul.f32 %v125_v16, %v114_v40  ;;  %v130_v9 = vmul.f32 %v125_v16, %v122_v53  ;;  %v105_v30 = vadd.f32 %v101_v47, %v4159_v21 }
  0xb1   :  { %1362 = vperm.xlu1 %3874, %v4141_v19   ;;  %v118_v19 = vrot.slane %v4250_v56, %v4208_v41  ;;  %v4354_v40 = vmul.f32 %v4288_v13, %v202_v25  ;;  %v155_v53 = vmul.f32 %v4171_v27, %v138_v17  ;;  %v156_v56 = vmul.f32 %v4171_v27, %v142_v18 }
  0xb2   :  { %v4314_v45 = vpop.permute.xlu1 %342  ;;  %v158_v17 = vmul.f32 %v4171_v27, %v150_v12  ;;  %v183_v18 = vmul.f32 %v4177_v29, %v166_v20  ;;  %v184_v10 = vmul.f32 %v4177_v29, %v170_v24 }
  0xb3   :  { %v4338_v62 = vpop.permute.xlu0 %823  ;;  %v129_v7 = vmul.f32 %v125_v16, %v118_v19  ;;  %v106_v16 = vadd.f32 %v102_v52, %v4159_v21  ;;  %v4357_v19 = vmul.f32 %v4291_v14, %v200_v51  ;;  %v131_v21 = vadd.f32 %v127_v63, %v103_v23 }
  0xb4   :  { %6929 = vst [vmem:[#allocation15_spill] sm:$0xff] %v4338_v62  ;;  %v132_v52 = vadd.f32 %v128_v1, %v104_v48  ;;  %v157_v51 = vmul.f32 %v4171_v27, %v146_v11  ;;  %v255_v23 = vrot.slane %v4354_v40, %v4208_v41  ;;  %v186_v27 = vmul.f32 %v4177_v29, %v178_v28 }
  0xb5   :  { %3875 = vset.pattern.permute.xlu1 %v6838_v3  ;;  %v133_v25 = vadd.f32 %v129_v7, %v105_v30  ;;  %v134_v3 = vadd.f32 %v130_v9, %v106_v16  ;;  %v259_v48 = vrot.slane %v4357_v19, %v4208_v41  ;;  %v159_v1 = vadd.f32 %v155_v53, %v131_v21 }
  0xb6   :  { %v4349_v8 = vpop.permute.xlu1 %414  ;;  %1408 = vperm.xlu1 %3875, %v1405_v54   ;;  %v4366_v54 = vmul.f32 %v4288_v13, %v203_v61  ;;  %v160_v7 = vadd.f32 %v156_v56, %v132_v52  ;;  %v283_v26 = vrot.slane %v4354_v40, %v4258_v59  ;;  %v287_v29 = vrot.slane %v4357_v19, %v4258_v59 }
  0xb7   :  { %v4368_v47 = vpop.permute.xlu0 %827  ;;  %v161_v9 = vadd.f32 %v157_v51, %v133_v25  ;;  %v162_v11 = vadd.f32 %v158_v17, %v134_v3  ;;  %v226_v28 = vrot.slane %v4354_v40, %v4199_v38  ;;  %v230_v30 = vrot.slane %v4357_v19, %v4199_v38 }
  0xb8   :  { %6930 = vst [vmem:[#allocation16_spill] sm:$0xff] %v4368_v47  ;;  %v263_v61 = vrot.slane %v4366_v54, %v4208_v41  ;;  %v6932_v16 = vmov 2   ;;  %v267_v53 = vrot.slane %v4378_v37, %v4208_v41  ;;  %v272_v56 = vmul.f32 %v4212_v42, %v255_v23 }
  0xb9   :  { %v273_v3 = vmul.f32 %v4212_v42, %v259_v48  ;;  %v291_v57 = vrot.slane %v4366_v54, %v4258_v59  ;;  %v295_v25 = vrot.slane %v4378_v37, %v4258_v59  ;;  %v234_v51 = vrot.slane %v4366_v54, %v4199_v38 }
  0xba   :  { %1446 = vperm.xlu1 %3875, %v4184_v32   ;;  %v274_v52 = vmul.f32 %v4212_v42, %v263_v61  ;;  %v238_v17 = vrot.slane %v4378_v37, %v4199_v38  ;;  %v187_v48 = vadd.f32 %v183_v18, %v159_v1  ;;  %v188_v24 = vadd.f32 %v184_v10, %v160_v7 }
  0xbb   :  { %v4384_v12 = vpop.permute.xlu1 %442  ;;  %v4393_v63 = vpop.permute.xlu0 %899  ;;  %v189_v20 = vadd.f32 %v185_v33, %v161_v9  ;;  %v190_v14 = vadd.f32 %v186_v27, %v162_v11  ;;  %v275_v61 = vmul.f32 %v4212_v42, %v267_v53  ;;  %v301_v58 = vmul.f32 %v4232_v49, %v287_v29 }
  0xbc   :  { %6931 = vst [vmem:[#allocation17_spill] sm:$0xff] %v4393_v63  ;;  %v300_v63 = vmul.f32 %v4232_v49, %v283_v26  ;;  %v6933_v47 = vmov 3   ;;  %v345_v33 = vsel %vm344_vm2, %v4247_v55, %v4191_v35  ;;  %v347_v42 = vsel %vm344_vm2, %v4191_v35, %v4247_v55 }
  0xbd   :  { %v323_v35 = vrot.slane %v4378_v37, %v4261_v60  ;;  %v302_v55 = vmul.f32 %v4232_v49, %v291_v57  ;;  %v303_v1 = vmul.f32 %v4232_v49, %v295_v25  ;;  %v4452_v9 = vmul.f32 %v4294_v15, %v347_v42 }
  0xbe   :  { %3877 = vset.pattern.permute.xlu1 %v6932_v16  ;;  %v4466_v26 = vsub.s32 6, %v4189_v34  ;;  %v6935_v29 = vrot.slane %v4357_v19, %v4261_v60 }
  0xbf   :  { %v4410_v21 = vpop.permute.xlu1 %481  ;;  %1502 = vperm.xlu1 %3877, %v4184_v32  }
  0xc0   :  { %v242_v23 = vpop.permute.xlu0 %241 }
  0xc1   :  { %v244_v13 = vmul.f32 %v242_v23, %v226_v28  ;;  %v245_v46 = vmul.f32 %v242_v23, %v230_v30  ;;  %v246_v43 = vmul.f32 %v242_v23, %v234_v51  ;;  %v247_v16 = vmul.f32 %v242_v23, %v238_v17 }
  0xc2   :  { %v329_v28 = vmul.f32 %v4179_v31, %v6935_v29  ;;  %v4477_v30 = vsub.s32 7, %v4189_v34 }
  0xc3   :  { %v4423_v62 = vpop.permute.xlu1 %483  ;;  %3878 = vset.pattern.permute.xlu1 %v6933_v47  ;;  %v248_v50 = vadd.f32 %v244_v13, %v187_v48  ;;  %v249_v6 = vadd.f32 %v245_v46, %v188_v24  ;;  %v250_v18 = vadd.f32 %v246_v43, %v189_v20  ;;  %v251_v10 = vadd.f32 %v247_v16, %v190_v14  ;;  %v3811_v16 = vld [vmem:[%s6826_s1 + $0x3] ss:$8 sm:$0x3] }
  0xc4   :  { %1530 = vperm.xlu1 %3878, %v4184_v32   ;;  %v346_v13 = vsel %vm344_vm2, %v4276_v2, %v4314_v45  ;;  %v348_v43 = vsel %vm344_vm2, %v4314_v45, %v4276_v2  ;;  %v319_v24 = vrot.slane %v4366_v54, %v4261_v60  ;;  %v6860_v45 = vmov 5   ;;  %6936 = vst [vmem:[#allocation18_spill] sm:$0xff] %v4477_v30  ;;  %v387_v53 = vpop.permute.xlu0 %386 }
  0xc5   :  { %v276_v46 = vadd.f32 %v272_v56, %v248_v50  ;;  %v277_v14 = vadd.f32 %v273_v3, %v249_v6  ;;  %v278_v27 = vadd.f32 %v274_v52, %v250_v18  ;;  %v279_v20 = vadd.f32 %v275_v61, %v251_v10 }
  0xc6   :  { %v4455_v50 = vmul.f32 %v4304_v22, %v345_v33  ;;  %v4459_v54 = vmul.f32 %v4294_v15, %v348_v43  ;;  %v4462_v37 = vmul.f32 %v4304_v22, %v346_v13  ;;  %v330_v56 = vmul.f32 %v4179_v31, %v319_v24 }
  0xc7   :  { %v4449_v7 = vpop.permute.xlu1 %487  ;;  %v304_v2 = vadd.f32 %v300_v63, %v276_v46  ;;  %v305_v6 = vadd.f32 %v301_v58, %v277_v14  ;;  %v306_v49 = vadd.f32 %v302_v55, %v278_v27  ;;  %v307_v11 = vadd.f32 %v303_v1, %v279_v20 }
  0xc8   :  { %3879 = vset.pattern.permute.xlu1 %v6860_v45  ;;  %v6934_v63 = vrot.slane %v4354_v40, %v4261_v60  ;;  %v331_v40 = vmul.f32 %v4179_v31, %v323_v35  ;;  %v371_v52 = vrot.slane %v4452_v9, %v4199_v38  ;;  %v375_v34 = vrot.slane %v4455_v50, %v4199_v38 }
  0xc9   :  { %1586 = vperm.xlu1 %3879, %v4184_v32   ;;  %v333_v19 = vadd.f32 %v329_v28, %v305_v6  ;;  %v334_v25 = vadd.f32 %v330_v56, %v306_v49  ;;  %v379_v17 = vrot.slane %v4459_v54, %v4199_v38  ;;  %v383_v23 = vrot.slane %v4462_v37, %v4199_v38 }
  0xca   :  { %v328_v58 = vmul.f32 %v4179_v31, %v6934_v63  ;;  %v335_v51 = vadd.f32 %v331_v40, %v307_v11  ;;  %v6856_v48 = vmov 6   ;;  %v4497_v31 = vrot.slane %v3811_v16, %v4199_v38 }
  0xcb   :  { %v4485_v3 = vpop.permute.xlu1 %559  ;;  %v4500_v61 = vrot.slane %v3811_v16, %v4208_v41  ;;  %v389_v18 = vmul.f32 %v387_v53, %v371_v52  ;;  %v390_v10 = vmul.f32 %v387_v53, %v375_v34  ;;  %v408_v33 = vrot.slane %v4459_v54, %v4208_v41 }
  0xcc   :  { %v332_v57 = vadd.f32 %v328_v58, %v304_v2  ;;  %6937 = vst [vmem:[#allocation19_spill] sm:$0xff] %v4497_v31  ;;  %v412_v42 = vrot.slane %v4462_v37, %v4208_v41  ;;  %v391_v13 = vmul.f32 %v387_v53, %v379_v17  ;;  %v392_v43 = vmul.f32 %v387_v53, %v383_v23 }
  0xcd   :  { %3880 = vset.pattern.permute.xlu1 %v6856_v48  ;;  %6938 = vst [vmem:[#allocation20_spill] sm:$0xff] %v4500_v61  ;;  %v400_v46 = vrot.slane %v4452_v9, %v4208_v41  ;;  %v404_v14 = vrot.slane %v4455_v50, %v4208_v41  ;;  %v394_v20 = vadd.f32 %v390_v10, %v333_v19  ;;  %v6939_v63 = vmov 1  }
  0xce   :  { %1614 = vperm.xlu1 %3880, %v4184_v32   ;;  %v393_v27 = vadd.f32 %v389_v18, %v332_v57  ;;  %v456_v32 = vrot.slane %v4452_v9, %v4261_v60  ;;  %v460_v35 = vrot.slane %v4455_v50, %v4261_v60  ;;  %v395_v55 = vadd.f32 %v391_v13, %v334_v25 }
  0xcf   :  { %v396_v1 = vadd.f32 %v392_v43, %v335_v51  ;;  %v417_v2 = vmul.f32 %v4349_v8, %v400_v46  ;;  %v418_v6 = vmul.f32 %v4349_v8, %v404_v14  ;;  %v428_v49 = vrot.slane %v4452_v9, %v4258_v59 }
  0xd0   :  { %v4511_v24 = vpop.permute.xlu1 %587  ;;  %v432_v11 = vrot.slane %v4455_v50, %v4258_v59  ;;  %v419_v58 = vmul.f32 %v4349_v8, %v408_v33  ;;  %v420_v29 = vmul.f32 %v4349_v8, %v412_v42  ;;  %v436_v28 = vrot.slane %v4459_v54, %v4258_v59 }
  0xd1   :  { %v440_v16 = vrot.slane %v4462_v37, %v4258_v59  ;;  %v421_v53 = vadd.f32 %v417_v2, %v393_v27  ;;  %v422_v56 = vadd.f32 %v418_v6, %v394_v20  ;;  %v491_v9 = vsel %vm489_vm3, %v4423_v62, %v4449_v7  ;;  %v532_v20 = vpop.permute.xlu0 %531 }
  0xd2   :  { %3881 = vset.pattern.permute.xlu1 %v6939_v63  ;;  %v493_v50 = vsel %vm489_vm3, %v4449_v7, %v4423_v62  ;;  %v490_v8 = vsel %vm489_vm3, %v4410_v21, %v4218_v44  ;;  %v492_v40 = vsel %vm489_vm3, %v4218_v44, %v4410_v21  ;;  %v423_v57 = vadd.f32 %v419_v58, %v395_v55 }
  0xd3   :  { %v424_v19 = vadd.f32 %v420_v29, %v396_v1  ;;  %v464_v34 = vrot.slane %v4459_v54, %v4261_v60  ;;  %v468_v62 = vrot.slane %v4462_v37, %v4261_v60  ;;  %v445_v7 = vmul.f32 %v4384_v12, %v428_v49 }
  0xd4   :  { %v446_v25 = vmul.f32 %v4384_v12, %v432_v11  ;;  %v447_v51 = vmul.f32 %v4384_v12, %v436_v28  ;;  %v448_v17 = vmul.f32 %v4384_v12, %v440_v16  ;;  %v4557_v44 = vmul.f32 %v4497_v31, %v493_v50 }
  0xd5   :  { %v4546_v52 = vpop.permute.xlu1 %666  ;;  %v4560_v21 = vmul.f32 %v4500_v61, %v491_v9  ;;  %v4563_v23 = vmul.f32 %v4497_v31, %v492_v40  ;;  %v4566_v54 = vmul.f32 %v4500_v61, %v490_v8  ;;  %v449_v37 = vadd.f32 %v445_v7, %v421_v53 }
  0xd6   :  { %v450_v18 = vadd.f32 %v446_v25, %v422_v56  ;;  %v728_v10 = vrot.slane %v4044_v5, %v4258_v59  ;;  %v732_v12 = vrot.slane %v4044_v5, %v4466_v26  ;;  %v451_v33 = vadd.f32 %v447_v51, %v423_v57  ;;  %v3814_v56 = vld [vmem:[%s6826_s1 + $0x5] ss:$8 sm:$0x3] }
  0xd7   :  { %v452_v42 = vadd.f32 %v448_v17, %v424_v19  ;;  %v736_v13 = vrot.slane %v4042_v4, %v4258_v59  ;;  %v740_v43 = vrot.slane %v4042_v4, %v4466_v26  ;;  %v473_v46 = vmul.f32 %v4201_v39, %v456_v32 }
  0xd8   :  { %v474_v14 = vmul.f32 %v4201_v39, %v460_v35  ;;  %v475_v55 = vmul.f32 %v4201_v39, %v464_v34  ;;  %v476_v1 = vmul.f32 %v4201_v39, %v468_v62  ;;  %v524_v2 = vrot.slane %v4557_v44, %v4199_v38 }
  0xd9   :  { %v528_v6 = vrot.slane %v4560_v21, %v4199_v38  ;;  %v477_v49 = vadd.f32 %v473_v46, %v449_v37  ;;  %v516_v32 = vrot.slane %v4563_v23, %v4199_v38  ;;  %v520_v35 = vrot.slane %v4566_v54, %v4199_v38 }
  0xda   :  { %v4578_v27 = vpop.permute.xlu1 %714  ;;  %v478_v11 = vadd.f32 %v474_v14, %v450_v18  ;;  %v4591_v58 = vrot.slane %v728_v10, %v4258_v59  ;;  %v4594_v29 = vrot.slane %v732_v12, %v4258_v59  ;;  %v479_v39 = vadd.f32 %v475_v55, %v451_v33 }
  0xdb   :  { %v480_v28 = vadd.f32 %v476_v1, %v452_v42  ;;  %v4597_v16 = vrot.slane %v736_v13, %v4258_v59  ;;  %v4600_v53 = vrot.slane %v740_v43, %v4258_v59  ;;  %v534_v9 = vmul.f32 %v532_v20, %v516_v32 }
  0xdc   :  { %v535_v50 = vmul.f32 %v532_v20, %v520_v35  ;;  %v536_v8 = vmul.f32 %v532_v20, %v524_v2  ;;  %v537_v40 = vmul.f32 %v532_v20, %v528_v6  ;;  %v553_v57 = vrot.slane %v4557_v44, %v4208_v41 }
  0xdd   :  { %v557_v19 = vrot.slane %v4560_v21, %v4208_v41  ;;  %v538_v62 = vadd.f32 %v534_v9, %v477_v49  ;;  %v545_v25 = vrot.slane %v4563_v23, %v4208_v41  ;;  %v549_v51 = vrot.slane %v4566_v54, %v4208_v41 }
  0xde   :  { %v539_v7 = vadd.f32 %v535_v50, %v478_v11  ;;  %v4616_v17 = vrot.slane %v3814_v56, %v4199_v38  ;;  %v4619_v37 = vrot.slane %v3814_v56, %v4208_v41  ;;  %v540_v18 = vadd.f32 %v536_v8, %v479_v39 }
  0xdf   :  { %v4609_v34 = vpop.permute.xlu1 %810  ;;  %v541_v10 = vadd.f32 %v537_v40, %v480_v28  ;;  %v562_v12 = vmul.f32 %v4485_v3, %v545_v25  ;;  %v563_v33 = vmul.f32 %v4485_v3, %v549_v51  ;;  %v631_v42 = vrot.slane %v4044_v5, %v4199_v38 }
  0xe0   :  { %6940 = vst [vmem:[#allocation21_spill] sm:$0xff] %v4616_v17  ;;  %6941 = vst [vmem:[#allocation22_spill] sm:$0xff] %v4619_v37  ;;  %v635_v13 = vrot.slane %v4044_v5, %v4273_v0  ;;  %v564_v43 = vmul.f32 %v4485_v3, %v553_v57  ;;  %v565_v46 = vmul.f32 %v4485_v3, %v557_v19 }
  0xe1   :  { %v639_v14 = vrot.slane %v4042_v4, %v4199_v38  ;;  %v643_v20 = vrot.slane %v4042_v4, %v4273_v0  ;;  %v566_v1 = vadd.f32 %v562_v12, %v538_v62  ;;  %v567_v2 = vadd.f32 %v563_v33, %v539_v7  ;;  %v6942_v7 = vld [vmem:[#allocation12_spill] sm:$0xff] }
  0xe2   :  { %v573_v6 = vrot.slane %v4563_v23, %v4258_v59  ;;  %v577_v49 = vrot.slane %v4566_v54, %v4258_v59  ;;  %v568_v11 = vadd.f32 %v564_v43, %v540_v18  ;;  %v569_v3 = vadd.f32 %v565_v46, %v541_v10  ;;  %v6943_v10 = vld [vmem:[#allocation9_spill] sm:$0xff] }
  0xe3   :  { %v4633_v55 = vpop.permute.xlu1 %821  ;;  %v581_v32 = vrot.slane %v4557_v44, %v4258_v59  ;;  %v585_v35 = vrot.slane %v4560_v21, %v4258_v59  ;;  %v601_v39 = vrot.slane %v4563_v23, %v4261_v60  ;;  %v605_v28 = vrot.slane %v4566_v54, %v4261_v60 }
  0xe4   :  { %v590_v56 = vmul.f32 %v4511_v24, %v573_v6  ;;  %v591_v9 = vmul.f32 %v4511_v24, %v577_v49  ;;  %v609_v50 = vrot.slane %v4557_v44, %v4261_v60  ;;  %v613_v8 = vrot.slane %v4560_v21, %v4261_v60 }
  0xe5   :  { %v592_v40 = vmul.f32 %v4511_v24, %v581_v32  ;;  %v593_v57 = vmul.f32 %v4511_v24, %v585_v35  ;;  %v680_v54 = vrot.slane %v4044_v5, %v4208_v41  ;;  %v684_v25 = vrot.slane %v4044_v5, %v6942_v7 }
  0xe6   :  { %v594_v62 = vadd.f32 %v590_v56, %v566_v1  ;;  %v595_v23 = vadd.f32 %v591_v9, %v567_v2  ;;  %v688_v44 = vrot.slane %v4042_v4, %v4208_v41  ;;  %v692_v21 = vrot.slane %v4042_v4, %v6942_v7  ;;  %v4680_v9 = vpop.permute.xlu0 %966 }
  0xe7   :  { %v826_v19 = vpop.permute.xlu1 %825  ;;  %v596_v51 = vadd.f32 %v592_v40, %v568_v11  ;;  %v597_v18 = vadd.f32 %v593_v57, %v569_v3  ;;  %v618_v12 = vmul.f32 %v6943_v10, %v601_v39  ;;  %v619_v24 = vmul.f32 %v6943_v10, %v605_v28  ;;  %v6945_v40 = vld [vmem:[#allocation15_spill] sm:$0xff] }
  0xe8   :  { %v651_v33 = vrot.slane %v631_v42, %v4199_v38  ;;  %v655_v43 = vrot.slane %v635_v13, %v4199_v38  ;;  %v620_v46 = vmul.f32 %v6943_v10, %v609_v50  ;;  %v621_v1 = vmul.f32 %v6943_v10, %v613_v8  ;;  %v6944_v8 = vld [vmem:[#allocation16_spill] sm:$0xff] }
  0xe9   :  { %v659_v2 = vrot.slane %v639_v14, %v4199_v38  ;;  %v663_v6 = vrot.slane %v643_v20, %v4199_v38  ;;  %v622_v11 = vadd.f32 %v618_v12, %v594_v62  ;;  %v623_v3 = vadd.f32 %v619_v24, %v595_v23 }
  0xea   :  { %v700_v32 = vrot.slane %v680_v54, %v4208_v41  ;;  %v704_v35 = vrot.slane %v684_v25, %v4208_v41  ;;  %v624_v39 = vadd.f32 %v620_v46, %v596_v51  ;;  %v625_v42 = vadd.f32 %v621_v1, %v597_v18  ;;  %v6946_v1 = vld [vmem:[#allocation10_spill] sm:$0xff] }
  0xeb   :  { %v4672_v49 = vpop.permute.xlu1 %871  ;;  %v708_v13 = vrot.slane %v688_v44, %v4208_v41  ;;  %v712_v28 = vrot.slane %v692_v21, %v4208_v41  ;;  %v669_v56 = vmul.f32 %v4546_v52, %v651_v33  ;;  %v670_v14 = vmul.f32 %v4546_v52, %v655_v43 }
  0xec   :  { %v776_v20 = vrot.slane %v4044_v5, %v4261_v60  ;;  %v780_v50 = vrot.slane %v4044_v5, %v4477_v30  ;;  %v831_v57 = vsel %vm829_vm4, %v6945_v40, %v6944_v8  ;;  %v833_v62 = vsel %vm829_vm4, %v6944_v8, %v6945_v40  ;;  %v3816_v8 = vld [vmem:[%s6826_s1 + $0x6] ss:$8 sm:$0x3] }
  0xed   :  { %v671_v23 = vmul.f32 %v4546_v52, %v659_v2  ;;  %v672_v54 = vmul.f32 %v4546_v52, %v663_v6  ;;  %v673_v25 = vadd.f32 %v669_v56, %v622_v11  ;;  %v674_v51 = vadd.f32 %v670_v14, %v623_v3 }
  0xee   :  { %v717_v18 = vmul.f32 %v4578_v27, %v700_v32  ;;  %v718_v5 = vmul.f32 %v4578_v27, %v704_v35  ;;  %v719_v12 = vmul.f32 %v4578_v27, %v708_v13  ;;  %v720_v24 = vmul.f32 %v4578_v27, %v712_v28 }
  0xef   :  { %v675_v21 = vadd.f32 %v671_v23, %v624_v39  ;;  %v676_v10 = vadd.f32 %v672_v54, %v625_v42  ;;  %v784_v33 = vrot.slane %v4042_v4, %v4261_v60  ;;  %v788_v52 = vrot.slane %v4042_v4, %v4477_v30 }
  0xf0   :  { %v4698_v44 = vpop.permute.xlu1 %927  ;;  %v830_v43 = vsel %vm829_vm4, %v4633_v55, %v826_v19  ;;  %v832_v46 = vsel %vm829_vm4, %v826_v19, %v4633_v55  ;;  %v765_v2 = vmul.f32 %v6946_v1, %v4591_v58  ;;  %v766_v27 = vmul.f32 %v6946_v1, %v4594_v29  ;;  %v971_v19 = vpop.permute.xlu0 %970 }
  0xf1   :  { %v767_v6 = vmul.f32 %v6946_v1, %v4597_v16  ;;  %v768_v4 = vmul.f32 %v6946_v1, %v4600_v53  ;;  %v4721_v11 = vmul.f32 %v4616_v17, %v831_v57  ;;  %v4724_v3 = vmul.f32 %v4619_v37, %v833_v62 }
  0xf2   :  { %v721_v32 = vadd.f32 %v717_v18, %v673_v25  ;;  %v722_v55 = vadd.f32 %v718_v5, %v674_v51  ;;  %v723_v35 = vadd.f32 %v719_v12, %v675_v21  ;;  %v724_v58 = vadd.f32 %v720_v24, %v676_v10 }
  0xf3   :  { %v4727_v39 = vmul.f32 %v4616_v17, %v830_v43  ;;  %v4730_v29 = vmul.f32 %v4619_v37, %v832_v46  ;;  %v796_v53 = vrot.slane %v776_v20, %v4261_v60  ;;  %v800_v42 = vrot.slane %v780_v50, %v4261_v60 }
  0xf4   :  { %v804_v13 = vrot.slane %v784_v33, %v4261_v60  ;;  %v808_v28 = vrot.slane %v788_v52, %v4261_v60  ;;  %v769_v56 = vadd.f32 %v765_v2, %v721_v32  ;;  %v770_v14 = vadd.f32 %v766_v27, %v722_v55  ;;  %v4754_v21 = vpop.permute.xlu0 %1016 }
  0xf5   :  { %v4732_v16 = vpop.permute.xlu1 %955  ;;  %v864_v40 = vrot.slane %v4721_v11, %v4199_v38  ;;  %v868_v20 = vrot.slane %v4724_v3, %v4199_v38  ;;  %v771_v57 = vadd.f32 %v767_v6, %v723_v35  ;;  %v772_v50 = vadd.f32 %v768_v4, %v724_v58 }
  0xf6   :  { %v856_v62 = vrot.slane %v4727_v39, %v4199_v38  ;;  %v860_v23 = vrot.slane %v4730_v29, %v4199_v38  ;;  %v813_v25 = vmul.f32 %v4609_v34, %v796_v53  ;;  %v814_v51 = vmul.f32 %v4609_v34, %v800_v42 }
  0xf7   :  { %v815_v18 = vmul.f32 %v4609_v34, %v804_v13  ;;  %v816_v5 = vmul.f32 %v4609_v34, %v808_v28  ;;  %v893_v10 = vrot.slane %v4721_v11, %v4208_v41  ;;  %v897_v12 = vrot.slane %v4724_v3, %v4208_v41 }
  0xf8   :  { %v4761_v24 = vrot.slane %v3816_v8, %v4199_v38  ;;  %v4764_v33 = vrot.slane %v3816_v8, %v4208_v41  ;;  %v876_v52 = vmul.f32 %v4672_v49, %v864_v40  ;;  %v877_v43 = vmul.f32 %v4672_v49, %v868_v20 }
  0xf9   :  { %v969_v54 = vpop.permute.xlu1 %968  ;;  %v921_v34 = vrot.slane %v4721_v11, %v4258_v59  ;;  %v925_v46 = vrot.slane %v4724_v3, %v4258_v59  ;;  %v975_v1 = vsel %vm974_vm5, %v4680_v9, %v971_v19  ;;  %v977_v2 = vsel %vm974_vm5, %v971_v19, %v4680_v9  ;;  %v6949_v19 = vld [vmem:[#allocation17_spill] sm:$0xff] }
  0xfa   :  { %6947 = vst [vmem:[#allocation12_spill] sm:$0xff] %v4761_v24  ;;  %6948 = vst [vmem:[#allocation9_spill] sm:$0xff] %v4764_v33  ;;  %v874_v27 = vmul.f32 %v4672_v49, %v856_v62  ;;  %v875_v6 = vmul.f32 %v4672_v49, %v860_v23  ;;  %v817_v32 = vadd.f32 %v813_v25, %v769_v56  ;;  %v4790_v56 = vpop.permute.xlu0 %1115  ;;  %v6965_v17 = vmov 4  }
  0xfb   :  { %v818_v55 = vadd.f32 %v814_v51, %v770_v14  ;;  %v819_v35 = vadd.f32 %v815_v18, %v771_v57  ;;  %v820_v58 = vadd.f32 %v816_v5, %v772_v50  ;;  %v885_v53 = vrot.slane %v4727_v39, %v4208_v41 }
  0xfc   :  { %v889_v42 = vrot.slane %v4730_v29, %v4208_v41  ;;  %v904_v28 = vmul.f32 %v6949_v19, %v893_v10  ;;  %v905_v49 = vmul.f32 %v6949_v19, %v897_v12  ;;  %v878_v40 = vadd.f32 %v874_v27, %v817_v32 }
  0xfd   :  { %v973_v4 = vpop.permute.xlu1 %972  ;;  %v880_v14 = vadd.f32 %v876_v52, %v819_v35  ;;  %v881_v8 = vadd.f32 %v877_v43, %v820_v58  ;;  %v879_v20 = vadd.f32 %v875_v6, %v818_v55  ;;  %v949_v57 = vrot.slane %v4721_v11, %v4261_v60 }
  0xfe   :  { %v976_v13 = vsel %vm974_vm5, %v969_v54, %v973_v4  ;;  %v978_v9 = vsel %vm974_vm5, %v973_v4, %v969_v54  ;;  %v953_v50 = vrot.slane %v4724_v3, %v4261_v60  ;;  %v4799_v23 = vmul.f32 %v4761_v24, %v975_v1  ;;  %v4822_v4 = vpop.permute.xlu0 %1161 }
  0xff   :  { %v4802_v54 = vmul.f32 %v4764_v33, %v977_v2  ;;  %v4805_v25 = vmul.f32 %v4761_v24, %v976_v13  ;;  %v4808_v51 = vmul.f32 %v4764_v33, %v978_v9  ;;  %v902_v18 = vmul.f32 %v6949_v19, %v885_v53 }
 0x100   :  { %v903_v11 = vmul.f32 %v6949_v19, %v889_v42  ;;  %v913_v3 = vrot.slane %v4727_v39, %v4258_v59  ;;  %v917_v5 = vrot.slane %v4730_v29, %v4258_v59  ;;  %v908_v10 = vadd.f32 %v904_v28, %v880_v14 }
 0x101   :  { %v4796_v62 = vpop.permute.xlu1 %1044  ;;  %v909_v12 = vadd.f32 %v905_v49, %v881_v8  ;;  %v941_v52 = vrot.slane %v4727_v39, %v4261_v60  ;;  %v945_v43 = vrot.slane %v4730_v29, %v4261_v60  ;;  %v906_v1 = vadd.f32 %v902_v18, %v878_v40 }
 0x102   :  { %v907_v2 = vadd.f32 %v903_v11, %v879_v20  ;;  %v930_v27 = vmul.f32 %v4698_v44, %v913_v3  ;;  %v931_v6 = vmul.f32 %v4698_v44, %v917_v5  ;;  %v932_v32 = vmul.f32 %v4698_v44, %v921_v34  ;;  %v3818_v34 = vld [vmem:[%s6826_s1 + $0x7] ss:$8 sm:$0x3] }
 0x103   :  { %v933_v55 = vmul.f32 %v4698_v44, %v925_v46  ;;  %v1009_v35 = vrot.slane %v4805_v25, %v4199_v38  ;;  %v1013_v39 = vrot.slane %v4808_v51, %v4199_v38  ;;  %v958_v29 = vmul.f32 %v4732_v16, %v941_v52 }
 0x104   :  { %v959_v53 = vmul.f32 %v4732_v16, %v945_v43  ;;  %v960_v42 = vmul.f32 %v4732_v16, %v949_v57  ;;  %v961_v13 = vmul.f32 %v4732_v16, %v953_v50  ;;  %v1001_v44 = vrot.slane %v4799_v23, %v4199_v38  ;;  %v4847_v50 = vpop.permute.xlu0 %1260 }
 0x105   :  { %v1005_v46 = vrot.slane %v4802_v54, %v4199_v38  ;;  %v934_v9 = vadd.f32 %v930_v27, %v906_v1  ;;  %v935_v19 = vadd.f32 %v931_v6, %v907_v2  ;;  %v936_v28 = vadd.f32 %v932_v32, %v908_v10 }
 0x106   :  { %v1073_v58 = vpop.permute.xlu1 %1072  ;;  %v937_v49 = vadd.f32 %v933_v55, %v909_v12  ;;  %v1021_v14 = vmul.f32 %v4754_v21, %v1009_v35  ;;  %v1022_v8 = vmul.f32 %v4754_v21, %v1013_v39  ;;  %v4845_v57 = vrot.slane %v3818_v34, %v4199_v38 }
 0x107   :  { %v962_v16 = vadd.f32 %v958_v29, %v934_v9  ;;  %v963_v20 = vadd.f32 %v959_v53, %v935_v19  ;;  %v964_v18 = vadd.f32 %v960_v42, %v936_v28  ;;  %v1038_v3 = vrot.slane %v4805_v25, %v4208_v41 }
 0x108   :  { %6950 = vst [vmem:[#allocation16_spill] sm:$0xff] %v4845_v57  ;;  %v965_v11 = vadd.f32 %v961_v13, %v937_v49  ;;  %v1042_v5 = vrot.slane %v4808_v51, %v4208_v41  ;;  %v1019_v10 = vmul.f32 %v4754_v21, %v1001_v44  ;;  %v1020_v12 = vmul.f32 %v4754_v21, %v1005_v46  ;;  %v4882_v9 = vpop.permute.xlu0 %1306 }
 0x109   :  { %v1086_v52 = vrot.slane %v4799_v23, %v4261_v60  ;;  %v4858_v43 = vrot.slane %v3818_v34, %v4208_v41  ;;  %v1025_v1 = vadd.f32 %v1021_v14, %v964_v18  ;;  %v1030_v27 = vrot.slane %v4799_v23, %v4208_v41 }
 0x10a   :  { %v1112_v40 = vpop.permute.xlu1 %1111  ;;  %v1026_v2 = vadd.f32 %v1022_v8, %v965_v11  ;;  %v1034_v6 = vrot.slane %v4802_v54, %v4208_v41  ;;  %v1058_v55 = vrot.slane %v4799_v23, %v4258_v59  ;;  %v1062_v21 = vrot.slane %v4802_v54, %v4258_v59 }
 0x10b   :  { %6951 = vst [vmem:[#allocation15_spill] sm:$0xff] %v4858_v43  ;;  %v1120_v35 = vsel %vm1119_vm6, %v1112_v40, %v4790_v56  ;;  %v1122_v39 = vsel %vm1119_vm6, %v4790_v56, %v1112_v40  ;;  %v1023_v29 = vadd.f32 %v1019_v10, %v962_v16  ;;  %v1024_v53 = vadd.f32 %v1020_v12, %v963_v20 }
 0x10c   :  { %v1049_v42 = vmul.f32 %v4796_v62, %v1038_v3  ;;  %v1050_v13 = vmul.f32 %v4796_v62, %v1042_v5  ;;  %v1047_v34 = vmul.f32 %v4796_v62, %v1030_v27  ;;  %v1048_v23 = vmul.f32 %v4796_v62, %v1034_v6 }
 0x10d   :  { %v1066_v44 = vrot.slane %v4805_v25, %v4258_v59  ;;  %v1070_v46 = vrot.slane %v4808_v51, %v4258_v59  ;;  %v4885_v28 = vmul.f32 %v4845_v57, %v1120_v35  ;;  %v4888_v49 = vmul.f32 %v4858_v43, %v1122_v39 }
 0x10e   :  { %v1114_v32 = vpop.permute.xlu1 %1113  ;;  %v1053_v19 = vadd.f32 %v1049_v42, %v1025_v1  ;;  %v1054_v56 = vadd.f32 %v1050_v13, %v1026_v2  ;;  %v1075_v8 = vmul.f32 %v1073_v58, %v1058_v55  ;;  %v1076_v20 = vmul.f32 %v1073_v58, %v1062_v21  ;;  %v1101_v2 = vpop.permute.xlu0 %1100 }
 0x10f   :  { %v1077_v40 = vmul.f32 %v1073_v58, %v1066_v44  ;;  %v1078_v18 = vmul.f32 %v1073_v58, %v1070_v46  ;;  %v1090_v5 = vrot.slane %v4802_v54, %v4261_v60  ;;  %v1094_v10 = vrot.slane %v4805_v25, %v4261_v60  ;;  %v3820_v58 = vld [vmem:[%s6826_s1 + $0x10] ss:$8 sm:$0x3] }
 0x110   :  { %v1098_v12 = vrot.slane %v4808_v51, %v4261_v60  ;;  %v1051_v1 = vadd.f32 %v1047_v34, %v1023_v29  ;;  %v1052_v27 = vadd.f32 %v1048_v23, %v1024_v53  ;;  %v1146_v6 = vrot.slane %v4885_v28, %v4199_v38 }
 0x111   :  { %v1081_v21 = vadd.f32 %v1077_v40, %v1053_v19  ;;  %v1082_v39 = vadd.f32 %v1078_v18, %v1054_v56  ;;  %v4919_v29 = vrot.slane %v3820_v58, %v4199_v38  ;;  %v1103_v53 = vmul.f32 %v1101_v2, %v1086_v52 }
 0x112   :  { %v1118_v14 = vpop.permute.xlu1 %1117  ;;  %v1079_v55 = vadd.f32 %v1075_v8, %v1051_v1  ;;  %v1080_v35 = vadd.f32 %v1076_v20, %v1052_v27  ;;  %v1105_v42 = vmul.f32 %v1101_v2, %v1094_v10  ;;  %v4923_v34 = vrot.slane %v3820_v58, %v4208_v41 }
 0x113   :  { %v1121_v62 = vsel %vm1119_vm6, %v1114_v32, %v1118_v14  ;;  %v1123_v16 = vsel %vm1119_vm6, %v1118_v14, %v1114_v32  ;;  %v1150_v32 = vrot.slane %v4888_v49, %v4199_v38  ;;  %6952 = vst [vmem:[#allocation10_spill] sm:$0xff] %v4919_v29  ;;  %v1104_v23 = vmul.f32 %v1101_v2, %v1090_v5 }
 0x114   :  { %v4895_v11 = vmul.f32 %v4845_v57, %v1121_v62  ;;  %v4898_v3 = vmul.f32 %v4858_v43, %v1123_v16  ;;  %6953 = vst [vmem:[#allocation17_spill] sm:$0xff] %v4923_v34  ;;  %v1106_v44 = vmul.f32 %v1101_v2, %v1098_v12  ;;  %v1164_v46 = vmul.f32 %v4822_v4, %v1146_v6 }
 0x115   :  { %v1165_v19 = vmul.f32 %v4822_v4, %v1150_v32  ;;  %v1107_v14 = vadd.f32 %v1103_v53, %v1079_v55  ;;  %v1109_v56 = vadd.f32 %v1105_v42, %v1081_v21  ;;  %v1108_v62 = vadd.f32 %v1104_v23, %v1080_v35 }
 0x116   :  { %v1154_v54 = vrot.slane %v4895_v11, %v4199_v38  ;;  %v1190_v25 = vpop.permute.xlu1 %1189  ;;  %v1158_v51 = vrot.slane %v4898_v3, %v4199_v38  ;;  %v1183_v40 = vrot.slane %v4895_v11, %v4208_v41  ;;  %v1110_v16 = vadd.f32 %v1106_v44, %v1082_v39 }
 0x117   :  { %v1231_v20 = vrot.slane %v4885_v28, %v4261_v60  ;;  %v1175_v18 = vrot.slane %v4885_v28, %v4208_v41  ;;  %v1179_v10 = vrot.slane %v4888_v49, %v4208_v41  ;;  %v1187_v12 = vrot.slane %v4898_v3, %v4208_v41 }
 0x118   :  { %v1166_v13 = vmul.f32 %v4822_v4, %v1154_v54  ;;  %v1167_v8 = vmul.f32 %v4822_v4, %v1158_v51  ;;  %v1203_v4 = vrot.slane %v4885_v28, %v4258_v59  ;;  %v1168_v1 = vadd.f32 %v1164_v46, %v1107_v14 }
 0x119   :  { %v1169_v58 = vadd.f32 %v1165_v19, %v1108_v62  ;;  %v1192_v2 = vmul.f32 %v1190_v25, %v1175_v18  ;;  %v1207_v27 = vrot.slane %v4888_v49, %v4258_v59  ;;  %v1193_v32 = vmul.f32 %v1190_v25, %v1179_v10 }
 0x11a   :  { %v1170_v5 = vadd.f32 %v1166_v13, %v1109_v56  ;;  %v1171_v6 = vadd.f32 %v1167_v8, %v1110_v16  ;;  %v1194_v54 = vmul.f32 %v1190_v25, %v1183_v40  ;;  %v1211_v55 = vrot.slane %v4895_v11, %v4258_v59  ;;  %v1246_v56 = vpop.permute.xlu0 %1245 }
 0x11b   :  { %v1218_v52 = vpop.permute.xlu1 %1217  ;;  %v1215_v51 = vrot.slane %v4898_v3, %v4258_v59  ;;  %v1195_v53 = vmul.f32 %v1190_v25, %v1187_v12  ;;  %v1235_v44 = vrot.slane %v4888_v49, %v4261_v60  ;;  %v1196_v46 = vadd.f32 %v1192_v2, %v1168_v1 }
 0x11c   :  { %v1220_v35 = vmul.f32 %v1218_v52, %v1203_v4  ;;  %v1198_v42 = vadd.f32 %v1194_v54, %v1170_v5  ;;  %v1221_v13 = vmul.f32 %v1218_v52, %v1207_v27  ;;  %v1222_v23 = vmul.f32 %v1218_v52, %v1211_v55 }
 0x11d   :  { %v1239_v8 = vrot.slane %v4895_v11, %v4261_v60  ;;  %v1197_v40 = vadd.f32 %v1193_v32, %v1169_v58  ;;  %v1223_v25 = vmul.f32 %v1218_v52, %v1215_v51  ;;  %v1243_v16 = vrot.slane %v4898_v3, %v4261_v60 }
 0x11e   :  { %v1224_v18 = vadd.f32 %v1220_v35, %v1196_v46  ;;  %v1226_v5 = vadd.f32 %v1222_v23, %v1198_v42  ;;  %v1248_v10 = vmul.f32 %v1246_v56, %v1231_v20  ;;  %v1249_v1 = vmul.f32 %v1246_v56, %v1235_v44 }
 0x11f   :  { %v1257_v21 = vpop.permute.xlu1 %1256  ;;  %v1225_v49 = vadd.f32 %v1221_v13, %v1197_v40  ;;  %v1250_v2 = vmul.f32 %v1246_v56, %v1239_v8  ;;  %v1251_v27 = vmul.f32 %v1246_v56, %v1243_v16 }
 0x120   :  { %v1265_v28 = vsel %vm1264_vm7, %v1257_v21, %v4847_v50  ;;  %v1267_v39 = vsel %vm1264_vm7, %v4847_v50, %v1257_v21  ;;  %v1199_v50 = vadd.f32 %v1195_v53, %v1171_v6  ;;  %v1252_v52 = vadd.f32 %v1248_v10, %v1224_v18 }
 0x121   :  { %v4955_v19 = vmul.f32 %v4919_v29, %v1265_v28  ;;  %v4958_v14 = vmul.f32 %v4923_v34, %v1267_v39  ;;  %v1253_v32 = vadd.f32 %v1249_v1, %v1225_v49  ;;  %v1254_v20 = vadd.f32 %v1250_v2, %v1226_v5 }
 0x122   :  { %v1227_v11 = vadd.f32 %v1223_v25, %v1199_v50 }
 0x123   :  { %v1259_v62 = vpop.permute.xlu1 %1258  ;;  %v1291_v12 = vrot.slane %v4955_v19, %v4199_v38  ;;  %v1295_v4 = vrot.slane %v4958_v14, %v4199_v38  ;;  %v1320_v35 = vrot.slane %v4955_v19, %v4208_v41  ;;  %v1324_v28 = vrot.slane %v4958_v14, %v4208_v41 }
 0x124   :  { %v1255_v39 = vadd.f32 %v1251_v27, %v1227_v11  ;;  %v1376_v53 = vrot.slane %v4955_v19, %v4261_v60  ;;  %v1380_v40 = vrot.slane %v4958_v14, %v4261_v60  ;;  %v1352_v5 = vrot.slane %v4958_v14, %v4258_v59 }
 0x125   :  { %v1309_v21 = vmul.f32 %v4882_v9, %v1291_v12  ;;  %v1310_v51 = vmul.f32 %v4882_v9, %v1295_v4 }
 0x127   :  { %v1263_v58 = vpop.permute.xlu1 %1262  ;;  %v1313_v18 = vadd.f32 %v1309_v21, %v1252_v52  ;;  %v1314_v49 = vadd.f32 %v1310_v51, %v1253_v32  ;;  %v1391_v52 = vpop.permute.xlu0 %1390 }
 0x128   :  { %v1266_v6 = vsel %vm1264_vm7, %v1259_v62, %v1263_v58  ;;  %v1268_v3 = vsel %vm1264_vm7, %v1263_v58, %v1259_v62  ;;  %v1348_v62 = vrot.slane %v4955_v19, %v4258_v59 }
 0x129   :  { %v1284_v54 = vmul.f32 %v4919_v29, %v1266_v6  ;;  %v1285_v55 = vmul.f32 %v4923_v34, %v1268_v3 }
 0x12b   :  { %v1299_v42 = vrot.slane %v1284_v54, %v4199_v38  ;;  %v1303_v13 = vrot.slane %v1285_v55, %v4199_v38  ;;  %v1335_v23 = vpop.permute.xlu1 %1334  ;;  %v1328_v44 = vrot.slane %v1284_v54, %v4208_v41  ;;  %v1332_v46 = vrot.slane %v1285_v55, %v4208_v41 }
 0x12c   :  { %v1337_v56 = vmul.f32 %v1335_v23, %v1320_v35  ;;  %v1338_v8 = vmul.f32 %v1335_v23, %v1324_v28  ;;  %v1384_v16 = vrot.slane %v1284_v54, %v4261_v60  ;;  %v1356_v58 = vrot.slane %v1284_v54, %v4258_v59 }
 0x12d   :  { %v1311_v50 = vmul.f32 %v4882_v9, %v1299_v42  ;;  %v1312_v25 = vmul.f32 %v4882_v9, %v1303_v13  ;;  %v1339_v4 = vmul.f32 %v1335_v23, %v1328_v44  ;;  %v1340_v1 = vmul.f32 %v1335_v23, %v1332_v46 }
 0x12e   :  { %v1341_v2 = vadd.f32 %v1337_v56, %v1313_v18  ;;  %v1342_v11 = vadd.f32 %v1338_v8, %v1314_v49  ;;  %v1360_v9 = vrot.slane %v1285_v55, %v4258_v59  ;;  %v1388_v32 = vrot.slane %v1285_v55, %v4261_v60  ;;  %v3940_v49 = vld [vmem:[%s6831_s6] sm:$0xff] }
 0x12f   :  { %v1315_v10 = vadd.f32 %v1311_v50, %v1254_v20  ;;  %v1316_v12 = vadd.f32 %v1312_v25, %v1255_v39  ;;  %v1393_v20 = vmul.f32 %v1391_v52, %v1376_v53  ;;  %v1395_v39 = vmul.f32 %v1391_v52, %v1384_v16 }
 0x130   :  { %v1363_v27 = vpop.permute.xlu1 %1362  ;;  %v1394_v23 = vmul.f32 %v1391_v52, %v1380_v40  ;;  %v1396_v44 = vmul.f32 %v1391_v52, %v1388_v32  ;;  %v3823_v40 = vld [vmem:[%s6831_s6 + $0x10] sm:$0xff]  ;;  %v6862_v16 = vmov 4   ;;  %v6958_v18 = vmov 2  }
 0x131   :  { %v1343_v6 = vadd.f32 %v1339_v4, %v1315_v10  ;;  %v1344_v19 = vadd.f32 %v1340_v1, %v1316_v12  ;;  %v1365_v3 = vmul.f32 %v1363_v27, %v1348_v62  ;;  %v1366_v35 = vmul.f32 %v1363_v27, %v1352_v5  ;;  %v3822_v62 = vld [vmem:[%s6831_s6 + $0x8] sm:$0xff]  ;;  %v3824_v12 = vld [vmem:[%s6831_s6 + $0x18] sm:$0xff] }
 0x132   :  { %v1367_v21 = vmul.f32 %v1363_v27, %v1356_v58  ;;  %v1368_v14 = vmul.f32 %v1363_v27, %v1360_v9  ;;  %v6858_v5 = vmov 7   ;;  %v6959_v10 = vmov 0   ;;  %v5058_v4 = vld [vmem:[%s6831_s6 + $0x28] sm:$0xff]  ;;  %v5094_v9 = vld [vmem:[%s6831_s6 + $0x30] sm:$0xff] }
 0x133   :  { %v1369_v51 = vadd.f32 %v1365_v3, %v1341_v2  ;;  %v1370_v28 = vadd.f32 %v1366_v35, %v1342_v11  ;;  %v3825_v2 = vld [vmem:[%s6831_s6 + $0x20] sm:$0xff]  ;;  %6960 = vst [vmem:[#allocation27_spill] sm:$0xff] %v5094_v9  ;;  %v5108_v3 = vpop.permute.xlu0 %1474 }
 0x134   :  { %v1371_v42 = vadd.f32 %v1367_v21, %v1343_v6  ;;  %v1372_v13 = vadd.f32 %v1368_v14, %v1344_v19  ;;  %v5123_v14 = vld [vmem:[%s6831_s6 + $0x38] sm:$0xff] }
 0x135   :  { %v1397_v54 = vadd.f32 %v1393_v20, %v1369_v51  ;;  %v1398_v56 = vadd.f32 %v1394_v23, %v1370_v28  ;;  %v5072_v1 = vpop.permute.xlu1 %1408  ;;  %6961 = vst [vmem:[#allocation28_spill] sm:$0xff] %v5123_v14 }
 0x136   :  { %v1399_v46 = vadd.f32 %v1395_v39, %v1371_v42  ;;  %v1400_v50 = vadd.f32 %v1396_v44, %v1372_v13  ;;  %v6962_v39 = vld [vmem:[#allocation7_spill] sm:$0xff]  ;;  %v6963_v13 = vld [vmem:[#allocation8_spill] sm:$0xff] }
 0x137   :  { %v4998_v8 = vmax.f32 %v1397_v54, 0.0  ;;  %v5006_v55 = vmax.f32 %v1398_v56, 0.0 }
 0x138   :  { %v5000_v25 = vmax.f32 %v1399_v46, 0.0  ;;  %v5008_v53 = vmax.f32 %v1400_v50, 0.0 }
 0x139   :  { %6954 = vst [vmem:[#allocation23_spill] sm:$0xff] %v4998_v8  ;;  %1411 = vrot.lane.b32.xlu1 %v4998_v8, %s3970_s11  ;;  %6956 = vst [vmem:[#allocation25_spill] sm:$0xff] %v5006_v55  ;;  %v5081_v11 = vpop.permute.xlu1 %1446 }
 0x13a   :  { %6955 = vst [vmem:[#allocation24_spill] sm:$0xff] %v5000_v25  ;;  %1413 = vrot.lane.b32.xlu0 %v5000_v25, %s3970_s11  ;;  %6957 = vst [vmem:[#allocation26_spill] sm:$0xff] %v5008_v53 }
 0x13d   :  { %1415 = vrot.lane.b32.xlu1 %v5006_v55, %s3970_s11 }
 0x13e   :  { %1417 = vrot.lane.b32.xlu0 %v5008_v53, %s3970_s11  ;;  %v5086_v58 = vpop.permute.xlu1 %1502 }
 0x141   :  { %1653 = vrot.lane.b32.xlu1 %v4998_v8, %s3972_s13 }
 0x142   :  { %1657 = vrot.lane.b32.xlu0 %v5006_v55, %s3972_s13 }
 0x143   :  { %v5096_v27 = vpop.permute.xlu1 %1530 }
 0x145   :  { %1655 = vrot.lane.b32.xlu1 %v5000_v25, %s3972_s13 }
 0x146   :  { %1898 = vrot.lane.b32.xlu0 %v5000_v25, %s3974_s16 }
 0x148   :  { %v5101_v6 = vpop.permute.xlu1 %1586 }
 0x149   :  { %1659 = vrot.lane.b32.xlu1 %v5008_v53, %s3972_s13 }
 0x14a   :  { %1960 = vperm.xlu0 %3876, %v3823_v40  }
 0x14d   :  { %1717 = vperm.xlu1 %3881, %v3822_v62   ;;  %v5106_v19 = vpop.permute.xlu1 %1614 }
 0x14e   :  { %1902 = vrot.lane.b32.xlu0 %v5008_v53, %s3974_s16 }
 0x14f   :  { %3887 = vset.pattern.permute.xlu0 %v6862_v16 }
 0x151   :  { %3882 = vset.pattern.permute.xlu1 %v6958_v18 }
 0x152   :  { %1558 = vperm.xlu0 %3887, %v3940_v49   ;;  %1745 = vperm.xlu1 %3882, %v3822_v62  }
 0x156   :  { %2044 = vperm.xlu0 %3887, %v3823_v40   ;;  %3883 = vset.pattern.permute.xlu1 %v6862_v16 }
 0x157   :  { %1801 = vperm.xlu1 %3883, %v3822_v62  }
 0x15a   :  { %3890 = vset.pattern.permute.xlu0 %v6858_v5 }
 0x15b   :  { %1642 = vperm.xlu0 %3890, %v3940_v49   ;;  %3884 = vset.pattern.permute.xlu1 %v6860_v45 }
 0x15c   :  { %1829 = vperm.xlu1 %3884, %v3822_v62  }
 0x15f   :  { %2128 = vperm.xlu0 %3890, %v3823_v40  }
 0x160   :  { %3885 = vset.pattern.permute.xlu1 %v6858_v5 }
 0x161   :  { %1885 = vperm.xlu1 %3885, %v3822_v62  }
 0x163   :  { %3893 = vset.pattern.permute.xlu0 %v6959_v10 }
 0x164   :  { %1689 = vperm.xlu0 %3893, %v3822_v62  }
 0x165   :  { %1896 = vrot.lane.b32.xlu1 %v4998_v8, %s3974_s16 }
 0x166   :  { %3886 = vset.pattern.permute.xlu1 %v6959_v10 }
 0x168   :  { %2143 = vrot.lane.b32.xlu0 %v5006_v55, %s3976_s19 }
 0x169   :  { %1900 = vrot.lane.b32.xlu1 %v5006_v55, %s3974_s16 }
 0x16c   :  { %2175 = vperm.xlu0 %3893, %v3824_v12  }
 0x16d   :  { %1932 = vperm.xlu1 %3886, %v3823_v40  }
 0x170   :  { %2613 = vrot.lane.b32.xlu0 %v5006_v55, %s3977_s24 }
 0x171   :  { %3888 = vset.pattern.permute.xlu1 %v6958_v18 }
 0x172   :  { %1988 = vperm.xlu1 %3888, %v3823_v40  }
 0x174   :  { %2645 = vperm.xlu0 %3893, %v5058_v4  }
 0x176   :  { %3889 = vset.pattern.permute.xlu1 %v6933_v47 }
 0x177   :  { %2016 = vperm.xlu1 %3889, %v3823_v40  }
 0x178   :  { %3904 = vset.pattern.permute.xlu0 %v6933_v47 }
 0x179   :  { %1773 = vperm.xlu0 %3904, %v3822_v62  }
 0x17b   :  { %3891 = vset.pattern.permute.xlu1 %v6860_v45 }
 0x17c   :  { %2072 = vperm.xlu1 %3891, %v3823_v40  }
 0x17d   :  { %2259 = vperm.xlu0 %3904, %v3824_v12  }
 0x180   :  { %3892 = vset.pattern.permute.xlu1 %v6856_v48 }
 0x181   :  { %2729 = vperm.xlu0 %3904, %v5058_v4   ;;  %2100 = vperm.xlu1 %3892, %v3823_v40  }
 0x185   :  { %3907 = vset.pattern.permute.xlu0 %v6856_v48  ;;  %2139 = vrot.lane.b32.xlu1 %v4998_v8, %s3976_s19 }
 0x186   :  { %1857 = vperm.xlu0 %3907, %v3822_v62   ;;  %3894 = vset.pattern.permute.xlu1 %v6939_v63 }
 0x189   :  { %2141 = vrot.lane.b32.xlu1 %v5000_v25, %s3976_s19 }
 0x18a   :  { %2343 = vperm.xlu0 %3907, %v3824_v12  }
 0x18d   :  { %2145 = vrot.lane.b32.xlu1 %v5008_v53, %s3976_s19 }
 0x18e   :  { %2813 = vperm.xlu0 %3907, %v5058_v4  }
 0x191   :  { %2203 = vperm.xlu1 %3894, %v3824_v12  }
 0x192   :  { %3910 = vset.pattern.permute.xlu0 %v6939_v63 }
 0x193   :  { %2430 = vperm.xlu0 %3910, %v3825_v2  }
 0x195   :  { %3895 = vset.pattern.permute.xlu1 %v6958_v18 }
 0x196   :  { %2231 = vperm.xlu1 %3895, %v3824_v12  }
 0x197   :  { %2854 = vrot.lane.b32.xlu0 %v5000_v25, %s3978_s27 }
 0x19a   :  { %3896 = vset.pattern.permute.xlu1 %v6862_v16 }
 0x19b   :  { %2858 = vrot.lane.b32.xlu0 %v5008_v53, %s3978_s27  ;;  %2287 = vperm.xlu1 %3896, %v3824_v12  }
 0x19f   :  { %2916 = vperm.xlu0 %3910, %v5094_v9   ;;  %3897 = vset.pattern.permute.xlu1 %v6860_v45 }
 0x1a0   :  { %2315 = vperm.xlu1 %3897, %v3824_v12  }
 0x1a3   :  { %3913 = vset.pattern.permute.xlu0 %v6862_v16 }
 0x1a4   :  { %2514 = vperm.xlu0 %3913, %v3825_v2   ;;  %3898 = vset.pattern.permute.xlu1 %v6858_v5 }
 0x1a5   :  { %2371 = vperm.xlu1 %3898, %v3824_v12  }
 0x1a8   :  { %3000 = vperm.xlu0 %3913, %v5094_v9  }
 0x1a9   :  { %3899 = vset.pattern.permute.xlu1 %v6959_v10 }
 0x1aa   :  { %2402 = vperm.xlu1 %3899, %v3825_v2  }
 0x1ab   :  { %v1412_v35 = vpop.permute.xlu1 %1411 }
 0x1ac   :  { %3916 = vset.pattern.permute.xlu0 %v6858_v5  ;;  %v1414_v52 = vpop.permute.xlu0 %1413 }
 0x1ad   :  { %2598 = vperm.xlu0 %3916, %v3825_v2  }
 0x1ae   :  { %3900 = vset.pattern.permute.xlu1 %v6958_v18 }
 0x1af   :  { %2458 = vperm.xlu1 %3900, %v3825_v2   ;;  %v1416_v32 = vpop.permute.xlu1 %1415 }
 0x1b0   :  { %v1418_v21 = vpop.permute.xlu0 %1417  ;;  %v1419_v54 = vsel %vm56_vm0, %v1412_v35, %v1416_v32  ;;  %v1421_v44 = vsel %vm56_vm0, %v1416_v32, %v1412_v35 }
 0x1b1   :  { %3084 = vperm.xlu0 %3916, %v5094_v9   ;;  %v1420_v20 = vsel %vm56_vm0, %v1414_v52, %v1418_v21  ;;  %v1422_v51 = vsel %vm56_vm0, %v1418_v21, %v1414_v52  ;;  %v5146_v56 = vmul.f32 %v1421_v44, %v6962_v39  ;;  %v5149_v50 = vmul.f32 %v1419_v54, %v6963_v13 }
 0x1b2   :  { %v5133_v42 = vmul.f32 %v1422_v51, %v6962_v39  ;;  %v5136_v23 = vmul.f32 %v1420_v20, %v6963_v13  ;;  %v5185_v13 = vld [vmem:[%s6831_s6 + $0x40] sm:$0xff] }
 0x1b3   :  { %3901 = vset.pattern.permute.xlu1 %v6933_v47  ;;  %v5129_v28 = vpop.permute.xlu1 %1653  ;;  %v1431_v12 = vrot.slane %v5146_v56, %v4199_v38  ;;  %v1520_v61 = vrot.slane %v5149_v50, %v4261_v60 }
 0x1b4   :  { %2486 = vperm.xlu1 %3901, %v3825_v2   ;;  %v5143_v46 = vpop.permute.xlu0 %1657  ;;  %v1439_v40 = vrot.slane %v5133_v42, %v4199_v38  ;;  %v1443_v62 = vrot.slane %v5136_v23, %v4199_v38  ;;  %v1468_v54 = vrot.slane %v5133_v42, %v4208_v41  ;;  %v1472_v44 = vrot.slane %v5136_v23, %v4208_v41 }
 0x1b5   :  { %3097 = vrot.lane.b32.xlu0 %v5000_v25, %s3979_s30  ;;  %v1449_v39 = vmul.f32 %v5081_v11, %v1431_v12  ;;  %v1496_v51 = vrot.slane %v5133_v42, %v4258_v59  ;;  %v1500_v12 = vrot.slane %v5136_v23, %v4258_v59  ;;  %v1524_v16 = vrot.slane %v5133_v42, %v4261_v60 }
 0x1b6   :  { %3921 = vset.pattern.permute.xlu0 %v6958_v18  ;;  %v1451_v52 = vmul.f32 %v5081_v11, %v1439_v40  ;;  %v1452_v32 = vmul.f32 %v5081_v11, %v1443_v62  ;;  %v1479_v5 = vmul.f32 %v5108_v3, %v1468_v54  ;;  %v1528_v34 = vrot.slane %v5136_v23, %v4261_v60 }
 0x1b7   :  { %v5156_v49 = vpop.permute.xlu1 %1655  ;;  %v1580_v43 = vrot.slane %v5133_v42, %v6942_v7  ;;  %v1507_v24 = vmul.f32 %v5086_v58, %v1496_v51  ;;  %v1508_v37 = vmul.f32 %v5086_v58, %v1500_v12 }
 0x1b8   :  { %3902 = vset.pattern.permute.xlu1 %v6860_v45  ;;  %v5166_v35 = vpop.permute.xlu0 %1898  ;;  %v1456_v62 = vadd.f32 %v1452_v32, %v5072_v1  ;;  %v1453_v32 = vadd.f32 %v1449_v39, %v5072_v1 }
 0x1b9   :  { %3101 = vrot.lane.b32.xlu0 %v5008_v53, %s3979_s30  ;;  %2542 = vperm.xlu1 %3902, %v3825_v2  }
 0x1bb   :  { %v5191_v40 = vpop.permute.xlu1 %1659 }
 0x1bd   :  { %3187 = vperm.xlu0 %3921, %v5123_v14   ;;  %3903 = vset.pattern.permute.xlu1 %v6856_v48  ;;  %v1480_v48 = vmul.f32 %v5108_v3, %v1472_v44 }
 0x1be   :  { %2570 = vperm.xlu1 %3903, %v3825_v2   ;;  %v1435_v2 = vrot.slane %v5149_v50, %v4199_v38 }
 0x1bf   :  { %v1484_v33 = vadd.f32 %v1480_v48, %v1456_v62  ;;  %v1536_v48 = vmul.f32 %v5096_v27, %v1528_v34 }
 0x1c0   :  { %v1450_v20 = vmul.f32 %v5081_v11, %v1435_v2  ;;  %v1460_v11 = vrot.slane %v5146_v56, %v4208_v41  ;;  %v1464_v2 = vrot.slane %v5149_v50, %v4208_v41 }
 0x1c1   :  { %3924 = vset.pattern.permute.xlu0 %v6860_v45  ;;  %v1455_v45 = vadd.f32 %v1451_v52, %v5072_v1  ;;  %v1584_v52 = vrot.slane %v5136_v23, %v6942_v7 }
 0x1c2   :  { %3271 = vperm.xlu0 %3924, %v5123_v14   ;;  %2609 = vrot.lane.b32.xlu1 %v4998_v8, %s3977_s24  ;;  %v1454_v54 = vadd.f32 %v1450_v20, %v5072_v1  ;;  %v1492_v1 = vrot.slane %v5149_v50, %v4258_v59  ;;  %v1612_v20 = vrot.slane %v5136_v23, %v4466_v26 }
 0x1c3   :  { %3905 = vset.pattern.permute.xlu1 %v6939_v63  ;;  %v1483_v44 = vadd.f32 %v1479_v5, %v1455_v45  ;;  %v1535_v45 = vmul.f32 %v5096_v27, %v1524_v16  ;;  %v1608_v5 = vrot.slane %v5133_v42, %v4466_v26  ;;  %v5260_v51 = vmul.f32 %v5101_v6, %v1584_v52 }
 0x1c4   :  { %v1506_v31 = vmul.f32 %v5086_v58, %v1492_v1  ;;  %v6966_v1 = vld [vmem:[#allocation13_spill] sm:$0xff] }
 0x1c5   :  { %v1511_v34 = vadd.f32 %v1507_v24, %v1483_v44  ;;  %v1572_v24 = vrot.slane %v5146_v56, %v6942_v7 }
 0x1c6   :  { %3342 = vrot.lane.b32.xlu0 %v5006_v55, %s3980_s5  ;;  %2611 = vrot.lane.b32.xlu1 %v5000_v25, %s3977_s24  ;;  %v1478_v25 = vmul.f32 %v5108_v3, %v1464_v2  ;;  %v1516_v2 = vrot.slane %v5146_v56, %v4261_v60 }
 0x1c7   :  { %3927 = vset.pattern.permute.xlu0 %v6939_v63  ;;  %v1488_v63 = vrot.slane %v5146_v56, %v4258_v59 }
 0x1c8   :  { %v1482_v62 = vadd.f32 %v1478_v25, %v1454_v54  ;;  %v1661_v25 = vsel %vm199_vm1, %v5129_v28, %v5143_v46  ;;  %v5299_v54 = vadd.f32 %v1535_v45, %v1511_v34  ;;  %v1662_v45 = vsel %vm199_vm1, %v5156_v49, %v5191_v40 }
 0x1c9   :  { %v5200_v21 = vpop.permute.xlu0 %1960 }
 0x1ca   :  { %6964 = vst [vmem:[#allocation7_spill] sm:$0xff] %v5200_v21  ;;  %3402 = vperm.xlu0 %3927, %v5185_v13   ;;  %2615 = vrot.lane.b32.xlu1 %v5008_v53, %s3977_s24  ;;  %v1477_v53 = vmul.f32 %v5108_v3, %v1460_v11  ;;  %v5257_v3 = vmul.f32 %v5101_v6, %v1580_v43  ;;  %v6967_v21 = vld [vmem:[#allocation14_spill] sm:$0xff] }
 0x1cb   :  { %v1512_v11 = vadd.f32 %v1508_v37, %v1484_v33  ;;  %v1505_v43 = vmul.f32 %v5086_v58, %v1488_v63  ;;  %v1663_v37 = vsel %vm199_vm1, %v5143_v46, %v5129_v28  ;;  %v1576_v63 = vrot.slane %v5149_v50, %v6942_v7 }
 0x1cc   :  { %v5229_v29 = vpop.permute.xlu1 %1717  ;;  %v1481_v39 = vadd.f32 %v1477_v53, %v1453_v32  ;;  %v1600_v33 = vrot.slane %v5146_v56, %v4466_v26  ;;  %v1604_v53 = vrot.slane %v5149_v50, %v4466_v26  ;;  %v5291_v58 = vmul.f32 %v5106_v19, %v1608_v5 }
 0x1cd   :  { %v5237_v57 = vpop.permute.xlu0 %1902  ;;  %v5294_v28 = vmul.f32 %v5106_v19, %v1612_v20  ;;  %v1510_v52 = vadd.f32 %v1506_v31, %v1482_v62  ;;  %v5301_v44 = vadd.f32 %v1536_v48, %v1512_v11  ;;  %v5304_v14 = vmul.f32 %v1663_v37, %v6966_v1  ;;  %v5408_v37 = vld [vmem:[%s6827_s2] sm:$0xff] }
 0x1ce   :  { %3930 = vset.pattern.permute.xlu0 %v6965_v17  ;;  %2673 = vperm.xlu1 %3905, %v5058_v4   ;;  %v1509_v46 = vadd.f32 %v1505_v43, %v1481_v39  ;;  %v5307_v9 = vmul.f32 %v1661_v25, %v6967_v21  ;;  %v1533_v31 = vmul.f32 %v5096_v27, %v1516_v2  ;;  %v3582_v39 = vld [vmem:[%s6828_s3] sm:$0xff] }
 0x1cf   :  { %3486 = vperm.xlu0 %3930, %v5185_v13   ;;  %v1534_v20 = vmul.f32 %v5096_v27, %v1520_v61  ;;  %v1664_v48 = vsel %vm199_vm1, %v5191_v40, %v5156_v49  ;;  %v5329_v62 = vmul.f32 %v5101_v6, %v1576_v63  ;;  %v5332_v61 = vmul.f32 %v5106_v19, %v1600_v33 }
 0x1d0   :  { %v5335_v27 = vmul.f32 %v5106_v19, %v1604_v53  ;;  %v5338_v34 = vadd.f32 %v1533_v31, %v1509_v46  ;;  %v1552_v40 = vrot.slane %v5133_v42, %v4273_v0  ;;  %v1556_v11 = vrot.slane %v5136_v23, %v4273_v0  ;;  %6971 = vst [vmem:[#allocation14_spill] sm:$0xff] %v5408_v37 }
 0x1d1   :  { %v5262_v12 = vpop.permute.xlu0 %1558  ;;  %v5264_v16 = vpop.permute.xlu1 %1745  ;;  %v5340_v49 = vadd.f32 %v1534_v20, %v1510_v52  ;;  %v1707_v19 = vrot.slane %v5307_v9, %v4208_v41  ;;  %v5352_v2 = vmul.f32 %v1664_v48, %v6966_v1  ;;  %v5355_v43 = vmul.f32 %v1662_v45, %v6967_v21 }
 0x1d2   :  { %3906 = vset.pattern.permute.xlu1 %v6958_v18  ;;  %v1544_v31 = vrot.slane %v5146_v56, %v4273_v0  ;;  %v1548_v20 = vrot.slane %v5149_v50, %v4273_v0  ;;  %v1628_v45 = vrot.slane %v5146_v56, %v4477_v30  ;;  %v1632_v63 = vrot.slane %v5149_v50, %v4477_v30 }
 0x1d3   :  { %2701 = vperm.xlu1 %3906, %v5058_v4   ;;  %3931 = vset.pattern.permute.xlu0 %v6959_v10  ;;  %v1711_v52 = vrot.slane %v5352_v2, %v4208_v41  ;;  %v1715_v1 = vrot.slane %v5355_v43, %v4208_v41  ;;  %v1739_v46 = vrot.slane %v5352_v2, %v4258_v59 }
 0x1d4   :  { %3374 = vperm.xlu0 %3931, %v5185_v13   ;;  %v5326_v13 = vmul.f32 %v5101_v6, %v1572_v24  ;;  %v1703_v6 = vrot.slane %v5304_v14, %v4208_v41  ;;  %v1743_v21 = vrot.slane %v5355_v43, %v4258_v59  ;;  %v1907_v48 = vsel %vm344_vm2, %v5237_v57, %v5166_v35 }
 0x1d5   :  { %v5296_v32 = vpop.permute.xlu0 %2044  ;;  %v1563_v50 = vmul.f32 %v5262_v12, %v1552_v40 }
 0x1d6   :  { %v5309_v5 = vpop.permute.xlu1 %1801 }
 0x1d7   :  { %3908 = vset.pattern.permute.xlu1 %v6965_v17  ;;  %v1561_v17 = vmul.f32 %v5262_v12, %v1544_v31  ;;  %v1564_v31 = vmul.f32 %v5262_v12, %v1556_v11 }
 0x1d8   :  { %2757 = vperm.xlu1 %3908, %v5058_v4   ;;  %3585 = vperm.xlu0 %3931, %v3582_v39   ;;  %v6969_v39 = vmov 5  }
 0x1da   :  { %v5357_v25 = vpop.permute.xlu0 %1642 }
 0x1db   :  { %v5367_v53 = vpop.permute.xlu1 %1829 }
 0x1dc   :  { %6968 = vst [vmem:[#allocation8_spill] sm:$0xff] %v5367_v53  ;;  %3909 = vset.pattern.permute.xlu1 %v6969_v39  ;;  %3936 = vset.pattern.permute.xlu0 %v6958_v18  ;;  %v1905_v39 = vsel %vm344_vm2, %v5166_v35, %v5237_v57  ;;  %v5442_v57 = vmul.f32 %v5229_v29, %v1703_v6 }
 0x1dd   :  { %2785 = vperm.xlu1 %3909, %v5058_v4   ;;  %3724 = vperm.xlu0 %3936, %v5408_v37   ;;  %v1562_v37 = vmul.f32 %v5262_v12, %v1548_v20  ;;  %v5445_v35 = vmul.f32 %v5229_v29, %v1707_v19  ;;  %v5451_v20 = vmul.f32 %v1907_v48, %v4294_v15 }
 0x1de   :  { %v5394_v33 = vpop.permute.xlu0 %2128  ;;  %v5457_v53 = vmul.f32 %v5229_v29, %v1711_v52  ;;  %v5460_v6 = vmul.f32 %v5229_v29, %v1715_v1  ;;  %v1565_v52 = vadd.f32 %v1561_v17, %v5338_v34  ;;  %v6975_v17 = vrot.slane %v5307_v9, %v4258_v59 }
 0x1df   :  { %6970 = vst [vmem:[#allocation13_spill] sm:$0xff] %v5394_v33  ;;  %v5454_v33 = vmul.f32 %v1905_v39, %v4304_v22  ;;  %v1566_v29 = vadd.f32 %v1562_v37, %v5340_v49  ;;  %v1567_v39 = vadd.f32 %v1563_v50, %v5299_v54  ;;  %v5511_v1 = vmul.f32 %v5264_v16, %v1739_v46 }
 0x1e0   :  { %v5419_v24 = vpop.permute.xlu1 %1885  ;;  %v5508_v48 = vmul.f32 %v5264_v16, %v6975_v17  ;;  %v5514_v37 = vmul.f32 %v5264_v16, %v1743_v21  ;;  %v1593_v49 = vadd.f32 %v5326_v13, %v1565_v52  ;;  %v2122_v46 = vrot.slane %v5451_v20, %v4477_v30 }
 0x1e1   :  { %6972 = vst [vmem:[#allocation29_spill] sm:$0xff] %v5419_v24  ;;  %v6973_v24 = vmov 7   ;;  %3939 = vset.pattern.permute.xlu0 %v6933_v47  ;;  %v1594_v11 = vadd.f32 %v5329_v62, %v1566_v29  ;;  %v2042_v40 = vrot.slane %v5454_v33, %v4273_v0  ;;  %v6979_v52 = vrot.slane %v5304_v14, %v4273_v0 }
 0x1e2   :  { %3911 = vset.pattern.permute.xlu1 %v6973_v24  ;;  %v1621_v24 = vadd.f32 %v5332_v61, %v1593_v49  ;;  %v6986_v61 = vrot.slane %v5355_v43, %v4199_v38  ;;  %v6988_v49 = vld [vmem:[#allocation27_spill] sm:$0xff] }
 0x1e3   :  { %v1690_v56 = vpop.permute.xlu0 %1689  ;;  %2841 = vperm.xlu1 %3911, %v5058_v4   ;;  %v1568_v4 = vadd.f32 %v1564_v31, %v5301_v44  ;;  %v6974_v31 = vrot.slane %v5304_v14, %v4258_v59  ;;  %v1595_v44 = vadd.f32 %v5257_v3, %v1567_v39  ;;  %v5536_v62 = vmul.f32 %v5296_v32, %v2042_v40 }
 0x1e4   :  { %v5462_v19 = vpop.permute.xlu1 %1896  ;;  %v1645_v3 = vmul.f32 %v5357_v25, %v1628_v45  ;;  %v5546_v29 = vmul.f32 %v5309_v5, %v6979_v52  ;;  %v6980_v39 = vrot.slane %v5307_v9, %v4273_v0  ;;  %v6981_v40 = vrot.slane %v5133_v42, %v4477_v30 }
 0x1e5   :  { %v5502_v34 = vmul.f32 %v5264_v16, %v6974_v31  ;;  %v2038_v31 = vrot.slane %v5451_v20, %v4273_v0  ;;  %v1596_v17 = vadd.f32 %v5260_v51, %v1568_v4  ;;  %v2126_v16 = vrot.slane %v5454_v33, %v4477_v30  ;;  %6978 = vst [vmem:[#allocation32_spill] sm:$0xff] %v5536_v62 }
 0x1e6   :  { %v1646_v51 = vmul.f32 %v5357_v25, %v1632_v63  ;;  %v1647_v45 = vmul.f32 %v5357_v25, %v6981_v40  ;;  %v6982_v63 = vrot.slane %v5136_v23, %v4477_v30  ;;  %v1622_v52 = vadd.f32 %v5335_v27, %v1594_v11 }
 0x1e7   :  { %v5481_v12 = vpop.permute.xlu0 %2143  ;;  %2852 = vrot.lane.b32.xlu1 %v4998_v8, %s3978_s27  ;;  %v5533_v13 = vmul.f32 %v5296_v32, %v2038_v31  ;;  %v5552_v31 = vmul.f32 %v5309_v5, %v6980_v39  ;;  %v6984_v39 = vrot.slane %v5307_v9, %v4199_v38  ;;  %v1623_v42 = vadd.f32 %v5291_v58, %v1595_v44 }
 0x1e8   :  { %v1901_v50 = vpop.permute.xlu1 %1900  ;;  %3912 = vset.pattern.permute.xlu1 %v6959_v10  ;;  %v1648_v54 = vmul.f32 %v5357_v25, %v6982_v63  ;;  %v1624_v40 = vadd.f32 %v5294_v28, %v1596_v17  ;;  %v6985_v23 = vrot.slane %v5352_v2, %v4199_v38  ;;  %v1695_v27 = vmul.f32 %v1690_v56, %v6986_v61  ;;  %v7006_v8 = vld [vmem:[#allocation29_spill] sm:$0xff] }
 0x1e9   :  { %6977 = vst [vmem:[#allocation31_spill] sm:$0xff] %v5533_v13  ;;  %v1693_v13 = vmul.f32 %v1690_v56, %v6984_v39  ;;  %v6990_v58 = vrot.slane %v5355_v43, %v4273_v0  ;;  %v1649_v44 = vadd.f32 %v1645_v3, %v1621_v24  ;;  %v1650_v17 = vadd.f32 %v1646_v51, %v1622_v52 }
 0x1ea   :  { %v1694_v25 = vmul.f32 %v1690_v56, %v6985_v23  ;;  %v1651_v39 = vadd.f32 %v1647_v45, %v1623_v42  ;;  %v1906_v51 = vsel %vm344_vm2, %v1901_v50, %v5462_v19  ;;  %v6993_v45 = vld [vmem:[#allocation8_spill] sm:$0xff]  ;;  %v6994_v42 = vrot.slane %v5307_v9, %v6942_v7 }
 0x1eb   :  { %v5528_v21 = vpop.permute.xlu0 %2175  ;;  %2856 = vrot.lane.b32.xlu1 %v5006_v55, %s3978_s27  ;;  %v5591_v28 = vmul.f32 %v5309_v5, %v6990_v58  ;;  %v1697_v55 = vadd.f32 %v1693_v13, %v1650_v17  ;;  %v6992_v13 = vrot.slane %v5304_v14, %v6942_v7  ;;  %v6996_v58 = vrot.slane %v5355_v43, %v6942_v7 }
 0x1ec   :  { %6976 = vst [vmem:[#allocation30_spill] sm:$0xff] %v5528_v21  ;;  %v5540_v4 = vpop.permute.xlu1 %1932  ;;  %v6983_v21 = vrot.slane %v5304_v14, %v4199_v38  ;;  %v1698_v24 = vadd.f32 %v1694_v25, %v1651_v39  ;;  %v6995_v25 = vrot.slane %v5352_v2, %v6942_v7  ;;  %v7002_v39 = vld [vmem:[#allocation13_spill] sm:$0xff] }
 0x1ed   :  { %v5616_v52 = vmul.f32 %v6993_v45, %v6992_v13 }
 0x1ee   :  { %v1692_v62 = vmul.f32 %v1690_v56, %v6983_v21  ;;  %v6989_v21 = vrot.slane %v5352_v2, %v4273_v0  ;;  %v1652_v56 = vadd.f32 %v1648_v54, %v1624_v40  ;;  %v1904_v54 = vsel %vm344_vm2, %v5462_v19, %v1901_v50  ;;  %v6998_v50 = vld [vmem:[#allocation7_spill] sm:$0xff] }
 0x1ef   :  { %v5578_v11 = vpop.permute.xlu0 %2613  ;;  %2888 = vperm.xlu1 %3912, %v6988_v49   ;;  %v5622_v40 = vmul.f32 %v6993_v45, %v6994_v42  ;;  %v5649_v13 = vmul.f32 %v1904_v54, %v4304_v22  ;;  %v1726_v22 = vadd.f32 %v5457_v53, %v1698_v24  ;;  %v5670_v19 = vmul.f32 %v7002_v39, %v2122_v46 }
 0x1f0   :  { %6987 = vst [vmem:[#allocation33_spill] sm:$0xff] %v5578_v11  ;;  %v5585_v63 = vmul.f32 %v5309_v5, %v6989_v21  ;;  %v1696_v21 = vadd.f32 %v1692_v62, %v1649_v44  ;;  %v1699_v3 = vadd.f32 %v1695_v27, %v1652_v56  ;;  %v5633_v27 = vmul.f32 %v6993_v45, %v6995_v25 }
 0x1f1   :  { %v5597_v11 = vpop.permute.xlu1 %1988  ;;  %v5639_v44 = vmul.f32 %v6993_v45, %v6996_v58  ;;  %v5646_v56 = vmul.f32 %v1906_v51, %v4294_v15  ;;  %v6997_v25 = vrot.slane %v5451_v20, %v4208_v41  ;;  %v7000_v58 = vrot.slane %v5454_v33, %v4208_v41  ;;  %7003 = vst [vmem:[#allocation13_spill] sm:$0xff] %v5670_v19 }
 0x1f2   :  { %v1724_v15 = vadd.f32 %v5442_v57, %v1696_v21  ;;  %v1725_v51 = vadd.f32 %v5445_v35, %v1697_v55  ;;  %v1727_v54 = vadd.f32 %v5460_v6, %v1699_v3  ;;  %v7005_v5 = vrot.slane %v5304_v14, %v4477_v30 }
 0x1f3   :  { %3914 = vset.pattern.permute.xlu1 %v6958_v18  ;;  %v5610_v62 = vpop.permute.xlu0 %2645  ;;  %v5657_v45 = vmul.f32 %v6998_v50, %v6997_v25  ;;  %v5663_v17 = vmul.f32 %v6998_v50, %v7000_v58  ;;  %v5673_v25 = vmul.f32 %v7002_v39, %v2126_v16  ;;  %v7007_v57 = vrot.slane %v5307_v9, %v4477_v30 }
 0x1f4   :  { %6991 = vst [vmem:[#allocation27_spill] sm:$0xff] %v5610_v62  ;;  %2944 = vperm.xlu1 %3914, %v6988_v49   ;;  %v5679_v58 = vmul.f32 %v7006_v8, %v7005_v5  ;;  %v7008_v35 = vrot.slane %v5304_v14, %v4261_v60  ;;  %v7009_v46 = vrot.slane %v5307_v9, %v4261_v60 }
 0x1f5   :  { %6999 = vst [vmem:[#allocation8_spill] sm:$0xff] %v5657_v45  ;;  %7001 = vst [vmem:[#allocation7_spill] sm:$0xff] %v5663_v17  ;;  %v5685_v55 = vmul.f32 %v7006_v8, %v7007_v57  ;;  %v7010_v21 = vrot.slane %v5352_v2, %v4261_v60  ;;  %v7011_v24 = vrot.slane %v5355_v43, %v4261_v60  ;;  %v7019_v45 = vmov 6  }
 0x1f6   :  { %v5651_v42 = vpop.permute.xlu1 %2016  ;;  %7004 = vst [vmem:[#allocation34_spill] sm:$0xff] %v5673_v25  ;;  %v7012_v57 = vrot.slane %v5352_v2, %v4477_v30  ;;  %v1753_v23 = vadd.f32 %v5508_v48, %v1725_v51  ;;  %v1754_v62 = vadd.f32 %v5511_v1, %v1726_v22  ;;  %v7015_v25 = vrot.slane %v5454_v33, %v4199_v38 }
 0x1f7   :  { %v1974_v48 = vrot.slane %v5646_v56, %v4258_v59  ;;  %v1978_v1 = vrot.slane %v5649_v13, %v4258_v59 }
 0x1f8   :  { %v1774_v53 = vpop.permute.xlu0 %1773  ;;  %3915 = vset.pattern.permute.xlu1 %v6933_v47  ;;  %v5705_v61 = vmul.f32 %v7006_v8, %v7012_v57  ;;  %v1755_v57 = vadd.f32 %v5514_v37, %v1727_v54  ;;  %v5733_v19 = vmul.f32 %v5540_v4, %v7015_v25  ;;  %v7017_v54 = vmov 5  }
 0x1f9   :  { %v1776_v6 = vmul.f32 %v1774_v53, %v7008_v35  ;;  %v1777_v16 = vmul.f32 %v1774_v53, %v7009_v46  ;;  %v1778_v5 = vmul.f32 %v1774_v53, %v7010_v21  ;;  %v1779_v3 = vmul.f32 %v1774_v53, %v7011_v24  ;;  %2972 = vperm.xlu1 %3915, %v6988_v49  }
 0x1fa   :  { %v7013_v35 = vrot.slane %v5355_v43, %v4477_v30  ;;  %v1917_v21 = vrot.slane %v5646_v56, %v4199_v38  ;;  %v1921_v53 = vrot.slane %v5649_v13, %v4199_v38  ;;  %v1752_v24 = vadd.f32 %v5502_v34, %v1724_v15 }
 0x1fb   :  { %v5721_v18 = vpop.permute.xlu1 %2072  ;;  %v1781_v15 = vadd.f32 %v1777_v16, %v1753_v23  ;;  %v1782_v51 = vadd.f32 %v1778_v5, %v1754_v62  ;;  %v1783_v22 = vadd.f32 %v1779_v3, %v1755_v57  ;;  %v2002_v47 = vrot.slane %v5646_v56, %v4261_v60 }
 0x1fc   :  { %v5711_v46 = vmul.f32 %v7006_v8, %v7013_v35  ;;  %v7014_v8 = vrot.slane %v5451_v20, %v4199_v38  ;;  %v5739_v34 = vpop.permute.xlu0 %2259  ;;  %v1780_v37 = vadd.f32 %v1776_v6, %v1752_v24  ;;  %v5746_v25 = vmul.f32 %v5540_v4, %v1921_v53 }
 0x1fd   :  { %7016 = vst [vmem:[#allocation29_spill] sm:$0xff] %v5739_v34  ;;  %3917 = vset.pattern.permute.xlu1 %v7017_v54  ;;  %v2006_v38 = vrot.slane %v5649_v13, %v4261_v60  ;;  %v2058_v23 = vrot.slane %v5646_v56, %v6942_v7  ;;  %v2062_v62 = vrot.slane %v5649_v13, %v6942_v7 }
 0x1fe   :  { %v5727_v35 = vmul.f32 %v5540_v4, %v7014_v8  ;;  %v5743_v8 = vmul.f32 %v5540_v4, %v1917_v21  ;;  %3028 = vperm.xlu1 %3917, %v6988_v49   ;;  %v1946_v6 = vrot.slane %v5646_v56, %v4208_v41  ;;  %v1950_v4 = vrot.slane %v5649_v13, %v4208_v41 }
 0x1ff   :  { %v2030_v3 = vrot.slane %v5646_v56, %v4273_v0  ;;  %v2034_v21 = vrot.slane %v5649_v13, %v4273_v0  ;;  %v2114_v53 = vrot.slane %v5646_v56, %v4477_v30  ;;  %v2118_v24 = vrot.slane %v5649_v13, %v4477_v30 }
 0x200   :  { %v5761_v16 = vpop.permute.xlu0 %2729  ;;  %v5763_v5 = vpop.permute.xlu1 %2100  ;;  %v1808_v57 = vadd.f32 %v5546_v29, %v1780_v37  ;;  %v1809_v54 = vadd.f32 %v5552_v31, %v1781_v15  ;;  %v1811_v34 = vadd.f32 %v5591_v28, %v1783_v22  ;;  %v5778_v41 = vmul.f32 %v5597_v11, %v1974_v48 }
 0x201   :  { %7018 = vst [vmem:[#allocation35_spill] sm:$0xff] %v5761_v16  ;;  %v1810_v16 = vadd.f32 %v5585_v63, %v1782_v51  ;;  %v5781_v17 = vmul.f32 %v5597_v11, %v1978_v1  ;;  %v2086_v0 = vrot.slane %v5646_v56, %v4466_v26  ;;  %v2090_v30 = vrot.slane %v5649_v13, %v4466_v26 }
 0x202   :  { %3918 = vset.pattern.permute.xlu1 %v7019_v45  ;;  %v7020_v29 = vrot.slane %v5451_v20, %v4258_v59  ;;  %v7021_v63 = vrot.slane %v5454_v33, %v4258_v59  ;;  %v1963_v56 = vmul.f32 %v6998_v50, %v1946_v6  ;;  %v1964_v13 = vmul.f32 %v6998_v50, %v1950_v4 }
 0x203   :  { %3056 = vperm.xlu1 %3918, %v6988_v49   ;;  %v5804_v48 = vmul.f32 %v5296_v32, %v2030_v3  ;;  %v5807_v1 = vmul.f32 %v5296_v32, %v2034_v21  ;;  %v5810_v15 = vmul.f32 %v7002_v39, %v2114_v53  ;;  %v5813_v51 = vmul.f32 %v7002_v39, %v2118_v24 }
 0x204   :  { %v5792_v31 = vmul.f32 %v5597_v11, %v7020_v29  ;;  %v5798_v28 = vmul.f32 %v5597_v11, %v7021_v63  ;;  %v2140_v37 = vpop.permute.xlu1 %2139  ;;  %v1836_v11 = vadd.f32 %v5616_v52, %v1808_v57  ;;  %v1837_v49 = vadd.f32 %v5622_v40, %v1809_v54  ;;  %v7028_v57 = vld [vmem:[#allocation28_spill] sm:$0xff] }
 0x205   :  { %v1838_v22 = vadd.f32 %v5633_v27, %v1810_v16  ;;  %v1839_v50 = vadd.f32 %v5639_v44, %v1811_v34  ;;  %v1858_v6 = vpop.permute.xlu0 %1857  ;;  %v7022_v32 = vrot.slane %v5304_v14, %v4466_v26  ;;  %v7023_v3 = vrot.slane %v5307_v9, %v4466_v26 }
 0x206   :  { %v7024_v39 = vrot.slane %v5352_v2, %v4466_v26  ;;  %v7025_v52 = vrot.slane %v5355_v43, %v4466_v26  ;;  %v2019_v27 = vmul.f32 %v5651_v42, %v2002_v47  ;;  %v2020_v44 = vmul.f32 %v5651_v42, %v2006_v38 }
 0x207   :  { %v1860_v4 = vmul.f32 %v1858_v6, %v7022_v32  ;;  %v1861_v21 = vmul.f32 %v1858_v6, %v7023_v3  ;;  %v7026_v14 = vrot.slane %v5451_v20, %v4261_v60  ;;  %v7027_v9 = vrot.slane %v5454_v33, %v4261_v60  ;;  %3919 = vset.pattern.permute.xlu1 %v6959_v10 }
 0x208   :  { %v1862_v53 = vmul.f32 %v1858_v6, %v7024_v39  ;;  %v1863_v40 = vmul.f32 %v1858_v6, %v7025_v52  ;;  %3131 = vperm.xlu1 %3919, %v7028_v57   ;;  %v2142_v47 = vpop.permute.xlu1 %2141  ;;  %v2075_v38 = vmul.f32 %v5721_v18, %v2058_v23  ;;  %v2076_v29 = vmul.f32 %v5721_v18, %v2062_v62 }
 0x209   :  { %v2021_v34 = vmul.f32 %v5651_v42, %v7026_v14  ;;  %v2022_v54 = vmul.f32 %v5651_v42, %v7027_v9  ;;  %v1864_v2 = vadd.f32 %v1860_v4, %v1836_v11  ;;  %v1865_v16 = vadd.f32 %v1861_v21, %v1837_v49  ;;  %v7031_v4 = vld [vmem:[#allocation23_spill] sm:$0xff] }
 0x20a   :  { %v1866_v43 = vadd.f32 %v1862_v53, %v1838_v22  ;;  %v1867_v24 = vadd.f32 %v1863_v40, %v1839_v50  ;;  %v2147_v63 = vsel %vm489_vm3, %v2140_v37, %v5481_v12  ;;  %v2149_v42 = vsel %vm489_vm3, %v5481_v12, %v2140_v37  ;;  %v7032_v21 = vld [vmem:[#allocation19_spill] sm:$0xff] }
 0x20b   :  { %v1892_v11 = vadd.f32 %v5679_v58, %v1864_v2  ;;  %v1893_v49 = vadd.f32 %v5685_v55, %v1865_v16  ;;  %v7029_v23 = vrot.slane %v5451_v20, %v6942_v7  ;;  %v7030_v6 = vrot.slane %v5454_v33, %v6942_v7  ;;  %v7036_v40 = vld [vmem:[#allocation7_spill] sm:$0xff] }
 0x20c   :  { %v1894_v22 = vadd.f32 %v5705_v61, %v1866_v43  ;;  %v1895_v50 = vadd.f32 %v5711_v46, %v1867_v24  ;;  %v2103_v12 = vmul.f32 %v5763_v5, %v2086_v0  ;;  %v2104_v58 = vmul.f32 %v5763_v5, %v2090_v30  ;;  %3095 = vrot.lane.b32.xlu1 %v7031_v4, %s3979_s30  ;;  %v2146_v3 = vpop.permute.xlu1 %2145 }
 0x20d   :  { %v2077_v62 = vmul.f32 %v5721_v18, %v7029_v23  ;;  %v2078_v32 = vmul.f32 %v5721_v18, %v7030_v6  ;;  %v1939_v55 = vadd.f32 %v5743_v8, %v1892_v11  ;;  %v1940_v61 = vadd.f32 %v5746_v25, %v1893_v49  ;;  %v7033_v18 = vld [vmem:[#allocation20_spill] sm:$0xff]  ;;  %v5904_v11 = vpop.permute.xlu0 %2343  ;;  %v7041_v6 = vld [vmem:[#allocation5_spill] sm:$0xff] }
 0x20e   :  { %v1941_v46 = vadd.f32 %v5727_v35, %v1894_v22  ;;  %v1942_v37 = vadd.f32 %v5733_v19, %v1895_v50  ;;  %v5872_v39 = vmul.f32 %v2149_v42, %v7032_v21  ;;  %v5875_v53 = vmul.f32 %v2147_v63, %v7033_v18  ;;  %v7035_v25 = vld [vmem:[#allocation8_spill] sm:$0xff]  ;;  %v7039_v42 = vld [vmem:[#allocation25_spill] sm:$0xff] }
 0x20f   :  { %v2148_v0 = vsel %vm489_vm3, %v2142_v47, %v2146_v3  ;;  %v2150_v30 = vsel %vm489_vm3, %v2146_v3, %v2142_v47  ;;  %v7034_v8 = vmov 1   ;;  %v1967_v35 = vadd.f32 %v1963_v56, %v1939_v55 }
 0x210   :  { %3920 = vset.pattern.permute.xlu1 %v7034_v8  ;;  %v1968_v19 = vadd.f32 %v1964_v13, %v1940_v61  ;;  %v1969_v52 = vadd.f32 %v7035_v25, %v1941_v46  ;;  %v1970_v14 = vadd.f32 %v7036_v40, %v1942_v37  ;;  %v7037_v9 = vrot.slane %v5451_v20, %v4466_v26 }
 0x211   :  { %v7038_v16 = vrot.slane %v5454_v33, %v4466_v26  ;;  %v5893_v24 = vmul.f32 %v2150_v30, %v7032_v21  ;;  %v5896_v56 = vmul.f32 %v2148_v0, %v7033_v18  ;;  %v1995_v13 = vadd.f32 %v5778_v41, %v1967_v35  ;;  %3099 = vrot.lane.b32.xlu1 %v7039_v42, %s3979_s30  ;;  %v2204_v33 = vpop.permute.xlu1 %2203  ;;  %v7042_v18 = vld [vmem:[#allocation31_spill] sm:$0xff]  ;;  %v7043_v30 = vld [vmem:[#allocation32_spill] sm:$0xff] }
 0x212   :  { %v2105_v2 = vmul.f32 %v5763_v5, %v7037_v9  ;;  %v1996_v47 = vadd.f32 %v5781_v17, %v1968_v19  ;;  %v1997_v63 = vadd.f32 %v5792_v31, %v1969_v52  ;;  %v1998_v20 = vadd.f32 %v5798_v28, %v1970_v14  ;;  %v7044_v14 = vld [vmem:[#allocation30_spill] sm:$0xff] }
 0x213   :  { %v2106_v43 = vmul.f32 %v5763_v5, %v7038_v16  ;;  %v7040_v5 = vld [vmem:[#allocation6_spill] sm:$0xff]  ;;  %v2023_v31 = vadd.f32 %v2019_v27, %v1995_v13  ;;  %v2160_v55 = vrot.slane %v5872_v39, %v7041_v6  ;;  %v2164_v61 = vrot.slane %v5875_v53, %v7041_v6 }
 0x214   :  { %v2189_v49 = vrot.slane %v5872_v39, %v7040_v5  ;;  %v2193_v22 = vrot.slane %v5875_v53, %v7040_v5  ;;  %v2197_v41 = vrot.slane %v5893_v24, %v7040_v5  ;;  %v2201_v17 = vrot.slane %v5896_v56, %v7040_v5 }
 0x215   :  { %v2024_v28 = vadd.f32 %v2020_v44, %v1996_v47  ;;  %v2025_v50 = vadd.f32 %v2021_v34, %v1997_v63  ;;  %v2026_v23 = vadd.f32 %v2022_v54, %v1998_v20  ;;  %v2051_v3 = vadd.f32 %v5804_v48, %v2023_v31  ;;  %3159 = vperm.xlu1 %3920, %v7028_v57   ;;  %v2232_v19 = vpop.permute.xlu1 %2231 }
 0x216   :  { %v2206_v46 = vmul.f32 %v2204_v33, %v2189_v49  ;;  %v2207_v37 = vmul.f32 %v2204_v33, %v2193_v22  ;;  %v2168_v27 = vrot.slane %v5893_v24, %v7041_v6  ;;  %v2172_v44 = vrot.slane %v5896_v56, %v7041_v6 }
 0x217   :  { %v2052_v21 = vadd.f32 %v5807_v1, %v2024_v28  ;;  %v2053_v0 = vadd.f32 %v7042_v18, %v2025_v50  ;;  %v2054_v35 = vadd.f32 %v7043_v30, %v2026_v23  ;;  %v2208_v34 = vmul.f32 %v2204_v33, %v2197_v41  ;;  %v5927_v1 = vpop.permute.xlu0 %2813 }
 0x218   :  { %v2209_v54 = vmul.f32 %v2204_v33, %v2201_v17  ;;  %v2079_v25 = vadd.f32 %v2075_v38, %v2051_v3  ;;  %v2178_v9 = vmul.f32 %v7044_v14, %v2160_v55  ;;  %v2179_v16 = vmul.f32 %v7044_v14, %v2164_v61 }
 0x219   :  { %v2080_v52 = vadd.f32 %v2076_v29, %v2052_v21  ;;  %v2081_v48 = vadd.f32 %v2077_v62, %v2053_v0  ;;  %v2082_v40 = vadd.f32 %v2078_v32, %v2054_v35  ;;  %v2217_v13 = vrot.slane %v5872_v39, %v4258_v59 }
 0x21a   :  { %v2221_v47 = vrot.slane %v5875_v53, %v4258_v59  ;;  %v2107_v63 = vadd.f32 %v2103_v12, %v2079_v25  ;;  %v7045_v38 = vmov 3   ;;  %v2180_v29 = vmul.f32 %v7044_v14, %v2168_v27  ;;  %v2288_v31 = vpop.permute.xlu1 %2287 }
 0x21b   :  { %v2108_v20 = vadd.f32 %v2104_v58, %v2080_v52  ;;  %v2109_v33 = vadd.f32 %v2105_v2, %v2081_v48  ;;  %v2110_v49 = vadd.f32 %v2106_v43, %v2082_v40  ;;  %3922 = vset.pattern.permute.xlu1 %v7045_v38  ;;  %v2181_v62 = vmul.f32 %v7044_v14, %v2172_v44  ;;  %v7046_v58 = vld [vmem:[#allocation13_spill] sm:$0xff]  ;;  %v7047_v43 = vld [vmem:[#allocation34_spill] sm:$0xff]  ;;  %v5955_v21 = vpop.permute.xlu0 %2430 }
 0x21c   :  { %v2225_v32 = vrot.slane %v5893_v24, %v4258_v59  ;;  %v2229_v22 = vrot.slane %v5896_v56, %v4258_v59  ;;  %3215 = vperm.xlu1 %3922, %v7028_v57   ;;  %v2135_v41 = vadd.f32 %v5810_v15, %v2107_v63  ;;  %v2245_v28 = vrot.slane %v5872_v39, %v4261_v60  ;;  %v7049_v40 = vld [vmem:[#allocation29_spill] sm:$0xff] }
 0x21d   :  { %v2136_v12 = vadd.f32 %v5813_v51, %v2108_v20  ;;  %v2137_v2 = vadd.f32 %v7046_v58, %v2109_v33  ;;  %v2138_v17 = vadd.f32 %v7047_v43, %v2110_v49  ;;  %v2249_v50 = vrot.slane %v5875_v53, %v4261_v60  ;;  %v7050_v49 = vld [vmem:[#allocation11_spill] sm:$0xff] }
 0x21e   :  { %v2253_v23 = vrot.slane %v5893_v24, %v4261_v60  ;;  %v2257_v55 = vrot.slane %v5896_v56, %v4261_v60  ;;  %v2182_v15 = vadd.f32 %v2178_v9, %v2135_v41  ;;  %v2234_v18 = vmul.f32 %v2232_v19, %v2217_v13 }
 0x21f   :  { %v2183_v61 = vadd.f32 %v2179_v16, %v2136_v12  ;;  %v2184_v51 = vadd.f32 %v2180_v29, %v2137_v2  ;;  %v2185_v3 = vadd.f32 %v2181_v62, %v2138_v17  ;;  %v2235_v0 = vmul.f32 %v2232_v19, %v2221_v47  ;;  %v2316_v13 = vpop.permute.xlu1 %2315  ;;  %v5972_v41 = vpop.permute.xlu0 %2854 }
 0x220   :  { %v2236_v30 = vmul.f32 %v2232_v19, %v2225_v32  ;;  %v2237_v35 = vmul.f32 %v2232_v19, %v2229_v22  ;;  %v7048_v27 = vmov 4   ;;  %v2210_v44 = vadd.f32 %v2206_v46, %v2182_v15 }
 0x221   :  { %3923 = vset.pattern.permute.xlu1 %v7048_v27  ;;  %v2211_v25 = vadd.f32 %v2207_v37, %v2183_v61  ;;  %v2212_v52 = vadd.f32 %v2208_v34, %v2184_v51  ;;  %v2213_v48 = vadd.f32 %v2209_v54, %v2185_v3  ;;  %v2262_v14 = vmul.f32 %v7049_v40, %v2245_v28 }
 0x222   :  { %3243 = vperm.xlu1 %3923, %v7028_v57   ;;  %v2263_v9 = vmul.f32 %v7049_v40, %v2249_v50  ;;  %v2264_v16 = vmul.f32 %v7049_v40, %v2253_v23  ;;  %v2265_v63 = vmul.f32 %v7049_v40, %v2257_v55  ;;  %v2238_v47 = vadd.f32 %v2234_v18, %v2210_v44 }
 0x223   :  { %v2239_v20 = vadd.f32 %v2235_v0, %v2211_v25  ;;  %v2240_v19 = vadd.f32 %v2236_v30, %v2212_v52  ;;  %v2241_v33 = vadd.f32 %v2237_v35, %v2213_v48  ;;  %v2273_v46 = vrot.slane %v5872_v39, %v7050_v49  ;;  %v7051_v0 = vld [vmem:[#allocation24_spill] sm:$0xff]  ;;  %v7052_v35 = vld [vmem:[#allocation26_spill] sm:$0xff] }
 0x224   :  { %v2277_v37 = vrot.slane %v5875_v53, %v7050_v49  ;;  %v2281_v34 = vrot.slane %v5893_v24, %v7050_v49  ;;  %v2285_v54 = vrot.slane %v5896_v56, %v7050_v49  ;;  %v2266_v29 = vadd.f32 %v2262_v14, %v2238_v47  ;;  %v2372_v55 = vpop.permute.xlu1 %2371  ;;  %v5999_v47 = vpop.permute.xlu0 %2858 }
 0x225   :  { %v2267_v62 = vadd.f32 %v2263_v9, %v2239_v20  ;;  %v2268_v32 = vadd.f32 %v2264_v16, %v2240_v19  ;;  %v2269_v22 = vadd.f32 %v2265_v63, %v2241_v33  ;;  %v2290_v12 = vmul.f32 %v2288_v31, %v2273_v46 }
 0x226   :  { %3925 = vset.pattern.permute.xlu1 %v7019_v45  ;;  %v2291_v58 = vmul.f32 %v2288_v31, %v2277_v37  ;;  %v2292_v2 = vmul.f32 %v2288_v31, %v2281_v34  ;;  %v2293_v43 = vmul.f32 %v2288_v31, %v2285_v54  ;;  %v2329_v17 = vrot.slane %v5872_v39, %v4466_v26 }
 0x227   :  { %3299 = vperm.xlu1 %3925, %v7028_v57   ;;  %v2333_v28 = vrot.slane %v5875_v53, %v4466_v26  ;;  %v2301_v50 = vrot.slane %v5872_v39, %v6942_v7  ;;  %v2305_v23 = vrot.slane %v5875_v53, %v6942_v7  ;;  %v2294_v15 = vadd.f32 %v2290_v12, %v2266_v29  ;;  %v7054_v29 = vld [vmem:[#allocation18_spill] sm:$0xff] }
 0x228   :  { %v2295_v61 = vadd.f32 %v2291_v58, %v2267_v62  ;;  %v2296_v51 = vadd.f32 %v2292_v2, %v2268_v32  ;;  %v2297_v3 = vadd.f32 %v2293_v43, %v2269_v22  ;;  %v2309_v31 = vrot.slane %v5893_v24, %v6942_v7 }
 0x229   :  { %v2313_v18 = vrot.slane %v5896_v56, %v6942_v7  ;;  %v2395_v30 = vrot.slane %v7051_v0, %v7041_v6  ;;  %v2399_v27 = vrot.slane %v7052_v35, %v7041_v6  ;;  %v2318_v44 = vmul.f32 %v2316_v13, %v2301_v50  ;;  %v2403_v37 = vpop.permute.xlu1 %2402 }
 0x22a   :  { %v2319_v25 = vmul.f32 %v2316_v13, %v2305_v23  ;;  %v7053_v52 = vmov 7   ;;  %v2444_v48 = vrot.slane %v7031_v4, %v4258_v59  ;;  %v2448_v40 = vrot.slane %v7039_v42, %v4258_v59 }
 0x22b   :  { %3926 = vset.pattern.permute.xlu1 %v7053_v52  ;;  %v2346_v14 = vmul.f32 %v5904_v11, %v2329_v17  ;;  %v2347_v9 = vmul.f32 %v5904_v11, %v2333_v28  ;;  %v2320_v16 = vmul.f32 %v2316_v13, %v2309_v31  ;;  %v2321_v63 = vmul.f32 %v2316_v13, %v2313_v18 }
 0x22c   :  { %3327 = vperm.xlu1 %3926, %v7028_v57   ;;  %v2322_v20 = vadd.f32 %v2318_v44, %v2294_v15  ;;  %v2323_v19 = vadd.f32 %v2319_v25, %v2295_v61  ;;  %v2337_v33 = vrot.slane %v5893_v24, %v4466_v26  ;;  %v2341_v46 = vrot.slane %v5896_v56, %v4466_v26 }
 0x22d   :  { %v2324_v34 = vadd.f32 %v2320_v16, %v2296_v51  ;;  %v2325_v54 = vadd.f32 %v2321_v63, %v2297_v3  ;;  %v2357_v62 = vrot.slane %v5872_v39, %v7054_v29  ;;  %v2361_v13 = vrot.slane %v5875_v53, %v7054_v29  ;;  %v6022_v51 = vpop.permute.xlu0 %2916 }
 0x22e   :  { %v2348_v57 = vmul.f32 %v5904_v11, %v2337_v33  ;;  %v2349_v32 = vmul.f32 %v5904_v11, %v2341_v46  ;;  %v2350_v22 = vadd.f32 %v2346_v14, %v2322_v20  ;;  %v2351_v12 = vadd.f32 %v2347_v9, %v2323_v19 }
 0x22f   :  { %v2365_v58 = vrot.slane %v5893_v24, %v7054_v29  ;;  %v2369_v2 = vrot.slane %v5896_v56, %v7054_v29  ;;  %v2374_v43 = vmul.f32 %v2372_v55, %v2357_v62  ;;  %v2375_v17 = vmul.f32 %v2372_v55, %v2361_v13  ;;  %v2459_v56 = vpop.permute.xlu1 %2458 }
 0x230   :  { %3338 = vrot.lane.b32.xlu1 %v7031_v4, %s3980_s5  ;;  %v2352_v39 = vadd.f32 %v2348_v57, %v2324_v34  ;;  %v2353_v28 = vadd.f32 %v2349_v32, %v2325_v54  ;;  %v2452_v53 = vrot.slane %v7051_v0, %v4258_v59  ;;  %v2456_v11 = vrot.slane %v7052_v35, %v4258_v59 }
 0x231   :  { %v7055_v50 = vmov 2   ;;  %v2376_v23 = vmul.f32 %v2372_v55, %v2365_v58  ;;  %v2377_v24 = vmul.f32 %v2372_v55, %v2369_v2  ;;  %v2378_v15 = vadd.f32 %v2374_v43, %v2350_v22 }
 0x232   :  { %3928 = vset.pattern.permute.xlu1 %v7055_v50  ;;  %v2379_v61 = vadd.f32 %v2375_v17, %v2351_v12  ;;  %v7056_v3 = vrot.slane %v7031_v4, %v7041_v6  ;;  %v7057_v18 = vrot.slane %v7039_v42, %v7041_v6  ;;  %v2472_v25 = vrot.slane %v7031_v4, %v4261_v60  ;;  %v2515_v50 = vpop.permute.xlu0 %2514 }
 0x233   :  { %v2476_v14 = vrot.slane %v7039_v42, %v4261_v60  ;;  %v2380_v55 = vadd.f32 %v2376_v23, %v2352_v39  ;;  %v2381_v9 = vadd.f32 %v2377_v24, %v2353_v28  ;;  %v2407_v16 = vmul.f32 %v2403_v37, %v2395_v30  ;;  %v2487_v2 = vpop.permute.xlu1 %2486 }
 0x234   :  { %v2405_v31 = vmul.f32 %v2403_v37, %v7056_v3  ;;  %v2406_v44 = vmul.f32 %v2403_v37, %v7057_v18  ;;  %v2408_v63 = vmul.f32 %v2403_v37, %v2399_v27  ;;  %3340 = vrot.lane.b32.xlu1 %v7051_v0, %s3980_s5  ;;  %v7058_v20 = vrot.slane %v7031_v4, %v7040_v5 }
 0x235   :  { %v7059_v33 = vrot.slane %v7039_v42, %v7040_v5  ;;  %v7060_v62 = vrot.slane %v7051_v0, %v7040_v5  ;;  %v7061_v27 = vrot.slane %v7052_v35, %v7040_v5  ;;  %v2411_v13 = vadd.f32 %v2407_v16, %v2380_v55 }
 0x236   :  { %v2433_v19 = vmul.f32 %v5955_v21, %v7058_v20  ;;  %v2409_v34 = vadd.f32 %v2405_v31, %v2378_v15  ;;  %v2410_v54 = vadd.f32 %v2406_v44, %v2379_v61  ;;  %v2412_v57 = vadd.f32 %v2408_v63, %v2381_v9 }
 0x237   :  { %v2434_v46 = vmul.f32 %v5955_v21, %v7059_v33  ;;  %v2435_v30 = vmul.f32 %v5955_v21, %v7060_v62  ;;  %v2436_v37 = vmul.f32 %v5955_v21, %v7061_v27  ;;  %v2461_v12 = vmul.f32 %v2459_v56, %v2444_v48 }
 0x238   :  { %v2437_v32 = vadd.f32 %v2433_v19, %v2409_v34  ;;  %v2462_v58 = vmul.f32 %v2459_v56, %v2448_v40  ;;  %v2463_v39 = vmul.f32 %v2459_v56, %v2452_v53  ;;  %v2464_v28 = vmul.f32 %v2459_v56, %v2456_v11  ;;  %3344 = vrot.lane.b32.xlu1 %v7052_v35, %s3980_s5 }
 0x239   :  { %v2438_v22 = vadd.f32 %v2434_v46, %v2410_v54  ;;  %v2439_v43 = vadd.f32 %v2435_v30, %v2411_v13  ;;  %v2440_v17 = vadd.f32 %v2436_v37, %v2412_v57  ;;  %v2480_v21 = vrot.slane %v7051_v0, %v4261_v60  ;;  %v2543_v54 = vpop.permute.xlu1 %2542 }
 0x23a   :  { %v2465_v23 = vadd.f32 %v2461_v12, %v2437_v32  ;;  %v2484_v15 = vrot.slane %v7052_v35, %v4261_v60  ;;  %v2489_v40 = vmul.f32 %v2487_v2, %v2472_v25  ;;  %v2490_v3 = vmul.f32 %v2487_v2, %v2476_v14  ;;  %v6071_v25 = vld [vmem:[%s6831_s6 + $0x40] sm:$0xff] }
 0x23b   :  { %v2466_v24 = vadd.f32 %v2462_v58, %v2438_v22  ;;  %v2467_v61 = vadd.f32 %v2463_v39, %v2439_v43  ;;  %v2468_v48 = vadd.f32 %v2464_v28, %v2440_v17  ;;  %v2491_v31 = vmul.f32 %v2487_v2, %v2480_v21 }
 0x23c   :  { %v2492_v18 = vmul.f32 %v2487_v2, %v2484_v15  ;;  %v2528_v53 = vrot.slane %v7031_v4, %v6942_v7  ;;  %v2532_v11 = vrot.slane %v7039_v42, %v6942_v7  ;;  %v7062_v56 = vrot.slane %v7031_v4, %v7050_v49  ;;  %3430 = vperm.xlu1 %3928, %v6071_v25  }
 0x23d   :  { %v7063_v55 = vrot.slane %v7039_v42, %v7050_v49  ;;  %v2493_v16 = vadd.f32 %v2489_v40, %v2465_v23  ;;  %v2494_v63 = vadd.f32 %v2490_v3, %v2466_v24  ;;  %v7064_v14 = vrot.slane %v7051_v0, %v7050_v49  ;;  %v6094_v23 = vpop.permute.xlu0 %3000  ;;  %v2571_v15 = vpop.permute.xlu1 %2570 }
 0x23e   :  { %v2517_v44 = vmul.f32 %v2515_v50, %v7062_v56  ;;  %v7065_v19 = vrot.slane %v7052_v35, %v7050_v49  ;;  %v2495_v46 = vadd.f32 %v2491_v31, %v2467_v61  ;;  %v2496_v34 = vadd.f32 %v2492_v18, %v2468_v48  ;;  %v7066_v56 = vld [vmem:[#allocation14_spill] sm:$0xff] }
 0x23f   :  { %v2518_v9 = vmul.f32 %v2515_v50, %v7063_v55  ;;  %v2519_v20 = vmul.f32 %v2515_v50, %v7064_v14  ;;  %v2536_v27 = vrot.slane %v7051_v0, %v6942_v7  ;;  %v2540_v37 = vrot.slane %v7052_v35, %v6942_v7 }
 0x240   :  { %v2520_v33 = vmul.f32 %v2515_v50, %v7065_v19  ;;  %v2521_v62 = vadd.f32 %v2517_v44, %v2493_v16  ;;  %v2545_v32 = vmul.f32 %v2543_v54, %v2528_v53  ;;  %v2546_v22 = vmul.f32 %v2543_v54, %v2532_v11  ;;  %3929 = vset.pattern.permute.xlu1 %v7045_v38 }
 0x241   :  { %v2522_v30 = vadd.f32 %v2518_v9, %v2494_v63  ;;  %v2523_v13 = vadd.f32 %v2519_v20, %v2495_v46  ;;  %v2547_v12 = vmul.f32 %v2543_v54, %v2536_v27  ;;  %v2548_v58 = vmul.f32 %v2543_v54, %v2540_v37  ;;  %3458 = vperm.xlu1 %3929, %v6071_v25   ;;  %v2610_v44 = vpop.permute.xlu1 %2609  ;;  %v6102_v55 = vpop.permute.xlu0 %2598  ;;  %v7067_v9 = vld [vmem:[#allocation33_spill] sm:$0xff] }
 0x242   :  { %v2524_v57 = vadd.f32 %v2520_v33, %v2496_v34  ;;  %v2556_v2 = vrot.slane %v7031_v4, %v4466_v26  ;;  %v2560_v43 = vrot.slane %v7039_v42, %v4466_v26  ;;  %v2549_v17 = vadd.f32 %v2545_v32, %v2521_v62  ;;  %v7069_v33 = vld [vmem:[#allocation22_spill] sm:$0xff] }
 0x243   :  { %v2550_v39 = vadd.f32 %v2546_v22, %v2522_v30  ;;  %v2564_v28 = vrot.slane %v7051_v0, %v4466_v26  ;;  %v2568_v50 = vrot.slane %v7052_v35, %v4466_v26  ;;  %v2551_v24 = vadd.f32 %v2547_v12, %v2523_v13  ;;  %v7071_v13 = vld [vmem:[#allocation27_spill] sm:$0xff] }
 0x244   :  { %v2552_v21 = vadd.f32 %v2548_v58, %v2524_v57  ;;  %v2573_v61 = vmul.f32 %v2571_v15, %v2556_v2  ;;  %v2574_v48 = vmul.f32 %v2571_v15, %v2560_v43  ;;  %v2617_v16 = vsel %vm829_vm4, %v2610_v44, %v7067_v9 }
 0x245   :  { %v2575_v40 = vmul.f32 %v2571_v15, %v2564_v28  ;;  %v2576_v3 = vmul.f32 %v2571_v15, %v2568_v50  ;;  %3932 = vset.pattern.permute.xlu1 %v6959_v10  ;;  %v2619_v63 = vsel %vm829_vm4, %v7067_v9, %v2610_v44  ;;  %v2584_v14 = vrot.slane %v7031_v4, %v7054_v29  ;;  %v7068_v10 = vld [vmem:[#allocation21_spill] sm:$0xff]  ;;  %v2612_v54 = vpop.permute.xlu1 %2611 }
 0x246   :  { %v2577_v31 = vadd.f32 %v2573_v61, %v2549_v17  ;;  %v2578_v18 = vadd.f32 %v2574_v48, %v2550_v39  ;;  %3628 = vperm.xlu1 %3932, %v7066_v56   ;;  %v2588_v20 = vrot.slane %v7039_v42, %v7054_v29  ;;  %v6115_v19 = vmul.f32 %v2617_v16, %v7068_v10 }
 0x247   :  { %v6096_v53 = vadd.f32 %v2575_v40, %v2551_v24  ;;  %v6098_v11 = vadd.f32 %v2576_v3, %v2552_v21  ;;  %v6118_v46 = vmul.f32 %v2619_v63, %v7069_v33  ;;  %v7070_v34 = vmov 5  }
 0x248   :  { %v2601_v62 = vmul.f32 %v6102_v55, %v2584_v14  ;;  %v2602_v30 = vmul.f32 %v6102_v55, %v2588_v20  ;;  %v2630_v4 = vrot.slane %v6115_v19, %v7041_v6  ;;  %v2659_v2 = vrot.slane %v6115_v19, %v7040_v5 }
 0x249   :  { %v2634_v42 = vrot.slane %v6118_v46, %v7041_v6  ;;  %v2616_v22 = vpop.permute.xlu1 %2615  ;;  %v2663_v43 = vrot.slane %v6118_v46, %v7040_v5  ;;  %v2687_v24 = vrot.slane %v6115_v19, %v4258_v59  ;;  %v2691_v21 = vrot.slane %v6118_v46, %v4258_v59 }
 0x24a   :  { %3933 = vset.pattern.permute.xlu1 %v7070_v34  ;;  %v2605_v27 = vadd.f32 %v2601_v62, %v2577_v31  ;;  %v2606_v37 = vadd.f32 %v2602_v30, %v2578_v18  ;;  %v2648_v57 = vmul.f32 %v7071_v13, %v2630_v4  ;;  %v2715_v15 = vrot.slane %v6115_v19, %v4261_v60  ;;  %v7072_v18 = vld [vmem:[#allocation35_spill] sm:$0xff]  ;;  %v3942_v30 = vld [vmem:[%s6827_s2] sm:$0xff] }
 0x24b   :  { %3514 = vperm.xlu1 %3933, %v6071_v25   ;;  %v2649_v32 = vmul.f32 %v7071_v13, %v2634_v42  ;;  %v2719_v61 = vrot.slane %v6118_v46, %v4261_v60  ;;  %v2743_v9 = vrot.slane %v6115_v19, %v7050_v49  ;;  %v2747_v16 = vrot.slane %v6118_v46, %v7050_v49 }
 0x24c   :  { %v2652_v12 = vadd.f32 %v2648_v57, %v2605_v27  ;;  %v2771_v4 = vrot.slane %v6115_v19, %v6942_v7  ;;  %v2775_v42 = vrot.slane %v6118_v46, %v6942_v7  ;;  %v2618_v27 = vsel %vm829_vm4, %v2612_v54, %v2616_v22 }
 0x24d   :  { %v2653_v58 = vadd.f32 %v2649_v32, %v2606_v37  ;;  %v6136_v17 = vpop.permute.xlu1 %2673  ;;  %v2733_v44 = vmul.f32 %v7072_v18, %v2719_v61  ;;  %v2620_v37 = vsel %vm829_vm4, %v2616_v22, %v2612_v54  ;;  %v2803_v57 = vrot.slane %v6118_v46, %v4466_v26 }
 0x24e   :  { %v2676_v39 = vmul.f32 %v6136_v17, %v2659_v2  ;;  %v2677_v28 = vmul.f32 %v6136_v17, %v2663_v43  ;;  %v6187_v2 = vmul.f32 %v2618_v27, %v7068_v10  ;;  %v6190_v43 = vmul.f32 %v2620_v37, %v7069_v33 }
 0x24f   :  { %3934 = vset.pattern.permute.xlu1 %v7034_v8 }
 0x250   :  { %3676 = vperm.xlu1 %3934, %v7066_v56   ;;  %v2680_v50 = vadd.f32 %v2676_v39, %v2652_v12  ;;  %v2681_v8 = vadd.f32 %v2677_v28, %v2653_v58  ;;  %v2732_v56 = vmul.f32 %v7072_v18, %v2715_v15  ;;  %v2817_v28 = vmul.f32 %v5927_v1, %v2803_v57 }
 0x251   :  { %v2638_v61 = vrot.slane %v6187_v2, %v7041_v6  ;;  %v2723_v37 = vrot.slane %v6187_v2, %v4261_v60 }
 0x252   :  { %v6150_v48 = vpop.permute.xlu1 %2701 }
 0x253   :  { %v2705_v40 = vmul.f32 %v6150_v48, %v2691_v21 }
 0x254   :  { %3935 = vset.pattern.permute.xlu1 %v7019_v45  ;;  %v2704_v45 = vmul.f32 %v6150_v48, %v2687_v24 }
 0x255   :  { %3542 = vperm.xlu1 %3935, %v6071_v25   ;;  %v2709_v31 = vadd.f32 %v2705_v40, %v2681_v8  ;;  %v2831_v8 = vrot.slane %v6118_v46, %v7054_v29  ;;  %v2592_v46 = vrot.slane %v7051_v0, %v7054_v29  ;;  %v2671_v0 = vrot.slane %v6190_v43, %v7040_v5 }
 0x256   :  { %v2708_v3 = vadd.f32 %v2704_v45, %v2680_v50  ;;  %v2827_v50 = vrot.slane %v6115_v19, %v7054_v29  ;;  %v2642_v45 = vrot.slane %v6190_v43, %v7041_v6 }
 0x257   :  { %v2737_v14 = vadd.f32 %v2733_v44, %v2709_v31  ;;  %v6162_v20 = vpop.permute.xlu1 %2757 }
 0x258   :  { %v2736_v63 = vadd.f32 %v2732_v56, %v2708_v3  ;;  %v2761_v34 = vmul.f32 %v6162_v20, %v2747_v16  ;;  %v2596_v3 = vrot.slane %v7052_v35, %v7054_v29  ;;  %v2603_v56 = vmul.f32 %v6102_v55, %v2592_v46 }
 0x259   :  { %3937 = vset.pattern.permute.xlu1 %v7053_v52  ;;  %v2760_v52 = vmul.f32 %v6162_v20, %v2743_v9  ;;  %v2650_v9 = vmul.f32 %v7071_v13, %v2638_v61  ;;  %v2651_v16 = vmul.f32 %v7071_v13, %v2642_v45  ;;  %v2695_v13 = vrot.slane %v6187_v2, %v4258_v59 }
 0x25a   :  { %3570 = vperm.xlu1 %3937, %v6071_v25   ;;  %v2765_v62 = vadd.f32 %v2761_v34, %v2737_v14  ;;  %v2604_v44 = vmul.f32 %v6102_v55, %v2596_v3  ;;  %v2679_v55 = vmul.f32 %v6136_v17, %v2671_v0 }
 0x25b   :  { %v2764_v25 = vadd.f32 %v2760_v52, %v2736_v63  ;;  %v2607_v63 = vadd.f32 %v2603_v56, %v6096_v53  ;;  %v2667_v52 = vrot.slane %v6187_v2, %v7040_v5  ;;  %v2699_v53 = vrot.slane %v6190_v43, %v4258_v59 }
 0x25c   :  { %v6182_v32 = vpop.permute.xlu1 %2785  ;;  %v2608_v14 = vadd.f32 %v2604_v44, %v6098_v11 }
 0x25d   :  { %v2788_v12 = vmul.f32 %v6182_v32, %v2771_v4  ;;  %v2789_v58 = vmul.f32 %v6182_v32, %v2775_v42  ;;  %v2654_v34 = vadd.f32 %v2650_v9, %v2607_v63  ;;  %v2706_v42 = vmul.f32 %v6150_v48, %v2695_v13 }
 0x25e   :  { %3938 = vset.pattern.permute.xlu1 %v7045_v38  ;;  %v2799_v38 = vrot.slane %v6115_v19, %v4466_v26  ;;  %v2707_v27 = vmul.f32 %v6150_v48, %v2699_v53  ;;  %v2863_v48 = vsel %vm974_vm5, %v5999_v47, %v5972_v41 }
 0x25f   :  { %3772 = vperm.xlu1 %3938, %v3942_v30   ;;  %v2792_v39 = vadd.f32 %v2788_v12, %v2764_v25  ;;  %v2793_v54 = vadd.f32 %v2789_v58, %v2765_v62  ;;  %v2655_v25 = vadd.f32 %v2651_v16, %v2608_v14  ;;  %v2678_v62 = vmul.f32 %v6136_v17, %v2667_v52 }
 0x260   :  { %v2816_v22 = vmul.f32 %v5927_v1, %v2799_v38  ;;  %v2727_v17 = vrot.slane %v6190_v43, %v4261_v60  ;;  %v6238_v38 = vpop.permute.xlu0 %3084  ;;  %v2861_v12 = vsel %vm974_vm5, %v5972_v41, %v5999_v47  ;;  %v2779_v47 = vrot.slane %v6187_v2, %v6942_v7 }
 0x261   :  { %v2821_v21 = vadd.f32 %v2817_v28, %v2793_v54  ;;  %v2682_v30 = vadd.f32 %v2678_v62, %v2654_v34  ;;  %v2683_v4 = vadd.f32 %v2679_v55, %v2655_v25  ;;  %v2734_v54 = vmul.f32 %v7072_v18, %v2723_v37  ;;  %v7073_v28 = vld [vmem:[#allocation12_spill] sm:$0xff] }
 0x262   :  { %v2820_v24 = vadd.f32 %v2816_v22, %v2792_v39  ;;  %v6198_v15 = vpop.permute.xlu1 %2841  ;;  %v2735_v22 = vmul.f32 %v7072_v18, %v2727_v17  ;;  %v2783_v18 = vrot.slane %v6190_v43, %v6942_v7  ;;  %v2790_v9 = vmul.f32 %v6182_v32, %v2779_v47  ;;  %v7076_v47 = vld [vmem:[#allocation15_spill] sm:$0xff] }
 0x263   :  { %v2844_v10 = vmul.f32 %v6198_v15, %v2827_v50  ;;  %v2845_v33 = vmul.f32 %v6198_v15, %v2831_v8  ;;  %v2710_v58 = vadd.f32 %v2706_v42, %v2682_v30  ;;  %v2711_v39 = vadd.f32 %v2707_v27, %v2683_v4  ;;  %v7074_v8 = vld [vmem:[#allocation9_spill] sm:$0xff] }
 0x264   :  { %v6253_v50 = vmul.f32 %v2861_v12, %v7073_v28  ;;  %v3098_v45 = vpop.permute.xlu0 %3097  ;;  %v2791_v16 = vmul.f32 %v6182_v32, %v2783_v18  ;;  %v2811_v32 = vrot.slane %v6190_v43, %v4466_v26  ;;  %v2835_v37 = vrot.slane %v6187_v2, %v7054_v29 }
 0x265   :  { %v6206_v40 = vadd.f32 %v2844_v10, %v2820_v24  ;;  %v6208_v19 = vadd.f32 %v2845_v33, %v2821_v21  ;;  %v6256_v24 = vmul.f32 %v2863_v48, %v7074_v8  ;;  %v2751_v21 = vrot.slane %v6187_v2, %v7050_v49 }
 0x266   :  { %v2853_v31 = vpop.permute.xlu1 %2852  ;;  %v2755_v10 = vrot.slane %v6190_v43, %v7050_v49  ;;  %v2738_v33 = vadd.f32 %v2734_v54, %v2710_v58  ;;  %v2739_v41 = vadd.f32 %v2735_v22, %v2711_v39  ;;  %v2910_v63 = vrot.slane %v6253_v50, %v7040_v5 }
 0x267   :  { %v2762_v46 = vmul.f32 %v6162_v20, %v2751_v21  ;;  %v2914_v14 = vrot.slane %v6256_v24, %v7040_v5  ;;  %v2819_v27 = vmul.f32 %v5927_v1, %v2811_v32  ;;  %v2839_v17 = vrot.slane %v6190_v43, %v7054_v29 }
 0x268   :  { %v2763_v3 = vmul.f32 %v6162_v20, %v2755_v10  ;;  %v3102_v25 = vpop.permute.xlu0 %3101  ;;  %v2921_v13 = vmul.f32 %v6022_v51, %v2910_v63  ;;  %v2881_v58 = vrot.slane %v6253_v50, %v7041_v6  ;;  %v2885_v39 = vrot.slane %v6256_v24, %v7041_v6 }
 0x269   :  { %v2766_v0 = vadd.f32 %v2762_v46, %v2738_v33  ;;  %v2922_v53 = vmul.f32 %v6022_v51, %v2914_v14  ;;  %v3104_v12 = vsel %vm1119_vm6, %v3098_v45, %v3102_v25  ;;  %v3106_v48 = vsel %vm1119_vm6, %v3102_v25, %v3098_v45  ;;  %v7075_v33 = vld [vmem:[#allocation16_spill] sm:$0xff] }
 0x26a   :  { %v2857_v35 = vpop.permute.xlu1 %2856  ;;  %v2767_v34 = vadd.f32 %v2763_v3, %v2739_v41  ;;  %v2847_v43 = vmul.f32 %v6198_v15, %v2839_v17  ;;  %v6323_v41 = vmul.f32 %v3104_v12, %v7075_v33  ;;  %v6326_v18 = vmul.f32 %v3106_v48, %v7076_v47 }
 0x26b   :  { %v2860_v56 = vsel %vm974_vm5, %v2853_v31, %v2857_v35  ;;  %v2862_v44 = vsel %vm974_vm5, %v2857_v35, %v2853_v31  ;;  %v2807_v31 = vrot.slane %v6187_v2, %v4466_v26  ;;  %v2794_v62 = vadd.f32 %v2790_v9, %v2766_v0 }
 0x26c   :  { %v6281_v52 = vmul.f32 %v2860_v56, %v7073_v28  ;;  %v6284_v20 = vmul.f32 %v2862_v44, %v7074_v8  ;;  %v2795_v55 = vadd.f32 %v2791_v16, %v2767_v34  ;;  %v2846_v2 = vmul.f32 %v6198_v15, %v2835_v37 }
 0x26d   :  { %v2818_v42 = vmul.f32 %v5927_v1, %v2807_v31  ;;  %v2994_v28 = vrot.slane %v6253_v50, %v7050_v49  ;;  %v2998_v8 = vrot.slane %v6256_v24, %v7050_v49  ;;  %v3078_v46 = vrot.slane %v6253_v50, %v7054_v29  ;;  %v6352_v31 = vpop.permute.xlu0 %3187 }
 0x26e   :  { %v6230_v11 = vpop.permute.xlu1 %2888  ;;  %v2873_v30 = vrot.slane %v6281_v52, %v7041_v6  ;;  %v2877_v4 = vrot.slane %v6284_v20, %v7041_v6  ;;  %v2823_v22 = vadd.f32 %v2819_v27, %v2795_v55  ;;  %v3082_v3 = vrot.slane %v6256_v24, %v7054_v29 }
 0x26f   :  { %v2822_v1 = vadd.f32 %v2818_v42, %v2794_v62  ;;  %v2893_v45 = vmul.f32 %v6230_v11, %v2881_v58  ;;  %v2894_v15 = vmul.f32 %v6230_v11, %v2885_v39  ;;  %v2902_v56 = vrot.slane %v6281_v52, %v7040_v5 }
 0x270   :  { %v2891_v21 = vmul.f32 %v6230_v11, %v2873_v30  ;;  %v2892_v10 = vmul.f32 %v6230_v11, %v2877_v4  ;;  %v2906_v44 = vrot.slane %v6284_v20, %v7040_v5  ;;  %v6339_v9 = vmul.f32 %v6094_v23, %v2994_v28 }
 0x271   :  { %v6342_v16 = vmul.f32 %v6094_v23, %v2998_v8  ;;  %v2850_v63 = vadd.f32 %v2846_v2, %v2822_v1  ;;  %v2851_v11 = vadd.f32 %v2847_v43, %v2823_v22  ;;  %v6347_v0 = vmul.f32 %v6238_v38, %v3078_v46 }
 0x272   :  { %v6350_v34 = vmul.f32 %v6238_v38, %v3082_v3  ;;  %v2895_v32 = vadd.f32 %v2891_v21, %v6206_v40  ;;  %v2896_v25 = vadd.f32 %v2892_v10, %v6208_v19  ;;  %v3181_v62 = vrot.slane %v6323_v41, %v4258_v59  ;;  %v6380_v21 = vpop.permute.xlu0 %3271 }
 0x273   :  { %v6240_v57 = vpop.permute.xlu1 %2944  ;;  %v3185_v55 = vrot.slane %v6326_v18, %v4258_v59  ;;  %v2897_v30 = vadd.f32 %v2893_v45, %v2850_v63  ;;  %v2898_v4 = vadd.f32 %v2894_v15, %v2851_v11  ;;  %v2919_v42 = vmul.f32 %v6022_v51, %v2902_v56 }
 0x274   :  { %v2920_v27 = vmul.f32 %v6022_v51, %v2906_v44  ;;  %v2930_v37 = vrot.slane %v6281_v52, %v4258_v59  ;;  %v2934_v40 = vrot.slane %v6284_v20, %v4258_v59  ;;  %v2938_v19 = vrot.slane %v6253_v50, %v4258_v59 }
 0x275   :  { %v2942_v17 = vrot.slane %v6256_v24, %v4258_v59  ;;  %v2958_v12 = vrot.slane %v6281_v52, %v4261_v60  ;;  %v2962_v48 = vrot.slane %v6284_v20, %v4261_v60  ;;  %v2923_v51 = vadd.f32 %v2919_v42, %v2895_v32 }
 0x276   :  { %v2924_v39 = vadd.f32 %v2920_v27, %v2896_v25  ;;  %v2947_v1 = vmul.f32 %v6240_v57, %v2930_v37  ;;  %v2948_v22 = vmul.f32 %v6240_v57, %v2934_v40  ;;  %v2925_v2 = vadd.f32 %v2921_v13, %v2897_v30 }
 0x277   :  { %v2926_v43 = vadd.f32 %v2922_v53, %v2898_v4  ;;  %v2966_v28 = vrot.slane %v6253_v50, %v4261_v60  ;;  %v2970_v8 = vrot.slane %v6256_v24, %v4261_v60  ;;  %v2949_v10 = vmul.f32 %v6240_v57, %v2938_v19 }
 0x278   :  { %v6266_v61 = vpop.permute.xlu1 %2972  ;;  %v2950_v45 = vmul.f32 %v6240_v57, %v2942_v17  ;;  %v3265_v13 = vrot.slane %v6323_v41, %v6942_v7  ;;  %v3269_v53 = vrot.slane %v6326_v18, %v6942_v7  ;;  %v2986_v3 = vrot.slane %v6281_v52, %v7050_v49 }
 0x279   :  { %v2975_v15 = vmul.f32 %v6266_v61, %v2958_v12  ;;  %v2976_v46 = vmul.f32 %v6266_v61, %v2962_v48  ;;  %v2990_v56 = vrot.slane %v6284_v20, %v7050_v49  ;;  %v2951_v63 = vadd.f32 %v2947_v1, %v2923_v51 }
 0x27a   :  { %v2952_v11 = vadd.f32 %v2948_v22, %v2924_v39  ;;  %v2977_v57 = vmul.f32 %v6266_v61, %v2966_v28  ;;  %v2978_v32 = vmul.f32 %v6266_v61, %v2970_v8  ;;  %v6397_v25 = vmul.f32 %v6352_v31, %v3181_v62 }
 0x27b   :  { %v6400_v30 = vmul.f32 %v6352_v31, %v3185_v55  ;;  %v6403_v4 = vmul.f32 %v6380_v21, %v3265_v13  ;;  %v6406_v42 = vmul.f32 %v6380_v21, %v3269_v53  ;;  %v2953_v27 = vadd.f32 %v2949_v10, %v2925_v2  ;;  %v6440_v13 = vpop.permute.xlu0 %3342 }
 0x27c   :  { %v2954_v37 = vadd.f32 %v2950_v45, %v2926_v43  ;;  %v2979_v40 = vadd.f32 %v2975_v15, %v2951_v63  ;;  %v2980_v19 = vadd.f32 %v2976_v46, %v2952_v11  ;;  %v3003_v17 = vmul.f32 %v6094_v23, %v2986_v3 }
 0x27d   :  { %v6290_v35 = vpop.permute.xlu1 %3028  ;;  %v3004_v61 = vmul.f32 %v6094_v23, %v2990_v56  ;;  %v3022_v62 = vrot.slane %v6253_v50, %v6942_v7  ;;  %v3026_v55 = vrot.slane %v6256_v24, %v6942_v7  ;;  %v2981_v48 = vadd.f32 %v2977_v57, %v2953_v27 }
 0x27e   :  { %v2982_v51 = vadd.f32 %v2978_v32, %v2954_v37  ;;  %v3014_v22 = vrot.slane %v6281_v52, %v6942_v7  ;;  %v3018_v23 = vrot.slane %v6284_v20, %v6942_v7  ;;  %v3050_v2 = vrot.slane %v6253_v50, %v4466_v26 }
 0x27f   :  { %v3054_v43 = vrot.slane %v6256_v24, %v4466_v26  ;;  %v3007_v28 = vadd.f32 %v3003_v17, %v2979_v40  ;;  %v3008_v8 = vadd.f32 %v3004_v61, %v2980_v19  ;;  %v3042_v10 = vrot.slane %v6281_v52, %v4466_v26  ;;  %v6468_v61 = vpop.permute.xlu0 %3402 }
 0x280   :  { %v3031_v45 = vmul.f32 %v6290_v35, %v3014_v22  ;;  %v3032_v15 = vmul.f32 %v6290_v35, %v3018_v23  ;;  %v3009_v24 = vadd.f32 %v6339_v9, %v2981_v48  ;;  %v3010_v53 = vadd.f32 %v6342_v16, %v2982_v51 }
 0x281   :  { %v3033_v3 = vmul.f32 %v6290_v35, %v3022_v62  ;;  %v3034_v56 = vmul.f32 %v6290_v35, %v3026_v55  ;;  %v3128_v11 = vrot.slane %v6326_v18, %v7041_v6  ;;  %v3070_v9 = vrot.slane %v6281_v52, %v7054_v29 }
 0x282   :  { %v6312_v54 = vpop.permute.xlu1 %3056  ;;  %v3074_v16 = vrot.slane %v6284_v20, %v7054_v29  ;;  %v3035_v32 = vadd.f32 %v3031_v45, %v3007_v28  ;;  %v3036_v27 = vadd.f32 %v3032_v15, %v3008_v8  ;;  %v3153_v52 = vrot.slane %v6323_v41, %v7040_v5 }
 0x283   :  { %v3059_v63 = vmul.f32 %v6312_v54, %v3042_v10  ;;  %v3061_v35 = vmul.f32 %v6312_v54, %v3050_v2  ;;  %v3062_v57 = vmul.f32 %v6312_v54, %v3054_v43  ;;  %v3037_v19 = vadd.f32 %v3033_v3, %v3009_v24 }
 0x284   :  { %v3038_v17 = vadd.f32 %v3034_v56, %v3010_v53  ;;  %v3209_v55 = vrot.slane %v6323_v41, %v4261_v60  ;;  %v3213_v48 = vrot.slane %v6326_v18, %v4261_v60  ;;  %v3237_v22 = vrot.slane %v6323_v41, %v7050_v49 }
 0x285   :  { %v3063_v62 = vadd.f32 %v3059_v63, %v3035_v32  ;;  %v3241_v23 = vrot.slane %v6326_v18, %v7050_v49  ;;  %v3087_v2 = vmul.f32 %v6238_v38, %v3070_v9  ;;  %v3088_v43 = vmul.f32 %v6238_v38, %v3074_v16  ;;  %v6500_v9 = vpop.permute.xlu0 %3486  ;;  %v6505_v16 = vld [vmem:[%s6825_s0] sm:$0xff] }
 0x287   :  { %v6344_v14 = vpop.permute.xlu1 %3131  ;;  %v3091_v24 = vadd.f32 %v3087_v2, %v3063_v62 }
 0x28b   :  { %v3096_v58 = vpop.permute.xlu1 %3095 }
 0x28f   :  { %v3100_v44 = vpop.permute.xlu1 %3099 }
 0x290   :  { %v3103_v39 = vsel %vm1119_vm6, %v3096_v58, %v3100_v44  ;;  %v3105_v1 = vsel %vm1119_vm6, %v3100_v44, %v3096_v58  ;;  %v3046_v58 = vrot.slane %v6284_v20, %v4466_v26  ;;  %v3157_v20 = vrot.slane %v6326_v18, %v7040_v5 }
 0x291   :  { %v6435_v46 = vmul.f32 %v3103_v39, %v7075_v33  ;;  %v6438_v50 = vmul.f32 %v3105_v1, %v7076_v47  ;;  %v3124_v47 = vrot.slane %v6323_v41, %v7041_v6  ;;  %v3065_v39 = vadd.f32 %v3061_v35, %v3037_v19  ;;  %v6518_v19 = vld [vmem:[%s6825_s0 + $0x8] sm:$0xff]  ;;  %s3985_s0 = smov [#allocation2]  }
 0x292   :  { %v3060_v33 = vmul.f32 %v6312_v54, %v3046_v58  ;;  %v3066_v1 = vadd.f32 %v3062_v57, %v3038_v17  ;;  %v3593_v35 = vrot.slane %v6505_v16, %v7041_v6  ;;  %v3597_v57 = vrot.slane %v6505_v16, %v7050_v49  ;;  %s3796_s11 = sshll.u32 %s3985_s0, 4  ;;  %s3797_s11 = int_to_ptr.vmem [resolvable:$true] %s3796_s11 }
 0x293   :  { %v3116_v37 = vrot.slane %v6435_v46, %v7041_v6  ;;  %v3120_v40 = vrot.slane %v6438_v50, %v7041_v6  ;;  %v3145_v38 = vrot.slane %v6435_v46, %v7040_v5  ;;  %v3149_v3 = vrot.slane %v6438_v50, %v7040_v5  ;;  %s3945_s20 = scalar_lea.vmem %s3797_s11, 512  ;;  %p3950_p1 = scmp.lt.s32.totalorder %s3797_s11, %s3797_s11 }
 0x294   :  { %v6414_v12 = vpop.permute.xlu1 %3159  ;;  %v3064_v54 = vadd.f32 %v3060_v33, %v3036_v27  ;;  %v3093_v56 = vadd.f32 %v6347_v0, %v3065_v39  ;;  %v3094_v63 = vadd.f32 %v6350_v34, %v3066_v1  ;;  %v3136_v32 = vmul.f32 %v6344_v14, %v3124_v47  ;;  %p3946_p0 = scmp.ne.s32.totalorder %s3797_s11, %s3945_s20  ;;  %p3951_p2 = scmp.lt.s32.totalorder %s3945_s20, %s3945_s20 }
 0x295   :  { %v3134_v28 = vmul.f32 %v6344_v14, %v3116_v37  ;;  %v3135_v8 = vmul.f32 %v6344_v14, %v3120_v40  ;;  %v3137_v0 = vmul.f32 %v6344_v14, %v3128_v11  ;;  %v3164_v37 = vmul.f32 %v6414_v12, %v3153_v52 }
 0x296   :  { %v3092_v53 = vadd.f32 %v3088_v43, %v3064_v54  ;;  %v3165_v40 = vmul.f32 %v6414_v12, %v3157_v20  ;;  %v3601_v17 = vrot.slane %v6518_v19, %v7041_v6  ;;  %v3605_v62 = vrot.slane %v6518_v19, %v7050_v49  ;;  %p3952_p3 = por %p3951_p2, %p3950_p1 }
 0x297   :  { %v3138_v34 = vadd.f32 %v3134_v28, %v3091_v24  ;;  %v3162_v47 = vmul.f32 %v6414_v12, %v3145_v38  ;;  %v3163_v14 = vmul.f32 %v6414_v12, %v3149_v3  ;;  %v3173_v11 = vrot.slane %v6435_v46, %v4258_v59  ;;  %v6542_v24 = vpop.permute.xlu0 %3374 }
 0x298   :  { %v3139_v27 = vadd.f32 %v3135_v8, %v3092_v53  ;;  %v3177_v52 = vrot.slane %v6438_v50, %v4258_v59  ;;  %v6531_v20 = vrot.slane %v3593_v35, %v7041_v6  ;;  %v6534_v54 = vrot.slane %v3597_v57, %v7041_v6  ;;  %p3953_p4 = pnand %p3952_p3, %p3946_p0 }
 0x299   :  { %v3642_v39 = vrot.slane %v6505_v16, %v7040_v5  ;;  %v3646_v1 = vrot.slane %v6505_v16, %v6942_v7  ;;  %v3140_v2 = vadd.f32 %v3136_v32, %v3093_v56  ;;  %v3141_v12 = vadd.f32 %v3137_v0, %v3094_v63 }
 0x29a   :  { %v3166_v43 = vadd.f32 %v3162_v47, %v3138_v34  ;;  %v3167_v28 = vadd.f32 %v3163_v14, %v3139_v27  ;;  %v6545_v53 = vrot.slane %v3601_v17, %v7041_v6  ;;  %v6548_v38 = vrot.slane %v3605_v62, %v7041_v6 }
 0x29b   :  { %v6446_v44 = vpop.permute.xlu1 %3215  ;;  %v3650_v3 = vrot.slane %v6518_v19, %v7040_v5  ;;  %v3654_v35 = vrot.slane %v6518_v19, %v6942_v7  ;;  %v3168_v56 = vadd.f32 %v3164_v37, %v3140_v2  ;;  %v3169_v63 = vadd.f32 %v3165_v40, %v3141_v12  ;;  %v6570_v14 = vpop.permute.xlu0 %3585 }
 0x29c   :  { %v3190_v57 = vmul.f32 %v6352_v31, %v3173_v11  ;;  %v3191_v32 = vmul.f32 %v6352_v31, %v3177_v52  ;;  %v6557_v0 = vrot.slane %v3642_v39, %v7040_v5  ;;  %v6560_v34 = vrot.slane %v3646_v1, %v7040_v5 }
 0x29d   :  { %v3690_v27 = vrot.slane %v6505_v16, %v4258_v59  ;;  %v3694_v17 = vrot.slane %v6505_v16, %v4466_v26  ;;  %v3201_v37 = vrot.slane %v6435_v46, %v4261_v60  ;;  %v3205_v31 = vrot.slane %v6438_v50, %v4261_v60 }
 0x29e   :  { %v3194_v62 = vadd.f32 %v3190_v57, %v3166_v43  ;;  %v3195_v47 = vadd.f32 %v3191_v32, %v3167_v28  ;;  %v6573_v11 = vrot.slane %v3650_v3, %v7040_v5  ;;  %v6576_v52 = vrot.slane %v3654_v35, %v7040_v5 }
 0x29f   :  { %v3698_v39 = vrot.slane %v6518_v19, %v4258_v59  ;;  %v3702_v1 = vrot.slane %v6518_v19, %v4466_v26  ;;  %v3196_v2 = vadd.f32 %v6397_v25, %v3168_v56  ;;  %v3197_v12 = vadd.f32 %v6400_v30, %v3169_v63 }
 0x2a0   :  { %v3218_v43 = vmul.f32 %v6446_v44, %v3201_v37  ;;  %v3219_v28 = vmul.f32 %v6446_v44, %v3205_v31  ;;  %v3220_v3 = vmul.f32 %v6446_v44, %v3209_v55  ;;  %v3221_v35 = vmul.f32 %v6446_v44, %v3213_v48 }
 0x2a1   :  { %v6474_v51 = vpop.permute.xlu1 %3243  ;;  %v3229_v57 = vrot.slane %v6435_v46, %v7050_v49  ;;  %v3233_v25 = vrot.slane %v6438_v50, %v7050_v49  ;;  %v3710_v32 = vrot.slane %v3690_v27, %v4258_v59  ;;  %v3714_v37 = vrot.slane %v3694_v17, %v4258_v59 }
 0x2a2   :  { %v3222_v30 = vadd.f32 %v3218_v43, %v3194_v62  ;;  %v3223_v56 = vadd.f32 %v3219_v28, %v3195_v47  ;;  %v3248_v44 = vmul.f32 %v6474_v51, %v3237_v22  ;;  %v3249_v48 = vmul.f32 %v6474_v51, %v3241_v23  ;;  %v3725_v62 = vpop.permute.xlu0 %3724 }
 0x2a3   :  { %v3246_v55 = vmul.f32 %v6474_v51, %v3229_v57  ;;  %v3247_v31 = vmul.f32 %v6474_v51, %v3233_v25  ;;  %v3738_v27 = vrot.slane %v6505_v16, %v4261_v60  ;;  %v3742_v17 = vrot.slane %v6505_v16, %v7054_v29 }
 0x2a4   :  { %v3746_v47 = vrot.slane %v6518_v19, %v4261_v60  ;;  %v3750_v43 = vrot.slane %v6518_v19, %v7054_v29  ;;  %v3224_v28 = vadd.f32 %v3220_v3, %v3196_v2  ;;  %v3225_v22 = vadd.f32 %v3221_v35, %v3197_v12 }
 0x2a5   :  { %v3718_v57 = vrot.slane %v3698_v39, %v4258_v59  ;;  %v3722_v25 = vrot.slane %v3702_v1, %v4258_v59  ;;  %v3257_v51 = vrot.slane %v6435_v46, %v6942_v7  ;;  %v3261_v23 = vrot.slane %v6438_v50, %v6942_v7 }
 0x2a6   :  { %v6498_v33 = vpop.permute.xlu1 %3299  ;;  %v6624_v16 = vmul.f32 %v3725_v62, %v3710_v32  ;;  %v6626_v45 = vmul.f32 %v3725_v62, %v3714_v37  ;;  %v3250_v58 = vadd.f32 %v3246_v55, %v3222_v30  ;;  %v3251_v10 = vadd.f32 %v3247_v31, %v3223_v56  ;;  %v7077_v37 = vld [vmem:[#allocation10_spill] sm:$0xff]  ;;  %v7078_v31 = vld [vmem:[#allocation17_spill] sm:$0xff] }
 0x2a7   :  { %v3252_v19 = vadd.f32 %v3248_v44, %v3224_v28  ;;  %v3253_v2 = vadd.f32 %v3249_v48, %v3225_v22  ;;  %v6639_v35 = vrot.slane %v3738_v27, %v4261_v60  ;;  %v6642_v30 = vrot.slane %v3742_v17, %v4261_v60 }
 0x2a8   :  { %v6645_v56 = vrot.slane %v3746_v47, %v4261_v60  ;;  %v6648_v32 = vrot.slane %v3750_v43, %v4261_v60  ;;  %v3285_v36 = vrot.slane %v6435_v46, %v4466_v26 }
 0x2a9   :  { %v3280_v47 = vadd.f32 %v6403_v4, %v3252_v19  ;;  %v3281_v43 = vadd.f32 %v6406_v42, %v3253_v2  ;;  %v3317_v4 = vrot.slane %v6438_v50, %v7054_v29  ;;  %v6686_v42 = vmul.f32 %v3725_v62, %v3718_v57 }
 0x2aa   :  { %v3302_v28 = vmul.f32 %v6498_v33, %v3285_v36 }
 0x2ab   :  { %v6540_v8 = vpop.permute.xlu1 %3327 }
 0x2ac   :  { %v3331_v57 = vmul.f32 %v6540_v8, %v3317_v4 }
 0x2af   :  { %v3339_v40 = vpop.permute.xlu1 %3338 }
 0x2b0   :  { %v3346_v39 = vsel %vm1264_vm7, %v3339_v40, %v6440_v13  ;;  %v3348_v1 = vsel %vm1264_vm7, %v6440_v13, %v3339_v40  ;;  %v3274_v13 = vmul.f32 %v6380_v21, %v3257_v51  ;;  %v3275_v40 = vmul.f32 %v6380_v21, %v3261_v23 }
 0x2b1   :  { %v6659_v55 = vmul.f32 %v3346_v39, %v7077_v37  ;;  %v6662_v44 = vmul.f32 %v3348_v1, %v7078_v31  ;;  %v7079_v51 = vrot.slane %v6323_v41, %v4466_v26  ;;  %v7080_v39 = vrot.slane %v6326_v18, %v4466_v26 }
 0x2b2   :  { %v3278_v21 = vadd.f32 %v3274_v13, %v3250_v58  ;;  %v3279_v17 = vadd.f32 %v3275_v40, %v3251_v10  ;;  %v3313_v10 = vrot.slane %v6435_v46, %v7054_v29  ;;  %v6688_v58 = vmul.f32 %v3725_v62, %v3722_v25 }
 0x2b3   :  { %v3341_v63 = vpop.permute.xlu1 %3340  ;;  %v3304_v23 = vmul.f32 %v6498_v33, %v7079_v51  ;;  %v3305_v1 = vmul.f32 %v6498_v33, %v7080_v39  ;;  %v3359_v19 = vrot.slane %v6659_v55, %v7041_v6  ;;  %v3363_v2 = vrot.slane %v6662_v44, %v7041_v6 }
 0x2b4   :  { %v7081_v62 = vrot.slane %v6323_v41, %v7054_v29  ;;  %v3306_v40 = vadd.f32 %v3302_v28, %v3278_v21  ;;  %v3388_v41 = vrot.slane %v6659_v55, %v7040_v5  ;;  %v3392_v51 = vrot.slane %v6662_v44, %v7040_v5 }
 0x2b5   :  { %v3420_v4 = vrot.slane %v6662_v44, %v4258_v59 }
 0x2b6   :  { %v3332_v25 = vmul.f32 %v6540_v8, %v7081_v62 }
 0x2b7   :  { %v3345_v15 = vpop.permute.xlu1 %3344 }
 0x2b8   :  { %v3347_v12 = vsel %vm1264_vm7, %v3341_v63, %v3345_v15  ;;  %v3349_v3 = vsel %vm1264_vm7, %v3345_v15, %v3341_v63  ;;  %v3289_v15 = vrot.slane %v6438_v50, %v4466_v26  ;;  %v3330_v50 = vmul.f32 %v6540_v8, %v3313_v10 }
 0x2b9   :  { %v6665_v48 = vmul.f32 %v3347_v12, %v7077_v37  ;;  %v6668_v27 = vmul.f32 %v3349_v3, %v7078_v31  ;;  %v7082_v3 = vrot.slane %v6326_v18, %v7054_v29  ;;  %v3472_v37 = vrot.slane %v6659_v55, %v7050_v49 }
 0x2ba   :  { %v3303_v22 = vmul.f32 %v6498_v33, %v3289_v15  ;;  %v3308_v15 = vadd.f32 %v3304_v23, %v3280_v47  ;;  %v3476_v31 = vrot.slane %v6662_v44, %v7050_v49  ;;  %v3377_v18 = vmul.f32 %v6542_v24, %v3359_v19 }
 0x2bb   :  { %v6656_v63 = vpop.permute.xlu1 %3430  ;;  %v3367_v12 = vrot.slane %v6665_v48, %v7041_v6  ;;  %v3371_v33 = vrot.slane %v6668_v27, %v7041_v6  ;;  %v3333_v13 = vmul.f32 %v6540_v8, %v7082_v3  ;;  %v3309_v6 = vadd.f32 %v3305_v1, %v3281_v43 }
 0x2bc   :  { %v3307_v36 = vadd.f32 %v3303_v22, %v3279_v17  ;;  %v3378_v8 = vmul.f32 %v6542_v24, %v3363_v2  ;;  %v3334_v47 = vadd.f32 %v3330_v50, %v3306_v40  ;;  %v3336_v28 = vadd.f32 %v3332_v25, %v3308_v15 }
 0x2bd   :  { %v3379_v21 = vmul.f32 %v6542_v24, %v3367_v12  ;;  %v3380_v17 = vmul.f32 %v6542_v24, %v3371_v33  ;;  %v3337_v22 = vadd.f32 %v3333_v13, %v3309_v6  ;;  %v3396_v39 = vrot.slane %v6665_v48, %v7040_v5 }
 0x2be   :  { %v3335_v43 = vadd.f32 %v3331_v57, %v3307_v36  ;;  %v3400_v1 = vrot.slane %v6668_v27, %v7040_v5  ;;  %v3416_v10 = vrot.slane %v6659_v55, %v4258_v59  ;;  %v6731_v19 = vmul.f32 %v6500_v9, %v3472_v37 }
 0x2bf   :  { %v6734_v24 = vmul.f32 %v6500_v9, %v3476_v31  ;;  %v3405_v2 = vmul.f32 %v6468_v61, %v3388_v41  ;;  %v3406_v12 = vmul.f32 %v6468_v61, %v3392_v51  ;;  %v3381_v33 = vadd.f32 %v3377_v18, %v3334_v47 }
 0x2c0   :  { %v6698_v46 = vpop.permute.xlu1 %3458  ;;  %v3382_v50 = vadd.f32 %v3378_v8, %v3335_v43  ;;  %v3383_v57 = vadd.f32 %v3379_v21, %v3336_v28  ;;  %v3384_v5 = vadd.f32 %v3380_v17, %v3337_v22  ;;  %v3424_v62 = vrot.slane %v6665_v48, %v4258_v59 }
 0x2c1   :  { %v3428_v25 = vrot.slane %v6668_v27, %v4258_v59  ;;  %v3444_v3 = vrot.slane %v6659_v55, %v4261_v60  ;;  %v3448_v13 = vrot.slane %v6662_v44, %v4261_v60  ;;  %v3407_v40 = vmul.f32 %v6468_v61, %v3396_v39 }
 0x2c2   :  { %v3408_v36 = vmul.f32 %v6468_v61, %v3400_v1  ;;  %v3433_v15 = vmul.f32 %v6656_v63, %v3416_v10  ;;  %v3434_v6 = vmul.f32 %v6656_v63, %v3420_v4  ;;  %v3500_v31 = vrot.slane %v6659_v55, %v6942_v7 }
 0x2c3   :  { %v3504_v59 = vrot.slane %v6662_v44, %v6942_v7  ;;  %v3528_v41 = vrot.slane %v6659_v55, %v4466_v26  ;;  %v3532_v51 = vrot.slane %v6662_v44, %v4466_v26  ;;  %v3409_v18 = vadd.f32 %v3405_v2, %v3381_v33 }
 0x2c4   :  { %v3410_v8 = vadd.f32 %v3406_v12, %v3382_v50  ;;  %v3411_v61 = vadd.f32 %v3407_v40, %v3383_v57  ;;  %v3412_v21 = vadd.f32 %v3408_v36, %v3384_v5  ;;  %v3480_v17 = vrot.slane %v6665_v48, %v7050_v49 }
 0x2c5   :  { %v3629_v23 = vpop.permute.xlu1 %3628  ;;  %v3484_v47 = vrot.slane %v6668_v27, %v7050_v49  ;;  %v3556_v43 = vrot.slane %v6659_v55, %v7054_v29  ;;  %v3560_v28 = vrot.slane %v6662_v44, %v7054_v29  ;;  %v3435_v22 = vmul.f32 %v6656_v63, %v3424_v62 }
 0x2c6   :  { %v3436_v39 = vmul.f32 %v6656_v63, %v3428_v25  ;;  %v3437_v1 = vadd.f32 %v3433_v15, %v3409_v18  ;;  %v3438_v10 = vadd.f32 %v3434_v6, %v3410_v8  ;;  %v3452_v4 = vrot.slane %v6665_v48, %v4261_v60 }
 0x2c7   :  { %v3456_v2 = vrot.slane %v6668_v27, %v4261_v60  ;;  %v3461_v49 = vmul.f32 %v6698_v46, %v3444_v3  ;;  %v3462_v12 = vmul.f32 %v6698_v46, %v3448_v13  ;;  %v3439_v33 = vadd.f32 %v3435_v22, %v3411_v61 }
 0x2c8   :  { %v3440_v50 = vadd.f32 %v3436_v39, %v3412_v21  ;;  %v3508_v44 = vrot.slane %v6665_v48, %v6942_v7  ;;  %v3512_v63 = vrot.slane %v6668_v27, %v6942_v7  ;;  %v3463_v57 = vmul.f32 %v6698_v46, %v3452_v4 }
 0x2c9   :  { %v3464_v5 = vmul.f32 %v6698_v46, %v3456_v2  ;;  %v3491_v62 = vmul.f32 %v6500_v9, %v3480_v17  ;;  %v3492_v60 = vmul.f32 %v6500_v9, %v3484_v47  ;;  %v3631_v25 = vmul.f32 %v3629_v23, %v6531_v20 }
 0x2ca   :  { %v3515_v37 = vpop.permute.xlu1 %3514  ;;  %v3632_v3 = vmul.f32 %v3629_v23, %v6534_v54  ;;  %v3633_v13 = vmul.f32 %v3629_v23, %v6545_v53  ;;  %v3634_v40 = vmul.f32 %v3629_v23, %v6548_v38  ;;  %v3465_v36 = vadd.f32 %v3461_v49, %v3437_v1 }
 0x2cb   :  { %v3466_v15 = vadd.f32 %v3462_v12, %v3438_v10  ;;  %v3536_v7 = vrot.slane %v6665_v48, %v4466_v26  ;;  %v3540_v46 = vrot.slane %v6668_v27, %v4466_v26  ;;  %v3467_v6 = vadd.f32 %v3463_v57, %v3439_v33 }
 0x2cc   :  { %v3468_v18 = vadd.f32 %v3464_v5, %v3440_v50  ;;  %v3564_v9 = vrot.slane %v6665_v48, %v7054_v29  ;;  %v3568_v20 = vrot.slane %v6668_v27, %v7054_v29  ;;  %v3635_v61 = vadd.f32 %v3631_v25, %v6570_v14 }
 0x2cd   :  { %v3636_v26 = vadd.f32 %v3632_v3, %v6570_v14  ;;  %v3637_v21 = vadd.f32 %v3633_v13, %v6570_v14  ;;  %v3638_v17 = vadd.f32 %v3634_v40, %v6570_v14  ;;  %v3517_v48 = vmul.f32 %v3515_v37, %v3500_v31 }
 0x2ce   :  { %v3518_v47 = vmul.f32 %v3515_v37, %v3504_v59  ;;  %v3519_v22 = vmul.f32 %v3515_v37, %v3508_v44  ;;  %v3520_v29 = vmul.f32 %v3515_v37, %v3512_v63  ;;  %v3495_v27 = vadd.f32 %v3491_v62, %v3467_v6 }
 0x2cf   :  { %v3677_v55 = vpop.permute.xlu1 %3676 }
 0x2d0   :  { %v3679_v54 = vmul.f32 %v3677_v55, %v6557_v0  ;;  %v3680_v53 = vmul.f32 %v3677_v55, %v6560_v34  ;;  %v3681_v38 = vmul.f32 %v3677_v55, %v6573_v11  ;;  %v3682_v23 = vmul.f32 %v3677_v55, %v6576_v52 }
 0x2d1   :  { %v3493_v0 = vadd.f32 %v6731_v19, %v3465_v36  ;;  %v3494_v34 = vadd.f32 %v6734_v24, %v3466_v15  ;;  %v3496_v11 = vadd.f32 %v3492_v60, %v3468_v18  ;;  %v3523_v59 = vadd.f32 %v3519_v22, %v3495_v27 }
 0x2d2   :  { %v3683_v39 = vadd.f32 %v3679_v54, %v3635_v61  ;;  %v3684_v52 = vadd.f32 %v3680_v53, %v3636_v26  ;;  %v3685_v1 = vadd.f32 %v3681_v38, %v3637_v21  ;;  %v3686_v10 = vadd.f32 %v3682_v23, %v3638_v17 }
 0x2d3   :  { %v3521_v14 = vadd.f32 %v3517_v48, %v3493_v0  ;;  %v3522_v31 = vadd.f32 %v3518_v47, %v3494_v34  ;;  %v3524_v33 = vadd.f32 %v3520_v29, %v3496_v11 }
 0x2d4   :  { %v3543_v8 = vpop.permute.xlu1 %3542  ;;  %v3731_v24 = vadd.f32 %v6624_v16, %v3683_v39  ;;  %v3732_v63 = vadd.f32 %v6626_v45, %v3684_v52  ;;  %v3733_v57 = vadd.f32 %v6686_v42, %v3685_v1  ;;  %v3734_v5 = vadd.f32 %v6688_v58, %v3686_v10 }
 0x2d5   :  { %v3545_v2 = vmul.f32 %v3543_v8, %v3528_v41  ;;  %v3546_v49 = vmul.f32 %v3543_v8, %v3532_v51  ;;  %v3547_v12 = vmul.f32 %v3543_v8, %v3536_v7  ;;  %v3548_v55 = vmul.f32 %v3543_v8, %v3540_v46 }
 0x2d7   :  { %v3549_v41 = vadd.f32 %v3545_v2, %v3521_v14  ;;  %v3550_v51 = vadd.f32 %v3546_v49, %v3522_v31  ;;  %v3551_v62 = vadd.f32 %v3547_v12, %v3523_v59  ;;  %v3552_v60 = vadd.f32 %v3548_v55, %v3524_v33 }
 0x2d9   :  { %v3571_v4 = vpop.permute.xlu1 %3570 }
 0x2da   :  { %v3573_v37 = vmul.f32 %v3571_v4, %v3556_v43  ;;  %v3574_v50 = vmul.f32 %v3571_v4, %v3560_v28  ;;  %v3575_v19 = vmul.f32 %v3571_v4, %v3564_v9  ;;  %v3576_v44 = vmul.f32 %v3571_v4, %v3568_v20 }
 0x2dc   :  { %v3577_v16 = vadd.f32 %v3573_v37, %v3549_v41  ;;  %v3578_v40 = vadd.f32 %v3574_v50, %v3550_v51  ;;  %v3579_v45 = vadd.f32 %v3575_v19, %v3551_v62  ;;  %v3580_v36 = vadd.f32 %v3576_v44, %v3552_v60 }
 0x2de   :  { %v3773_v25 = vpop.permute.xlu1 %3772 }
 0x2df   :  { %v3775_v3 = vmul.f32 %v3773_v25, %v6639_v35  ;;  %v3776_v43 = vmul.f32 %v3773_v25, %v6642_v30  ;;  %v3777_v28 = vmul.f32 %v3773_v25, %v6645_v56  ;;  %v3778_v13 = vmul.f32 %v3773_v25, %v6648_v32 }
 0x2e1   :  { %v3779_v42 = vadd.f32 %v3775_v3, %v3731_v24  ;;  %v3780_v58 = vadd.f32 %v3776_v43, %v3732_v63  ;;  %v3781_v15 = vadd.f32 %v3777_v28, %v3733_v57  ;;  %v3782_v7 = vadd.f32 %v3778_v13, %v3734_v5 }
 0x2e3   :  { %v3783_v46 = vadd.f32 %v3779_v42, %v3577_v16  ;;  %v3784_v6 = vadd.f32 %v3780_v58, %v3578_v40  ;;  %v3785_v18 = vadd.f32 %v3781_v15, %v3579_v45  ;;  %v3786_v35 = vadd.f32 %v3782_v7, %v3580_v36 }
 0x2e5   :  { %3787 = vst [vmem:[#allocation2] sm:$0xff] %v3783_v46  ;;  %3788 = vst [vmem:[#allocation2 + $0x8] sm:$0xff] %v3784_v6 }
 0x2e6   :  { %3789 = vst [vmem:[#allocation2 + $0x10] sm:$0xff] %v3785_v18  ;;  %3790 = vst [vmem:[#allocation2 + $0x18] sm:$0xff] %v3786_v35 }
 0x2e7   :  { %3956 = shalt.err (!%p3953_p4)
}
 0x2e8   :  { %s3957_s23 = scalar_lea.hbm %s6833_s8, 512 }
 0x2e9   :  { %p3958_p5 = scmp.ne.s32.totalorder %s6833_s8, %s3957_s23  ;;  %p3961_p6 = scmp.lt.u32.totalorder %s3957_s23, %s6833_s8 }
 0x2eb   :  { %p3963_p7 = pnand %p3961_p6, %p3958_p5 }
 0x2ed   :  { %3966 = shalt.err (!%p3963_p7)
}
 0x2ee   :  { %s3986_s28 = smov 256  }
 0x2ef   :  { %3802 = dma.vmem_to_hbm [thread:$0]  %s3797_s11, 512, %s6833_s8, [#allocation3], %s3986_s28, %s3986_s28, %s3972_s13  }
 0x2f0   :  { %3967 = dma.done.wait [#allocation3], 512  }
 0x2f1   :  { %3968 = vsyncadd [#allocation3], 4294966784 }
 0x2f2   :  { %3806 = vsyncpa [#allocation3], 1 }

</bundles_post_ra>
